<compile_context>
chip_gen: v7x
topology: tpu7x:2x2x1
jax: 0.10.0
libtpu: 0.0.40
codegen_flags: <defaults>
</compile_context>

<pallas_src>
import jax
import jax.numpy as jnp
from jax.experimental import pallas as pl
from jax.experimental.pallas import tpu as pltpu


# ----------------------------------------------------------------------------
# Pallas kernels
# ----------------------------------------------------------------------------
def _gemm_bias_relu_kernel(x_ref, w_ref, b_ref, o_ref):
    """y = relu(x @ w + b); f32 accumulate / bias / ReLU, bf16 output tile."""
    y = jnp.dot(x_ref[...], w_ref[...],
                preferred_element_type=jnp.float32) + b_ref[...]
    o_ref[...] = jnp.maximum(y, 0.0).astype(o_ref.dtype)


def gemm_bias_relu(x, w, b):
    """x: (M, K) bf16, w: (K, N) bf16, b: (1, N) f32 -> (M, N) bf16."""
    M, K = x.shape
    _, N = w.shape
    return pl.pallas_call(
        _gemm_bias_relu_kernel,
        out_shape=jax.ShapeDtypeStruct((M, N), jnp.bfloat16),
        grid=(1,),
        in_specs=[
            pl.BlockSpec((M, K), lambda i: (0, 0)),
            pl.BlockSpec((K, N), lambda i: (0, 0)),
            pl.BlockSpec((1, N), lambda i: (0, 0)),
        ],
        out_specs=pl.BlockSpec((M, N), lambda i: (0, 0)),
        compiler_params=pltpu.CompilerParams(
            dimension_semantics=("arbitrary",)),
    )(x, w, b)


def _mlp_head_kernel(x_ref, w1_ref, b1_ref, w2_ref, b2_ref, w3_ref, b3_ref,
                     wm_ref, bm_ref, mu_ref, logit_ref, lp_ref, acc_ref):
    """Fused l1 (K-streamed) -> l2 -> l3 -> mu head -> softmax / log_prob."""
    k = pl.program_id(0)

    @pl.when(k == 0)
    def _():
        acc_ref[...] = jnp.zeros_like(acc_ref)

    # l1 partial GEMM for this K chunk (bf16 operands streamed, f32 acc in VMEM).
    acc_ref[...] += jnp.dot(x_ref[...], w1_ref[...],
                            preferred_element_type=jnp.float32)

    @pl.when(k == pl.num_programs(0) - 1)
    def _():
        # All intermediate activations live in vregs/VMEM only (never hit HBM).
        h1 = jnp.maximum(acc_ref[...] + b1_ref[...], 0.0)          # (1, 512) f32
        h2 = jnp.maximum(
            jnp.dot(h1.astype(jnp.bfloat16), w2_ref[...],
                    preferred_element_type=jnp.float32) + b2_ref[...], 0.0)
        h3 = jnp.maximum(
            jnp.dot(h2.astype(jnp.bfloat16), w3_ref[...],
                    preferred_element_type=jnp.float32) + b3_ref[...], 0.0)
        logits = jnp.dot(h3.astype(jnp.bfloat16), wm_ref[...],
                         preferred_element_type=jnp.float32) + bm_ref[...]

        # Softmax over the action dimension (f32 throughout).
        m = jnp.max(logits, axis=-1, keepdims=True)
        z = logits - m                                             # shifted logits
        e = jnp.exp(z)
        mu = e / jnp.sum(e, axis=-1, keepdims=True)
        mu_ref[...] = mu
        logit_ref[...] = z                                         # for sampling

        # NOTE: matches the PyTorch code exactly -- log_softmax is applied to
        # the probabilities mu (not the logits), then summed over the last
        # axis.  mu is in [0, 1] so no max-shift is needed.
        lse = jnp.log(jnp.sum(jnp.exp(mu), axis=-1, keepdims=True))
        lp_ref[...] = jnp.sum(mu - lse, axis=-1, keepdims=True)


def mlp_head_pallas(x, p, *, tk=1408):
    """x: (1, 7040) bf16 flattened conv features.  Returns mu, shifted logits
    and the summed log_softmax(mu) -- all computed in one launch.  Only l1w is
    streamed (5 x (1408, 512) bf16 chunks); l2w/l3w/muw stay VMEM-resident."""
    K = p['l1w'].shape[0]
    assert x.shape == (1, K) and K % tk == 0 and tk % 128 == 0
    n_k = K // tk
    H1 = p['l1w'].shape[1]
    H2 = p['l2w'].shape[1]
    H3 = p['l3w'].shape[1]
    A = p['muw'].shape[1]
    return pl.pallas_call(
        _mlp_head_kernel,
        out_shape=(jax.ShapeDtypeStruct((1, A), jnp.float32),   # mu
                   jax.ShapeDtypeStruct((1, A), jnp.float32),   # shifted logits
                   jax.ShapeDtypeStruct((1, 1), jnp.float32)),  # log_prob
        grid=(n_k,),
        in_specs=[
            pl.BlockSpec((1, tk), lambda k: (0, k)),       # x chunk
            pl.BlockSpec((tk, H1), lambda k: (k, 0)),      # l1w chunk (streamed)
            pl.BlockSpec((1, H1), lambda k: (0, 0)),       # l1b
            pl.BlockSpec((H1, H2), lambda k: (0, 0)),      # l2w (resident)
            pl.BlockSpec((1, H2), lambda k: (0, 0)),       # l2b
            pl.BlockSpec((H2, H3), lambda k: (0, 0)),      # l3w (resident)
            pl.BlockSpec((1, H3), lambda k: (0, 0)),       # l3b
            pl.BlockSpec((H3, A), lambda k: (0, 0)),       # muw (resident)
            pl.BlockSpec((1, A), lambda k: (0, 0)),        # mub
        ],
        out_specs=(pl.BlockSpec((1, A), lambda k: (0, 0)),
                   pl.BlockSpec((1, A), lambda k: (0, 0)),
                   pl.BlockSpec((1, 1), lambda k: (0, 0))),
        scratch_shapes=[pltpu.VMEM((1, H1), jnp.float32)],
        compiler_params=pltpu.CompilerParams(
            dimension_semantics=("arbitrary",),
            vmem_limit_bytes=32 * 1024 * 1024),
    )(x, p['l1w'], p['l1b'], p['l2w'], p['l2b'],
      p['l3w'], p['l3b'], p['muw'], p['mub'])


# ----------------------------------------------------------------------------
# Glue: NHWC im2col (strided slices + lane-dim concat only, no transposes)
# ----------------------------------------------------------------------------
def im2col_nhwc(x, kh, kw, stride, pad):
    N, H, W, C = x.shape
    xp = jnp.pad(x, ((0, 0), (pad, pad), (pad, pad), (0, 0)))
    Ho = (H + 2 * pad - kh) // stride + 1
    Wo = (W + 2 * pad - kw) // stride + 1
    cols = []
    for i in range(kh):
        for j in range(kw):
            cols.append(xp[:,
                           i:i + stride * (Ho - 1) + 1:stride,
                           j:j + stride * (Wo - 1) + 1:stride,
                           :])
    p = jnp.concatenate(cols, axis=-1)                 # (N, Ho, Wo, kh*kw*C)
    return p.reshape(N * Ho * Wo, kh * kw * C), Ho, Wo


def conv2d_relu_pallas(x, w_mat, b, *, kh, kw, stride, pad):
    """x: (N, H, W, Cin) NHWC bf16.  w_mat: (kh*kw*Cin, Cout) bf16, tap-major."""
    N = x.shape[0]
    Cout = w_mat.shape[1]
    patches, Ho, Wo = im2col_nhwc(x, kh, kw, stride, pad)
    y = gemm_bias_relu(patches, w_mat, b)              # (N*Ho*Wo, Cout) bf16
    return y.reshape(N, Ho, Wo, Cout)                  # stays NHWC, bf16


# ----------------------------------------------------------------------------
# Parameters (deterministic, PyTorch-default-style uniform init; bf16 weights)
# ----------------------------------------------------------------------------
def _uniform(key, shape, bound):
    return jax.random.uniform(key, shape, jnp.float32, -bound, bound)


def init_actor_params(key, action_size):
    ks = jax.random.split(key, 14)
    p = {}

    def conv_init(kw_, kb, cin, cout, k):
        bound = 1.0 / (cin * k * k) ** 0.5
        w = _uniform(kw_, (k * k * cin, cout), bound)   # (kh*kw*Cin, Cout)
        return w.astype(jnp.bfloat16), _uniform(kb, (1, cout), bound)

    def lin_init(kw_, kb, fin, fout, bound=None):
        if bound is None:
            bound = 1.0 / fin ** 0.5
        w = _uniform(kw_, (fin, fout), bound)           # stored as (K, N)
        return w.astype(jnp.bfloat16), _uniform(kb, (1, fout), bound)

    p['c1w'], p['c1b'] = conv_init(ks[0], ks[1], 1, 32, 8)
    p['c2w'], p['c2b'] = conv_init(ks[2], ks[3], 32, 64, 4)
    p['c3w'], p['c3b'] = conv_init(ks[4], ks[5], 64, 64, 3)
    # l1 rows are in NHWC (h, w, c) flatten order; kept UNPADDED at 7040 rows
    # (7040 = 5 * 1408, lane-aligned chunks) so no wrapper-side jnp.pad exists.
    p['l1w'], p['l1b'] = lin_init(ks[6], ks[7], 64 * 11 * 10, 512)
    p['l2w'], p['l2b'] = lin_init(ks[8], ks[9], 512, 128)
    p['l3w'], p['l3b'] = lin_init(ks[10], ks[11], 128, 32)
    # initialize_uniformly(mu_layer, 0.003)
    p['muw'], p['mub'] = lin_init(ks[12], ks[13], 32, action_size, bound=0.003)
    return p


# ----------------------------------------------------------------------------
# Actor forward
# ----------------------------------------------------------------------------
@jax.jit
def actor_forward(params, state, sample_key):
    # state: (1, 1, 90, 82) NCHW (PyTorch layout) -> NHWC bf16 once, stay NHWC.
    x = jnp.transpose(state, (0, 2, 3, 1)).astype(jnp.bfloat16)    # (1, 90, 82, 1)
    x = conv2d_relu_pallas(x, params['c1w'], params['c1b'], kh=8, kw=8, stride=4, pad=1)
    x = conv2d_relu_pallas(x, params['c2w'], params['c2b'], kh=4, kw=4, stride=2, pad=1)
    x = conv2d_relu_pallas(x, params['c3w'], params['c3b'], kh=3, kw=3, stride=1, pad=1)
    n = x.shape[0]
    x = x.reshape(n, -1)                                           # (1, 7040) bf16

    mu, shifted_logits, log_prob = mlp_head_pallas(x, params)
    mu = mu[0]                          # .squeeze(0): (action_size,)
    log_prob = log_prob[0, 0]           # scalar, like torch's .sum(dim=-1)
    # TODO(synk): torch's mu.multinomial(1) uses an unseeded global RNG; here
    # the categorical sample is drawn deterministically from the (equivalent)
    # max-shifted logits with jax.random.
    action = jax.random.categorical(sample_key, shifted_logits[0]).reshape(1)
    return action, log_prob, mu


if __name__ == "__main__":
    action_size = 4
    key = jax.random.PRNGKey(0)
    pkey, xkey, skey = jax.random.split(key, 3)

    params = init_actor_params(pkey, action_size)
    # Input spatial size is fixed by Linear(64*11*10): (1, 1, 90, 82) NCHW.
    state = jax.random.uniform(xkey, (1, 1, 90, 82), jnp.float32)

    action, log_prob, mu = actor_forward(params, state, skey)
    jax.block_until_ready((action, log_prob, mu))

    assert action.shape == (1,)
    assert log_prob.shape == ()
    assert mu.shape == (action_size,)
    assert abs(float(jnp.sum(mu)) - 1.0) < 1e-5
    print("KERNEL_OK")
</pallas_src>

<mosaic_0001>
module attributes {stable_mosaic.version = 11 : i64} {
  func.func @_gemm_bias_relu_kernel(%arg0: i32, %arg1: memref<440x64xbf16, #tpu.memory_space<vmem>>, %arg2: memref<64x32xbf16, #tpu.memory_space<vmem>>, %arg3: memref<1x32xf32, #tpu.memory_space<vmem>>, %arg4: memref<440x32xbf16, #tpu.memory_space<vmem>>) attributes {dimension_semantics = [#tpu.dimension_semantics<arbitrary>], iteration_bounds = array<i64: 1>, scalar_prefetch = 0 : i64, scratch_operands = 0 : i64, tpu.core_type = #tpu.core_type<tc>, window_params = [{pipeline_mode = #tpu.pipeline_mode<synchronous>, transform_indices = @transform_0, window_bounds = array<i64: 440, 64>}, {pipeline_mode = #tpu.pipeline_mode<synchronous>, transform_indices = @transform_1, window_bounds = array<i64: 64, 32>}, {pipeline_mode = #tpu.pipeline_mode<synchronous>, transform_indices = @transform_2, window_bounds = array<i64: 1, 32>}, {pipeline_mode = #tpu.pipeline_mode<synchronous>, transform_indices = @transform_3, window_bounds = array<i64: 440, 32>}]} {
    %c0 = arith.constant 0 : index
    %c0_0 = arith.constant 0 : index
    %0 = vector.load %arg1[%c0, %c0_0] : memref<440x64xbf16, #tpu.memory_space<vmem>>, vector<440x64xbf16>
    %c0_1 = arith.constant 0 : index
    %c0_2 = arith.constant 0 : index
    %1 = vector.load %arg2[%c0_1, %c0_2] : memref<64x32xbf16, #tpu.memory_space<vmem>>, vector<64x32xbf16>
    %cst = arith.constant dense<0.000000e+00> : vector<440x32xf32>
    %2 = tpu.matmul %0, %1, %cst {dimension_numbers = #tpu.dot_dimension_numbers<[1], [0], [0], [1], [0, 0, 1, 1], [], []>} : vector<440x64xbf16>, vector<64x32xbf16>, vector<440x32xf32> -> vector<440x32xf32>
    %c0_3 = arith.constant 0 : index
    %c0_4 = arith.constant 0 : index
    %3 = vector.load %arg3[%c0_3, %c0_4] : memref<1x32xf32, #tpu.memory_space<vmem>>, vector<1x32xf32>
    %4 = vector.broadcast %3 : vector<1x32xf32> to vector<440x32xf32>
    %5 = arith.addf %2, %4 : vector<440x32xf32>
    %cst_5 = arith.constant 0.000000e+00 : f32
    %6 = vector.broadcast %cst_5 : f32 to vector<440x32xf32>
    %7 = arith.maximumf %5, %6 : vector<440x32xf32>
    %8 = arith.truncf %7 : vector<440x32xf32> to vector<440x32xbf16>
    %c0_6 = arith.constant 0 : index
    %c0_7 = arith.constant 0 : index
    %9 = vector.load %arg4[%c0_6, %c0_7] : memref<440x32xbf16, #tpu.memory_space<vmem>>, vector<440x32xbf16>
    tpu.vector_store %arg4[%c0_6, %c0_7], %8 {strides = array<i32>} : memref<440x32xbf16, #tpu.memory_space<vmem>>, vector<440x32xbf16>,
    return
  }
  func.func @transform_0(%arg0: i32) -> (i32, i32) {
    %c0_i32 = arith.constant 0 : i32
    %c0_i32_0 = arith.constant 0 : i32
    %c0_i32_1 = arith.constant 0 : i32
    return %c0_i32, %c0_i32_0 : i32, i32
  }
  func.func @transform_1(%arg0: i32) -> (i32, i32) {
    %c0_i32 = arith.constant 0 : i32
    %c0_i32_0 = arith.constant 0 : i32
    %c0_i32_1 = arith.constant 0 : i32
    return %c0_i32, %c0_i32_0 : i32, i32
  }
  func.func @transform_2(%arg0: i32) -> (i32, i32) {
    %c0_i32 = arith.constant 0 : i32
    %c0_i32_0 = arith.constant 0 : i32
    %c0_i32_1 = arith.constant 0 : i32
    return %c0_i32, %c0_i32_0 : i32, i32
  }
  func.func @transform_3(%arg0: i32) -> (i32, i32) {
    %c0_i32 = arith.constant 0 : i32
    %c0_i32_0 = arith.constant 0 : i32
    %c0_i32_1 = arith.constant 0 : i32
    return %c0_i32, %c0_i32_0 : i32, i32
  }
}

module attributes {stable_mosaic.version = 11 : i64} {
  func.func @_gemm_bias_relu_kernel(%arg0: i32, %arg1: memref<110x512xbf16, #tpu.memory_space<vmem>>, %arg2: memref<512x64xbf16, #tpu.memory_space<vmem>>, %arg3: memref<1x64xf32, #tpu.memory_space<vmem>>, %arg4: memref<110x64xbf16, #tpu.memory_space<vmem>>) attributes {dimension_semantics = [#tpu.dimension_semantics<arbitrary>], iteration_bounds = array<i64: 1>, scalar_prefetch = 0 : i64, scratch_operands = 0 : i64, tpu.core_type = #tpu.core_type<tc>, window_params = [{pipeline_mode = #tpu.pipeline_mode<synchronous>, transform_indices = @transform_0, window_bounds = array<i64: 110, 512>}, {pipeline_mode = #tpu.pipeline_mode<synchronous>, transform_indices = @transform_1, window_bounds = array<i64: 512, 64>}, {pipeline_mode = #tpu.pipeline_mode<synchronous>, transform_indices = @transform_2, window_bounds = array<i64: 1, 64>}, {pipeline_mode = #tpu.pipeline_mode<synchronous>, transform_indices = @transform_3, window_bounds = array<i64: 110, 64>}]} {
    %c0 = arith.constant 0 : index
    %c0_0 = arith.constant 0 : index
    %0 = vector.load %arg1[%c0, %c0_0] : memref<110x512xbf16, #tpu.memory_space<vmem>>, vector<110x512xbf16>
    %c0_1 = arith.constant 0 : index
    %c0_2 = arith.constant 0 : index
    %1 = vector.load %arg2[%c0_1, %c0_2] : memref<512x64xbf16, #tpu.memory_space<vmem>>, vector<512x64xbf16>
    %cst = arith.constant dense<0.000000e+00> : vector<110x64xf32>
    %2 = tpu.matmul %0, %1, %cst {dimension_numbers = #tpu.dot_dimension_numbers<[1], [0], [0], [1], [0, 0, 1, 1], [], []>} : vector<110x512xbf16>, vector<512x64xbf16>, vector<110x64xf32> -> vector<110x64xf32>
    %c0_3 = arith.constant 0 : index
    %c0_4 = arith.constant 0 : index
    %3 = vector.load %arg3[%c0_3, %c0_4] : memref<1x64xf32, #tpu.memory_space<vmem>>, vector<1x64xf32>
    %4 = vector.broadcast %3 : vector<1x64xf32> to vector<110x64xf32>
    %5 = arith.addf %2, %4 : vector<110x64xf32>
    %cst_5 = arith.constant 0.000000e+00 : f32
    %6 = vector.broadcast %cst_5 : f32 to vector<110x64xf32>
    %7 = arith.maximumf %5, %6 : vector<110x64xf32>
    %8 = arith.truncf %7 : vector<110x64xf32> to vector<110x64xbf16>
    %c0_6 = arith.constant 0 : index
    %c0_7 = arith.constant 0 : index
    %9 = vector.load %arg4[%c0_6, %c0_7] : memref<110x64xbf16, #tpu.memory_space<vmem>>, vector<110x64xbf16>
    tpu.vector_store %arg4[%c0_6, %c0_7], %8 {strides = array<i32>} : memref<110x64xbf16, #tpu.memory_space<vmem>>, vector<110x64xbf16>,
    return
  }
  func.func @transform_0(%arg0: i32) -> (i32, i32) {
    %c0_i32 = arith.constant 0 : i32
    %c0_i32_0 = arith.constant 0 : i32
    %c0_i32_1 = arith.constant 0 : i32
    return %c0_i32, %c0_i32_0 : i32, i32
  }
  func.func @transform_1(%arg0: i32) -> (i32, i32) {
    %c0_i32 = arith.constant 0 : i32
    %c0_i32_0 = arith.constant 0 : i32
    %c0_i32_1 = arith.constant 0 : i32
    return %c0_i32, %c0_i32_0 : i32, i32
  }
  func.func @transform_2(%arg0: i32) -> (i32, i32) {
    %c0_i32 = arith.constant 0 : i32
    %c0_i32_0 = arith.constant 0 : i32
    %c0_i32_1 = arith.constant 0 : i32
    return %c0_i32, %c0_i32_0 : i32, i32
  }
  func.func @transform_3(%arg0: i32) -> (i32, i32) {
    %c0_i32 = arith.constant 0 : i32
    %c0_i32_0 = arith.constant 0 : i32
    %c0_i32_1 = arith.constant 0 : i32
    return %c0_i32, %c0_i32_0 : i32, i32
  }
}

module attributes {stable_mosaic.version = 11 : i64} {
  func.func @_gemm_bias_relu_kernel(%arg0: i32, %arg1: memref<110x576xbf16, #tpu.memory_space<vmem>>, %arg2: memref<576x64xbf16, #tpu.memory_space<vmem>>, %arg3: memref<1x64xf32, #tpu.memory_space<vmem>>, %arg4: memref<110x64xbf16, #tpu.memory_space<vmem>>) attributes {dimension_semantics = [#tpu.dimension_semantics<arbitrary>], iteration_bounds = array<i64: 1>, scalar_prefetch = 0 : i64, scratch_operands = 0 : i64, tpu.core_type = #tpu.core_type<tc>, window_params = [{pipeline_mode = #tpu.pipeline_mode<synchronous>, transform_indices = @transform_0, window_bounds = array<i64: 110, 576>}, {pipeline_mode = #tpu.pipeline_mode<synchronous>, transform_indices = @transform_1, window_bounds = array<i64: 576, 64>}, {pipeline_mode = #tpu.pipeline_mode<synchronous>, transform_indices = @transform_2, window_bounds = array<i64: 1, 64>}, {pipeline_mode = #tpu.pipeline_mode<synchronous>, transform_indices = @transform_3, window_bounds = array<i64: 110, 64>}]} {
    %c0 = arith.constant 0 : index
    %c0_0 = arith.constant 0 : index
    %0 = vector.load %arg1[%c0, %c0_0] : memref<110x576xbf16, #tpu.memory_space<vmem>>, vector<110x576xbf16>
    %c0_1 = arith.constant 0 : index
    %c0_2 = arith.constant 0 : index
    %1 = vector.load %arg2[%c0_1, %c0_2] : memref<576x64xbf16, #tpu.memory_space<vmem>>, vector<576x64xbf16>
    %cst = arith.constant dense<0.000000e+00> : vector<110x64xf32>
    %2 = tpu.matmul %0, %1, %cst {dimension_numbers = #tpu.dot_dimension_numbers<[1], [0], [0], [1], [0, 0, 1, 1], [], []>} : vector<110x576xbf16>, vector<576x64xbf16>, vector<110x64xf32> -> vector<110x64xf32>
    %c0_3 = arith.constant 0 : index
    %c0_4 = arith.constant 0 : index
    %3 = vector.load %arg3[%c0_3, %c0_4] : memref<1x64xf32, #tpu.memory_space<vmem>>, vector<1x64xf32>
    %4 = vector.broadcast %3 : vector<1x64xf32> to vector<110x64xf32>
    %5 = arith.addf %2, %4 : vector<110x64xf32>
    %cst_5 = arith.constant 0.000000e+00 : f32
    %6 = vector.broadcast %cst_5 : f32 to vector<110x64xf32>
    %7 = arith.maximumf %5, %6 : vector<110x64xf32>
    %8 = arith.truncf %7 : vector<110x64xf32> to vector<110x64xbf16>
    %c0_6 = arith.constant 0 : index
    %c0_7 = arith.constant 0 : index
    %9 = vector.load %arg4[%c0_6, %c0_7] : memref<110x64xbf16, #tpu.memory_space<vmem>>, vector<110x64xbf16>
    tpu.vector_store %arg4[%c0_6, %c0_7], %8 {strides = array<i32>} : memref<110x64xbf16, #tpu.memory_space<vmem>>, vector<110x64xbf16>,
    return
  }
  func.func @transform_0(%arg0: i32) -> (i32, i32) {
    %c0_i32 = arith.constant 0 : i32
    %c0_i32_0 = arith.constant 0 : i32
    %c0_i32_1 = arith.constant 0 : i32
    return %c0_i32, %c0_i32_0 : i32, i32
  }
  func.func @transform_1(%arg0: i32) -> (i32, i32) {
    %c0_i32 = arith.constant 0 : i32
    %c0_i32_0 = arith.constant 0 : i32
    %c0_i32_1 = arith.constant 0 : i32
    return %c0_i32, %c0_i32_0 : i32, i32
  }
  func.func @transform_2(%arg0: i32) -> (i32, i32) {
    %c0_i32 = arith.constant 0 : i32
    %c0_i32_0 = arith.constant 0 : i32
    %c0_i32_1 = arith.constant 0 : i32
    return %c0_i32, %c0_i32_0 : i32, i32
  }
  func.func @transform_3(%arg0: i32) -> (i32, i32) {
    %c0_i32 = arith.constant 0 : i32
    %c0_i32_0 = arith.constant 0 : i32
    %c0_i32_1 = arith.constant 0 : i32
    return %c0_i32, %c0_i32_0 : i32, i32
  }
}

module attributes {stable_mosaic.version = 11 : i64} {
  func.func @_mlp_head_kernel(%arg0: i32, %arg1: memref<1x1408xbf16, #tpu.memory_space<vmem>>, %arg2: memref<1408x512xbf16, #tpu.memory_space<vmem>>, %arg3: memref<1x512xf32, #tpu.memory_space<vmem>>, %arg4: memref<512x128xbf16, #tpu.memory_space<vmem>>, %arg5: memref<1x128xf32, #tpu.memory_space<vmem>>, %arg6: memref<128x32xbf16, #tpu.memory_space<vmem>>, %arg7: memref<1x32xf32, #tpu.memory_space<vmem>>, %arg8: memref<32x4xbf16, #tpu.memory_space<vmem>>, %arg9: memref<1x4xf32, #tpu.memory_space<vmem>>, %arg10: memref<1x4xf32, #tpu.memory_space<vmem>>, %arg11: memref<1x4xf32, #tpu.memory_space<vmem>>, %arg12: memref<1x1xf32, #tpu.memory_space<vmem>>, %arg13: memref<1x512xf32, #tpu.memory_space<vmem>>) attributes {dimension_semantics = [#tpu.dimension_semantics<arbitrary>], iteration_bounds = array<i64: 5>, scalar_prefetch = 0 : i64, scratch_operands = 1 : i64, tpu.core_type = #tpu.core_type<tc>, window_params = [{transform_indices = @transform_0, window_bounds = array<i64: 1, 1408>}, {transform_indices = @transform_1, window_bounds = array<i64: 1408, 512>}, {pipeline_mode = #tpu.pipeline_mode<synchronous>, transform_indices = @transform_2, window_bounds = array<i64: 1, 512>}, {pipeline_mode = #tpu.pipeline_mode<synchronous>, transform_indices = @transform_3, window_bounds = array<i64: 512, 128>}, {pipeline_mode = #tpu.pipeline_mode<synchronous>, transform_indices = @transform_4, window_bounds = array<i64: 1, 128>}, {pipeline_mode = #tpu.pipeline_mode<synchronous>, transform_indices = @transform_5, window_bounds = array<i64: 128, 32>}, {pipeline_mode = #tpu.pipeline_mode<synchronous>, transform_indices = @transform_6, window_bounds = array<i64: 1, 32>}, {pipeline_mode = #tpu.pipeline_mode<synchronous>, transform_indices = @transform_7, window_bounds = array<i64: 32, 4>}, {pipeline_mode = #tpu.pipeline_mode<synchronous>, transform_indices = @transform_8, window_bounds = array<i64: 1, 4>}, {pipeline_mode = #tpu.pipeline_mode<synchronous>, transform_indices = @transform_9, window_bounds = array<i64: 1, 4>}, {pipeline_mode = #tpu.pipeline_mode<synchronous>, transform_indices = @transform_10, window_bounds = array<i64: 1, 4>}, {pipeline_mode = #tpu.pipeline_mode<synchronous>, transform_indices = @transform_11, window_bounds = array<i64: 1, 1>}]} {
    %c0_i32 = arith.constant 0 : i32
    %0 = arith.cmpi eq, %arg0, %c0_i32 : i32
    %1 = arith.extui %0 : i1 to i32
    %c0_i32_0 = arith.constant 0 : i32
    %2 = arith.cmpi ne, %1, %c0_i32_0 : i32
    scf.if %2 {
      %cst_9 = arith.constant 0.000000e+00 : f32
      %12 = vector.broadcast %cst_9 : f32 to vector<1x512xf32>
      %c0_10 = arith.constant 0 : index
      %c0_11 = arith.constant 0 : index
      %13 = vector.load %arg13[%c0_10, %c0_11] : memref<1x512xf32, #tpu.memory_space<vmem>>, vector<1x512xf32>
      tpu.vector_store %arg13[%c0_10, %c0_11], %12 {strides = array<i32>} : memref<1x512xf32, #tpu.memory_space<vmem>>, vector<1x512xf32>,
    } else {
    }
    %c0 = arith.constant 0 : index
    %c0_1 = arith.constant 0 : index
    %3 = vector.load %arg13[%c0, %c0_1] : memref<1x512xf32, #tpu.memory_space<vmem>>, vector<1x512xf32>
    %c0_2 = arith.constant 0 : index
    %c0_3 = arith.constant 0 : index
    %4 = vector.load %arg1[%c0_2, %c0_3] : memref<1x1408xbf16, #tpu.memory_space<vmem>>, vector<1x1408xbf16>
    %c0_4 = arith.constant 0 : index
    %c0_5 = arith.constant 0 : index
    %5 = vector.load %arg2[%c0_4, %c0_5] : memref<1408x512xbf16, #tpu.memory_space<vmem>>, vector<1408x512xbf16>
    %cst = arith.constant dense<0.000000e+00> : vector<1x512xf32>
    %6 = tpu.matmul %4, %5, %cst {dimension_numbers = #tpu.dot_dimension_numbers<[1], [0], [0], [1], [0, 0, 1, 1], [], []>} : vector<1x1408xbf16>, vector<1408x512xbf16>, vector<1x512xf32> -> vector<1x512xf32>
    %7 = arith.addf %3, %6 : vector<1x512xf32>
    %c0_6 = arith.constant 0 : index
    %c0_7 = arith.constant 0 : index
    %8 = vector.load %arg13[%c0_6, %c0_7] : memref<1x512xf32, #tpu.memory_space<vmem>>, vector<1x512xf32>
    tpu.vector_store %arg13[%c0_6, %c0_7], %7 {strides = array<i32>} : memref<1x512xf32, #tpu.memory_space<vmem>>, vector<1x512xf32>,
    %c4_i32 = arith.constant 4 : i32
    %9 = arith.cmpi eq, %arg0, %c4_i32 : i32
    %10 = arith.extui %9 : i1 to i32
    %c0_i32_8 = arith.constant 0 : i32
    %11 = arith.cmpi ne, %10, %c0_i32_8 : i32
    scf.if %11 {
      %c0_9 = arith.constant 0 : index
      %c0_10 = arith.constant 0 : index
      %12 = vector.load %arg13[%c0_9, %c0_10] : memref<1x512xf32, #tpu.memory_space<vmem>>, vector<1x512xf32>
      %c0_11 = arith.constant 0 : index
      %c0_12 = arith.constant 0 : index
      %13 = vector.load %arg3[%c0_11, %c0_12] : memref<1x512xf32, #tpu.memory_space<vmem>>, vector<1x512xf32>
      %14 = arith.addf %12, %13 : vector<1x512xf32>
      %cst_13 = arith.constant 0.000000e+00 : f32
      %15 = vector.broadcast %cst_13 : f32 to vector<1x512xf32>
      %16 = arith.maximumf %14, %15 : vector<1x512xf32>
      %17 = arith.truncf %16 : vector<1x512xf32> to vector<1x512xbf16>
      %c0_14 = arith.constant 0 : index
      %c0_15 = arith.constant 0 : index
      %18 = vector.load %arg4[%c0_14, %c0_15] : memref<512x128xbf16, #tpu.memory_space<vmem>>, vector<512x128xbf16>
      %cst_16 = arith.constant dense<0.000000e+00> : vector<1x128xf32>
      %19 = tpu.matmul %17, %18, %cst_16 {dimension_numbers = #tpu.dot_dimension_numbers<[1], [0], [0], [1], [0, 0, 1, 1], [], []>} : vector<1x512xbf16>, vector<512x128xbf16>, vector<1x128xf32> -> vector<1x128xf32>
      %c0_17 = arith.constant 0 : index
      %c0_18 = arith.constant 0 : index
      %20 = vector.load %arg5[%c0_17, %c0_18] : memref<1x128xf32, #tpu.memory_space<vmem>>, vector<1x128xf32>
      %21 = arith.addf %19, %20 : vector<1x128xf32>
      %cst_19 = arith.constant 0.000000e+00 : f32
      %22 = vector.broadcast %cst_19 : f32 to vector<1x128xf32>
      %23 = arith.maximumf %21, %22 : vector<1x128xf32>
      %24 = arith.truncf %23 : vector<1x128xf32> to vector<1x128xbf16>
      %c0_20 = arith.constant 0 : index
      %c0_21 = arith.constant 0 : index
      %25 = vector.load %arg6[%c0_20, %c0_21] : memref<128x32xbf16, #tpu.memory_space<vmem>>, vector<128x32xbf16>
      %cst_22 = arith.constant dense<0.000000e+00> : vector<1x32xf32>
      %26 = tpu.matmul %24, %25, %cst_22 {dimension_numbers = #tpu.dot_dimension_numbers<[1], [0], [0], [1], [0, 0, 1, 1], [], []>} : vector<1x128xbf16>, vector<128x32xbf16>, vector<1x32xf32> -> vector<1x32xf32>
      %c0_23 = arith.constant 0 : index
      %c0_24 = arith.constant 0 : index
      %27 = vector.load %arg7[%c0_23, %c0_24] : memref<1x32xf32, #tpu.memory_space<vmem>>, vector<1x32xf32>
      %28 = arith.addf %26, %27 : vector<1x32xf32>
      %cst_25 = arith.constant 0.000000e+00 : f32
      %29 = vector.broadcast %cst_25 : f32 to vector<1x32xf32>
      %30 = arith.maximumf %28, %29 : vector<1x32xf32>
      %31 = arith.truncf %30 : vector<1x32xf32> to vector<1x32xbf16>
      %c0_26 = arith.constant 0 : index
      %c0_27 = arith.constant 0 : index
      %32 = vector.load %arg8[%c0_26, %c0_27] : memref<32x4xbf16, #tpu.memory_space<vmem>>, vector<32x4xbf16>
      %cst_28 = arith.constant dense<0.000000e+00> : vector<1x4xf32>
      %33 = tpu.matmul %31, %32, %cst_28 {dimension_numbers = #tpu.dot_dimension_numbers<[1], [0], [0], [1], [0, 0, 1, 1], [], []>} : vector<1x32xbf16>, vector<32x4xbf16>, vector<1x4xf32> -> vector<1x4xf32>
      %c0_29 = arith.constant 0 : index
      %c0_30 = arith.constant 0 : index
      %34 = vector.load %arg9[%c0_29, %c0_30] : memref<1x4xf32, #tpu.memory_space<vmem>>, vector<1x4xf32>
      %35 = arith.addf %33, %34 : vector<1x4xf32>
      %cst_31 = arith.constant dense<0xFF800000> : vector<1xf32>
      %36 = vector.multi_reduction <maximumf>, %35, %cst_31 [1] : vector<1x4xf32> to vector<1xf32>
      %37 = vector.shape_cast %36 : vector<1xf32> to vector<1x1xf32>
      %38 = vector.broadcast %37 : vector<1x1xf32> to vector<1x4xf32>
      %39 = arith.subf %35, %38 : vector<1x4xf32>
      %40 = math.exp %39 : vector<1x4xf32>
      %cst_32 = arith.constant dense<0.000000e+00> : vector<1xf32>
      %41 = vector.multi_reduction <add>, %40, %cst_32 [1] : vector<1x4xf32> to vector<1xf32>
      %42 = vector.shape_cast %41 : vector<1xf32> to vector<1x1xf32>
      %43 = vector.broadcast %42 : vector<1x1xf32> to vector<1x4xf32>
      %44 = arith.divf %40, %43 : vector<1x4xf32>
      %c0_33 = arith.constant 0 : index
      %c0_34 = arith.constant 0 : index
      %45 = vector.load %arg10[%c0_33, %c0_34] : memref<1x4xf32, #tpu.memory_space<vmem>>, vector<1x4xf32>
      tpu.vector_store %arg10[%c0_33, %c0_34], %44 {strides = array<i32>} : memref<1x4xf32, #tpu.memory_space<vmem>>, vector<1x4xf32>,
      %c0_35 = arith.constant 0 : index
      %c0_36 = arith.constant 0 : index
      %46 = vector.load %arg11[%c0_35, %c0_36] : memref<1x4xf32, #tpu.memory_space<vmem>>, vector<1x4xf32>
      tpu.vector_store %arg11[%c0_35, %c0_36], %39 {strides = array<i32>} : memref<1x4xf32, #tpu.memory_space<vmem>>, vector<1x4xf32>,
      %47 = math.exp %44 : vector<1x4xf32>
      %cst_37 = arith.constant dense<0.000000e+00> : vector<1xf32>
      %48 = vector.multi_reduction <add>, %47, %cst_37 [1] : vector<1x4xf32> to vector<1xf32>
      %49 = vector.shape_cast %48 : vector<1xf32> to vector<1x1xf32>
      %50 = math.log %49 : vector<1x1xf32>
      %51 = vector.broadcast %50 : vector<1x1xf32> to vector<1x4xf32>
      %52 = arith.subf %44, %51 : vector<1x4xf32>
      %cst_38 = arith.constant dense<0.000000e+00> : vector<1xf32>
      %53 = vector.multi_reduction <add>, %52, %cst_38 [1] : vector<1x4xf32> to vector<1xf32>
      %54 = vector.shape_cast %53 : vector<1xf32> to vector<1x1xf32>
      %c0_39 = arith.constant 0 : index
      %c0_40 = arith.constant 0 : index
      %55 = vector.load %arg12[%c0_39, %c0_40] : memref<1x1xf32, #tpu.memory_space<vmem>>, vector<1x1xf32>
      tpu.vector_store %arg12[%c0_39, %c0_40], %54 {strides = array<i32>} : memref<1x1xf32, #tpu.memory_space<vmem>>, vector<1x1xf32>,
    } else {
    }
    return
  }
  func.func @transform_0(%arg0: i32) -> (i32, i32) {
    %c0_i32 = arith.constant 0 : i32
    %c0_i32_0 = arith.constant 0 : i32
    return %c0_i32, %arg0 : i32, i32
  }
  func.func @transform_1(%arg0: i32) -> (i32, i32) {
    %c0_i32 = arith.constant 0 : i32
    %c0_i32_0 = arith.constant 0 : i32
    return %arg0, %c0_i32 : i32, i32
  }
  func.func @transform_2(%arg0: i32) -> (i32, i32) {
    %c0_i32 = arith.constant 0 : i32
    %c0_i32_0 = arith.constant 0 : i32
    %c0_i32_1 = arith.constant 0 : i32
    return %c0_i32, %c0_i32_0 : i32, i32
  }
  func.func @transform_3(%arg0: i32) -> (i32, i32) {
    %c0_i32 = arith.constant 0 : i32
    %c0_i32_0 = arith.constant 0 : i32
    %c0_i32_1 = arith.constant 0 : i32
    return %c0_i32, %c0_i32_0 : i32, i32
  }
  func.func @transform_4(%arg0: i32) -> (i32, i32) {
    %c0_i32 = arith.constant 0 : i32
    %c0_i32_0 = arith.constant 0 : i32
    %c0_i32_1 = arith.constant 0 : i32
    return %c0_i32, %c0_i32_0 : i32, i32
  }
  func.func @transform_5(%arg0: i32) -> (i32, i32) {
    %c0_i32 = arith.constant 0 : i32
    %c0_i32_0 = arith.constant 0 : i32
    %c0_i32_1 = arith.constant 0 : i32
    return %c0_i32, %c0_i32_0 : i32, i32
  }
  func.func @transform_6(%arg0: i32) -> (i32, i32) {
    %c0_i32 = arith.constant 0 : i32
    %c0_i32_0 = arith.constant 0 : i32
    %c0_i32_1 = arith.constant 0 : i32
    return %c0_i32, %c0_i32_0 : i32, i32
  }
  func.func @transform_7(%arg0: i32) -> (i32, i32) {
    %c0_i32 = arith.constant 0 : i32
    %c0_i32_0 = arith.constant 0 : i32
    %c0_i32_1 = arith.constant 0 : i32
    return %c0_i32, %c0_i32_0 : i32, i32
  }
  func.func @transform_8(%arg0: i32) -> (i32, i32) {
    %c0_i32 = arith.constant 0 : i32
    %c0_i32_0 = arith.constant 0 : i32
    %c0_i32_1 = arith.constant 0 : i32
    return %c0_i32, %c0_i32_0 : i32, i32
  }
  func.func @transform_9(%arg0: i32) -> (i32, i32) {
    %c0_i32 = arith.constant 0 : i32
    %c0_i32_0 = arith.constant 0 : i32
    %c0_i32_1 = arith.constant 0 : i32
    return %c0_i32, %c0_i32_0 : i32, i32
  }
  func.func @transform_10(%arg0: i32) -> (i32, i32) {
    %c0_i32 = arith.constant 0 : i32
    %c0_i32_0 = arith.constant 0 : i32
    %c0_i32_1 = arith.constant 0 : i32
    return %c0_i32, %c0_i32_0 : i32, i32
  }
  func.func @transform_11(%arg0: i32) -> (i32, i32) {
    %c0_i32 = arith.constant 0 : i32
    %c0_i32_0 = arith.constant 0 : i32
    %c0_i32_1 = arith.constant 0 : i32
    return %c0_i32, %c0_i32_0 : i32, i32
  }
}

</mosaic_0001>

<bundles_post_ra>
// kernel: actor_forward.4
= control target key start
LH: loop header
LB: loop body
LE: loop exit
PB: predicated region body
PF: predicated region fallthrough
CT: control target
= control target key end

     0   :  { %vm247_vm0 = vcmask 523264   ;;  %vm864_vm1 = vcmask 257024   ;;  %s1655_s1 = inlined_call_operand.vmem [shape: bf16[64,32], index: 1, kind: input, shape index: {}]   ;;  %s1656_s0 = inlined_call_operand.vmem [shape: bf16[440,64], index: 0, kind: input, shape index: {}]   ;;  %s1657_s2 = inlined_call_operand.vmem [shape: f32[1,32], index: 2, kind: input, shape index: {}]   ;;  %s1658_s3 = inlined_call_operand.vmem [shape: bf16[440,32], index: 3, kind: output, shape index: {}]  }
   0x1   :  { %v1199_v0 = vld [vmem:[%s1655_s1] sm:$0xff]   ;;  %v1200_v1 = vld [vmem:[%s1655_s1 + $0x8] sm:$0xff]   ;;  %v1201_v2 = vld [vmem:[%s1655_s1 + $0x10] sm:$0xff]  }
   0x2   :  { %1127 = vmatprep.subr.bf16.mxu0 %v1199_v0  ;;  %1191 = vmatprep.subr.bf16.mxu1 %v1199_v0  ;;  %v1203_v3 = vld [vmem:[%s1656_s0] sm:$0xff]   ;;  %v1204_v4 = vld [vmem:[%s1656_s0 + $0x70] sm:$0xff]   ;;  %v1202_v5 = vld [vmem:[%s1655_s1 + $0x18] sm:$0xff]  }
   0x3   :  { %1128 = vmatpush3.bf16.msra.mxu0 %v1199_v0  ;;  %1195 = vmatpush3.bf16.msra.mxu1 %v1199_v0  ;;  %v1205_v6 = vld [vmem:[%s1656_s0 + $0x8] sm:$0xff]   ;;  %v1206_v7 = vld [vmem:[%s1656_s0 + $0x78] sm:$0xff]   ;;  %v1207_v8 = vld [vmem:[%s1656_s0 + $0x10] sm:$0xff]  }
   0x4   :  { %1129 = vmatprep.subr.bf16.mxu0 %v1200_v1  ;;  %1192 = vmatprep.subr.bf16.mxu1 %v1200_v1  ;;  %v1208_v9 = vld [vmem:[%s1656_s0 + $0x80] sm:$0xff]   ;;  %v1209_v10 = vld [vmem:[%s1656_s0 + $0x18] sm:$0xff]   ;;  %v1210_v11 = vld [vmem:[%s1656_s0 + $0x88] sm:$0xff]  }
   0x5   :  { %1135 = vmatprep.mubr.msk.bf16.mxu0 %vm247_vm0, %v1203_v3  ;;  %1163 = vmatprep.mubr.msk.bf16.mxu1 %vm247_vm0, %v1204_v4  ;;  %v1211_v12 = vld [vmem:[%s1656_s0 + $0x20] sm:$0xff]   ;;  %v1212_v13 = vld [vmem:[%s1656_s0 + $0x90] sm:$0xff]   ;;  %v1213_v14 = vld [vmem:[%s1656_s0 + $0x28] sm:$0xff]  }
   0x6   :  { %v1214_v15 = vld [vmem:[%s1656_s0 + $0x98] sm:$0xff]   ;;  %v1215_v16 = vld [vmem:[%s1656_s0 + $0x30] sm:$0xff]   ;;  %v1216_v17 = vld [vmem:[%s1656_s0 + $0xa0] sm:$0xff]  }
   0x7   :  { %1130 = vmatpush3.bf16.msra.mxu0 %v1200_v1  ;;  %1196 = vmatpush3.bf16.msra.mxu1 %v1200_v1  ;;  %v1217_v18 = vld [vmem:[%s1656_s0 + $0x38] sm:$0xff]   ;;  %v1218_v19 = vld [vmem:[%s1656_s0 + $0xa8] sm:$0xff]   ;;  %v1219_v20 = vld [vmem:[%s1656_s0 + $0x40] sm:$0xff]  }
   0x8   :  { %1131 = vmatprep.subr.bf16.mxu0 %v1201_v2  ;;  %1193 = vmatprep.subr.bf16.mxu1 %v1201_v2  ;;  %v1220_v21 = vld [vmem:[%s1656_s0 + $0xb0] sm:$0xff]   ;;  %v1221_v22 = vld [vmem:[%s1656_s0 + $0x48] sm:$0xff]   ;;  %v1222_v23 = vld [vmem:[%s1656_s0 + $0xb8] sm:$0xff]  }
   0x9   :  { %v1223_v24 = vld [vmem:[%s1656_s0 + $0x50] sm:$0xff]   ;;  %v1224_v25 = vld [vmem:[%s1656_s0 + $0xc0] sm:$0xff]   ;;  %v1225_v26 = vld [vmem:[%s1656_s0 + $0x58] sm:$0xff]  }
   0xa   :  { %v1226_v27 = vld [vmem:[%s1656_s0 + $0xc8] sm:$0xff]   ;;  %v1227_v28 = vld [vmem:[%s1656_s0 + $0x60] sm:$0xff]   ;;  %v1228_v29 = vld [vmem:[%s1656_s0 + $0xd0] sm:$0xff]  }
   0xb   :  { %1132 = vmatpush3.bf16.msra.mxu0 %v1201_v2  ;;  %1197 = vmatpush3.bf16.msra.mxu1 %v1201_v2  ;;  %v1229_v30 = vld [vmem:[%s1656_s0 + $0x68] sm:$0xff]   ;;  %v1230_v31 = vld [vmem:[%s1656_s0 + $0xd8] ss:$0 sps:$4 sm:$0xff]   ;;  %v1378_v32 = vld [vmem:[%s1657_s2] ss:$0 sm:$0xff] }
   0xc   :  { %1133 = vmatprep.subr.bf16.mxu0 %v1202_v5  ;;  %1194 = vmatprep.subr.bf16.mxu1 %v1202_v5 }
   0xf   :  { %1134 = vmatpush3.bf16.msra.mxu0 %v1202_v5  ;;  %1198 = vmatpush3.bf16.msra.mxu1 %v1202_v5 }
  0x12   :  { %1136 = vmatmul.mubr.msk.bf16.vlgmr.msra.gmra.mrb[0].mxu0 %vm247_vm0, %v1205_v6  ;;  %1164 = vmatmul.mubr.msk.bf16.vlgmr.msra.gmra.mrb[0].mxu1 %vm247_vm0, %v1206_v7 }
  0x13   :  { %1139 = vmatprep.mubr.msk.bf16.mxu0 %vm247_vm0, %v1207_v8  ;;  %1167 = vmatprep.mubr.msk.bf16.mxu1 %vm247_vm0, %v1208_v9 }
  0x1a   :  { %1140 = vmatmul.mubr.msk.bf16.gmra.mrb[4].mxu0 %vm247_vm0, %v1209_v10  ;;  %1168 = vmatmul.mubr.msk.bf16.gmra.mrb[4].mxu1 %vm247_vm0, %v1210_v11 }
  0x1b   :  { %1143 = vmatprep.mubr.msk.bf16.mxu0 %vm247_vm0, %v1211_v12  ;;  %1171 = vmatprep.mubr.msk.bf16.mxu1 %vm247_vm0, %v1212_v13 }
  0x22   :  { %1144 = vmatmul.mubr.msk.bf16.gmra.mrb[8].mxu0 %vm247_vm0, %v1213_v14  ;;  %1172 = vmatmul.mubr.msk.bf16.gmra.mrb[8].mxu1 %vm247_vm0, %v1214_v15 }
  0x23   :  { %1147 = vmatprep.mubr.msk.bf16.mxu0 %vm247_vm0, %v1215_v16  ;;  %1175 = vmatprep.mubr.msk.bf16.mxu1 %vm247_vm0, %v1216_v17 }
  0x2a   :  { %1148 = vmatmul.mubr.msk.bf16.gmra.mrb[12].mxu0 %vm247_vm0, %v1217_v18  ;;  %1176 = vmatmul.mubr.msk.bf16.gmra.mrb[12].mxu1 %vm247_vm0, %v1218_v19 }
  0x2b   :  { %1151 = vmatprep.mubr.msk.bf16.mxu0 %vm247_vm0, %v1219_v20  ;;  %1179 = vmatprep.mubr.msk.bf16.mxu1 %vm247_vm0, %v1220_v21 }
  0x32   :  { %1152 = vmatmul.mubr.msk.bf16.gmra.mrb[16].mxu0 %vm247_vm0, %v1221_v22  ;;  %1180 = vmatmul.mubr.msk.bf16.gmra.mrb[16].mxu1 %vm247_vm0, %v1222_v23 }
  0x33   :  { %1155 = vmatprep.mubr.msk.bf16.mxu0 %vm247_vm0, %v1223_v24  ;;  %1183 = vmatprep.mubr.msk.bf16.mxu1 %vm247_vm0, %v1224_v25 }
  0x3a   :  { %1156 = vmatmul.mubr.msk.bf16.gmra.mrb[20].mxu0 %vm247_vm0, %v1225_v26  ;;  %1184 = vmatmul.mubr.msk.bf16.gmra.mrb[20].mxu1 %vm247_vm0, %v1226_v27 }
  0x3b   :  { %1159 = vmatprep.mubr.msk.bf16.mxu0 %vm247_vm0, %v1227_v28  ;;  %1187 = vmatprep.mubr.msk.bf16.mxu1 %vm247_vm0, %v1228_v29 }
  0x42   :  { %1160 = vmatmul.mubr.msk.bf16.gmra.mrb[24].mxu0 %vm247_vm0, %v1229_v30  ;;  %1188 = vmatmul.mubr.msk.bf16.gmra.mrb[24].mxu1 %vm247_vm0, %v1230_v31 }
  0xe5   :  { %v1137_v33 = vpop.f32.mrb[0].mxu0  ;;  %v1165_v34 = vpop.f32.mrb[0].mxu1 }
  0xe6   :  { %v375_v35 = vadd.f32 %v1137_v33, %v1378_v32  ;;  %v487_v36 = vadd.f32 %v1165_v34, %v1378_v32  ;;  %v366_v37 = vpop.f32.mrb[1].mxu0  ;;  %v478_v38 = vpop.f32.mrb[1].mxu1 }
  0xe7   :  { %v367_v39 = vadd.f32 %v1378_v32, %v366_v37  ;;  %v479_v40 = vadd.f32 %v1378_v32, %v478_v38  ;;  %v1138_v41 = vpop.f32.mrb[2].mxu0  ;;  %v1166_v42 = vpop.f32.mrb[2].mxu1 }
  0xe8   :  { %v590_v43 = vmax.f32 %v375_v35, 0.0  ;;  %v618_v44 = vmax.f32 %v487_v36, 0.0  ;;  %v378_v45 = vadd.f32 %v1138_v41, %v1378_v32  ;;  %v490_v46 = vadd.f32 %v1166_v42, %v1378_v32  ;;  %v369_v47 = vpop.f32.mrb[3].mxu0  ;;  %v481_v48 = vpop.f32.mrb[3].mxu1 }
  0xe9   :  { %v588_v49 = vmax.f32 %v367_v39, 0.0  ;;  %v616_v50 = vmax.f32 %v479_v40, 0.0  ;;  %v370_v51 = vadd.f32 %v1378_v32, %v369_v47  ;;  %v482_v52 = vadd.f32 %v1378_v32, %v481_v48 }
  0xea   :  { %v1042_v53 = vpack.c.bf16 %v590_v43, %v590_v43  ;;  %v1070_v54 = vpack.c.bf16 %v618_v44, %v618_v44  ;;  %v591_v55 = vmax.f32 %v378_v45, 0.0  ;;  %v619_v56 = vmax.f32 %v490_v46, 0.0 }
  0xeb   :  { %v1040_v57 = vpack.c.bf16 %v588_v49, %v588_v49  ;;  %v1068_v58 = vpack.c.bf16 %v616_v50, %v616_v50  ;;  %v589_v59 = vmax.f32 %v370_v51, 0.0  ;;  %v617_v60 = vmax.f32 %v482_v52, 0.0 }
  0xec   :  { %867 = vst.msk [vmem:[%s1658_s3 + $0x8] sm:$0xf] %vm864_vm1, %v1042_v53  ;;  %895 = vst.msk [vmem:[%s1658_s3 + $0x78] sm:$0xf] %vm864_vm1, %v1070_v54  ;;  %v1043_v61 = vpack.c.bf16 %v591_v55, %v591_v55  ;;  %v1071_v62 = vpack.c.bf16 %v619_v56, %v619_v56 }
  0xed   :  { %865 = vst.msk [vmem:[%s1658_s3] sm:$0xf] %vm864_vm1, %v1040_v57  ;;  %893 = vst.msk [vmem:[%s1658_s3 + $0x70] sm:$0xf] %vm864_vm1, %v1068_v58  ;;  %v1041_v63 = vpack.c.bf16 %v589_v59, %v589_v59  ;;  %v1069_v0 = vpack.c.bf16 %v617_v60, %v617_v60  ;;  %v1141_v1 = vpop.f32.mrb[4].mxu0  ;;  %v1169_v2 = vpop.f32.mrb[4].mxu1 }
  0xee   :  { %868 = vst.msk [vmem:[%s1658_s3 + $0xc] sm:$0xf] %vm864_vm1, %v1043_v61  ;;  %896 = vst.msk [vmem:[%s1658_s3 + $0x7c] sm:$0xf] %vm864_vm1, %v1071_v62  ;;  %v391_v3 = vadd.f32 %v1141_v1, %v1378_v32  ;;  %v503_v4 = vadd.f32 %v1169_v2, %v1378_v32  ;;  %v382_v5 = vpop.f32.mrb[5].mxu0  ;;  %v494_v6 = vpop.f32.mrb[5].mxu1 }
  0xef   :  { %866 = vst.msk [vmem:[%s1658_s3 + $0x4] sm:$0xf] %vm864_vm1, %v1041_v63  ;;  %894 = vst.msk [vmem:[%s1658_s3 + $0x74] sm:$0xf] %vm864_vm1, %v1069_v0  ;;  %v383_v7 = vadd.f32 %v1378_v32, %v382_v5  ;;  %v495_v8 = vadd.f32 %v1378_v32, %v494_v6  ;;  %v1142_v9 = vpop.f32.mrb[6].mxu0  ;;  %v1170_v10 = vpop.f32.mrb[6].mxu1 }
  0xf0   :  { %v594_v11 = vmax.f32 %v391_v3, 0.0  ;;  %v622_v12 = vmax.f32 %v503_v4, 0.0  ;;  %v394_v13 = vadd.f32 %v1142_v9, %v1378_v32  ;;  %v506_v14 = vadd.f32 %v1170_v10, %v1378_v32  ;;  %v385_v15 = vpop.f32.mrb[7].mxu0  ;;  %v497_v16 = vpop.f32.mrb[7].mxu1 }
  0xf1   :  { %v592_v17 = vmax.f32 %v383_v7, 0.0  ;;  %v620_v18 = vmax.f32 %v495_v8, 0.0  ;;  %v386_v19 = vadd.f32 %v1378_v32, %v385_v15  ;;  %v498_v20 = vadd.f32 %v1378_v32, %v497_v16 }
  0xf2   :  { %v1046_v21 = vpack.c.bf16 %v594_v11, %v594_v11  ;;  %v1074_v22 = vpack.c.bf16 %v622_v12, %v622_v12  ;;  %v595_v23 = vmax.f32 %v394_v13, 0.0  ;;  %v623_v24 = vmax.f32 %v506_v14, 0.0 }
  0xf3   :  { %v1044_v25 = vpack.c.bf16 %v592_v17, %v592_v17  ;;  %v1072_v26 = vpack.c.bf16 %v620_v18, %v620_v18  ;;  %v593_v27 = vmax.f32 %v386_v19, 0.0  ;;  %v621_v28 = vmax.f32 %v498_v20, 0.0 }
  0xf4   :  { %871 = vst.msk [vmem:[%s1658_s3 + $0x18] sm:$0xf] %vm864_vm1, %v1046_v21  ;;  %899 = vst.msk [vmem:[%s1658_s3 + $0x88] sm:$0xf] %vm864_vm1, %v1074_v22  ;;  %v1047_v29 = vpack.c.bf16 %v595_v23, %v595_v23  ;;  %v1075_v30 = vpack.c.bf16 %v623_v24, %v623_v24 }
  0xf5   :  { %869 = vst.msk [vmem:[%s1658_s3 + $0x10] sm:$0xf] %vm864_vm1, %v1044_v25  ;;  %897 = vst.msk [vmem:[%s1658_s3 + $0x80] sm:$0xf] %vm864_vm1, %v1072_v26  ;;  %v1045_v31 = vpack.c.bf16 %v593_v27, %v593_v27  ;;  %v1073_v33 = vpack.c.bf16 %v621_v28, %v621_v28  ;;  %v1145_v34 = vpop.f32.mrb[8].mxu0  ;;  %v1173_v35 = vpop.f32.mrb[8].mxu1 }
  0xf6   :  { %872 = vst.msk [vmem:[%s1658_s3 + $0x1c] sm:$0xf] %vm864_vm1, %v1047_v29  ;;  %900 = vst.msk [vmem:[%s1658_s3 + $0x8c] sm:$0xf] %vm864_vm1, %v1075_v30  ;;  %v407_v36 = vadd.f32 %v1145_v34, %v1378_v32  ;;  %v519_v37 = vadd.f32 %v1173_v35, %v1378_v32  ;;  %v398_v38 = vpop.f32.mrb[9].mxu0  ;;  %v510_v39 = vpop.f32.mrb[9].mxu1 }
  0xf7   :  { %870 = vst.msk [vmem:[%s1658_s3 + $0x14] sm:$0xf] %vm864_vm1, %v1045_v31  ;;  %898 = vst.msk [vmem:[%s1658_s3 + $0x84] sm:$0xf] %vm864_vm1, %v1073_v33  ;;  %v399_v40 = vadd.f32 %v1378_v32, %v398_v38  ;;  %v511_v41 = vadd.f32 %v1378_v32, %v510_v39  ;;  %v1146_v42 = vpop.f32.mrb[10].mxu0  ;;  %v1174_v43 = vpop.f32.mrb[10].mxu1 }
  0xf8   :  { %v598_v44 = vmax.f32 %v407_v36, 0.0  ;;  %v626_v45 = vmax.f32 %v519_v37, 0.0  ;;  %v410_v46 = vadd.f32 %v1146_v42, %v1378_v32  ;;  %v522_v47 = vadd.f32 %v1174_v43, %v1378_v32  ;;  %v401_v48 = vpop.f32.mrb[11].mxu0  ;;  %v513_v49 = vpop.f32.mrb[11].mxu1 }
  0xf9   :  { %v596_v50 = vmax.f32 %v399_v40, 0.0  ;;  %v624_v51 = vmax.f32 %v511_v41, 0.0  ;;  %v402_v52 = vadd.f32 %v1378_v32, %v401_v48  ;;  %v514_v53 = vadd.f32 %v1378_v32, %v513_v49 }
  0xfa   :  { %v1050_v54 = vpack.c.bf16 %v598_v44, %v598_v44  ;;  %v1078_v55 = vpack.c.bf16 %v626_v45, %v626_v45  ;;  %v599_v56 = vmax.f32 %v410_v46, 0.0  ;;  %v627_v57 = vmax.f32 %v522_v47, 0.0 }
  0xfb   :  { %v1048_v58 = vpack.c.bf16 %v596_v50, %v596_v50  ;;  %v1076_v59 = vpack.c.bf16 %v624_v51, %v624_v51  ;;  %v597_v60 = vmax.f32 %v402_v52, 0.0  ;;  %v625_v61 = vmax.f32 %v514_v53, 0.0 }
  0xfc   :  { %875 = vst.msk [vmem:[%s1658_s3 + $0x28] sm:$0xf] %vm864_vm1, %v1050_v54  ;;  %903 = vst.msk [vmem:[%s1658_s3 + $0x98] sm:$0xf] %vm864_vm1, %v1078_v55  ;;  %v1051_v62 = vpack.c.bf16 %v599_v56, %v599_v56  ;;  %v1079_v63 = vpack.c.bf16 %v627_v57, %v627_v57 }
  0xfd   :  { %873 = vst.msk [vmem:[%s1658_s3 + $0x20] sm:$0xf] %vm864_vm1, %v1048_v58  ;;  %901 = vst.msk [vmem:[%s1658_s3 + $0x90] sm:$0xf] %vm864_vm1, %v1076_v59  ;;  %v1049_v0 = vpack.c.bf16 %v597_v60, %v597_v60  ;;  %v1077_v1 = vpack.c.bf16 %v625_v61, %v625_v61  ;;  %v1149_v2 = vpop.f32.mrb[12].mxu0  ;;  %v1177_v3 = vpop.f32.mrb[12].mxu1 }
  0xfe   :  { %876 = vst.msk [vmem:[%s1658_s3 + $0x2c] sm:$0xf] %vm864_vm1, %v1051_v62  ;;  %904 = vst.msk [vmem:[%s1658_s3 + $0x9c] sm:$0xf] %vm864_vm1, %v1079_v63  ;;  %v423_v4 = vadd.f32 %v1149_v2, %v1378_v32  ;;  %v535_v5 = vadd.f32 %v1177_v3, %v1378_v32  ;;  %v414_v6 = vpop.f32.mrb[13].mxu0  ;;  %v526_v7 = vpop.f32.mrb[13].mxu1 }
  0xff   :  { %874 = vst.msk [vmem:[%s1658_s3 + $0x24] sm:$0xf] %vm864_vm1, %v1049_v0  ;;  %902 = vst.msk [vmem:[%s1658_s3 + $0x94] sm:$0xf] %vm864_vm1, %v1077_v1  ;;  %v415_v8 = vadd.f32 %v1378_v32, %v414_v6  ;;  %v527_v9 = vadd.f32 %v1378_v32, %v526_v7  ;;  %v1150_v10 = vpop.f32.mrb[14].mxu0  ;;  %v1178_v11 = vpop.f32.mrb[14].mxu1 }
 0x100   :  { %v602_v12 = vmax.f32 %v423_v4, 0.0  ;;  %v630_v13 = vmax.f32 %v535_v5, 0.0  ;;  %v426_v14 = vadd.f32 %v1150_v10, %v1378_v32  ;;  %v538_v15 = vadd.f32 %v1178_v11, %v1378_v32  ;;  %v417_v16 = vpop.f32.mrb[15].mxu0  ;;  %v529_v17 = vpop.f32.mrb[15].mxu1 }
 0x101   :  { %v600_v18 = vmax.f32 %v415_v8, 0.0  ;;  %v628_v19 = vmax.f32 %v527_v9, 0.0  ;;  %v418_v20 = vadd.f32 %v1378_v32, %v417_v16  ;;  %v530_v21 = vadd.f32 %v1378_v32, %v529_v17 }
 0x102   :  { %v1054_v22 = vpack.c.bf16 %v602_v12, %v602_v12  ;;  %v1082_v23 = vpack.c.bf16 %v630_v13, %v630_v13  ;;  %v603_v24 = vmax.f32 %v426_v14, 0.0  ;;  %v631_v25 = vmax.f32 %v538_v15, 0.0 }
 0x103   :  { %v1052_v26 = vpack.c.bf16 %v600_v18, %v600_v18  ;;  %v1080_v27 = vpack.c.bf16 %v628_v19, %v628_v19  ;;  %v601_v28 = vmax.f32 %v418_v20, 0.0  ;;  %v629_v29 = vmax.f32 %v530_v21, 0.0 }
 0x104   :  { %879 = vst.msk [vmem:[%s1658_s3 + $0x38] sm:$0xf] %vm864_vm1, %v1054_v22  ;;  %907 = vst.msk [vmem:[%s1658_s3 + $0xa8] sm:$0xf] %vm864_vm1, %v1082_v23  ;;  %v1055_v30 = vpack.c.bf16 %v603_v24, %v603_v24  ;;  %v1083_v31 = vpack.c.bf16 %v631_v25, %v631_v25 }
 0x105   :  { %877 = vst.msk [vmem:[%s1658_s3 + $0x30] sm:$0xf] %vm864_vm1, %v1052_v26  ;;  %905 = vst.msk [vmem:[%s1658_s3 + $0xa0] sm:$0xf] %vm864_vm1, %v1080_v27  ;;  %v1053_v33 = vpack.c.bf16 %v601_v28, %v601_v28  ;;  %v1081_v34 = vpack.c.bf16 %v629_v29, %v629_v29  ;;  %v1153_v35 = vpop.f32.mrb[16].mxu0  ;;  %v1181_v36 = vpop.f32.mrb[16].mxu1 }
 0x106   :  { %880 = vst.msk [vmem:[%s1658_s3 + $0x3c] sm:$0xf] %vm864_vm1, %v1055_v30  ;;  %908 = vst.msk [vmem:[%s1658_s3 + $0xac] sm:$0xf] %vm864_vm1, %v1083_v31  ;;  %v439_v37 = vadd.f32 %v1153_v35, %v1378_v32  ;;  %v551_v38 = vadd.f32 %v1181_v36, %v1378_v32  ;;  %v430_v39 = vpop.f32.mrb[17].mxu0  ;;  %v542_v40 = vpop.f32.mrb[17].mxu1 }
 0x107   :  { %878 = vst.msk [vmem:[%s1658_s3 + $0x34] sm:$0xf] %vm864_vm1, %v1053_v33  ;;  %906 = vst.msk [vmem:[%s1658_s3 + $0xa4] sm:$0xf] %vm864_vm1, %v1081_v34  ;;  %v431_v41 = vadd.f32 %v1378_v32, %v430_v39  ;;  %v543_v42 = vadd.f32 %v1378_v32, %v542_v40  ;;  %v1154_v43 = vpop.f32.mrb[18].mxu0  ;;  %v1182_v44 = vpop.f32.mrb[18].mxu1 }
 0x108   :  { %v606_v45 = vmax.f32 %v439_v37, 0.0  ;;  %v634_v46 = vmax.f32 %v551_v38, 0.0  ;;  %v442_v47 = vadd.f32 %v1154_v43, %v1378_v32  ;;  %v554_v48 = vadd.f32 %v1182_v44, %v1378_v32  ;;  %v433_v49 = vpop.f32.mrb[19].mxu0  ;;  %v545_v50 = vpop.f32.mrb[19].mxu1 }
 0x109   :  { %v604_v51 = vmax.f32 %v431_v41, 0.0  ;;  %v632_v52 = vmax.f32 %v543_v42, 0.0  ;;  %v434_v53 = vadd.f32 %v1378_v32, %v433_v49  ;;  %v546_v54 = vadd.f32 %v1378_v32, %v545_v50 }
 0x10a   :  { %v1058_v55 = vpack.c.bf16 %v606_v45, %v606_v45  ;;  %v1086_v56 = vpack.c.bf16 %v634_v46, %v634_v46  ;;  %v607_v57 = vmax.f32 %v442_v47, 0.0  ;;  %v635_v58 = vmax.f32 %v554_v48, 0.0 }
 0x10b   :  { %v1056_v59 = vpack.c.bf16 %v604_v51, %v604_v51  ;;  %v1084_v60 = vpack.c.bf16 %v632_v52, %v632_v52  ;;  %v605_v61 = vmax.f32 %v434_v53, 0.0  ;;  %v633_v62 = vmax.f32 %v546_v54, 0.0 }
 0x10c   :  { %883 = vst.msk [vmem:[%s1658_s3 + $0x48] sm:$0xf] %vm864_vm1, %v1058_v55  ;;  %911 = vst.msk [vmem:[%s1658_s3 + $0xb8] sm:$0xf] %vm864_vm1, %v1086_v56  ;;  %v1059_v63 = vpack.c.bf16 %v607_v57, %v607_v57  ;;  %v1087_v0 = vpack.c.bf16 %v635_v58, %v635_v58 }
 0x10d   :  { %881 = vst.msk [vmem:[%s1658_s3 + $0x40] sm:$0xf] %vm864_vm1, %v1056_v59  ;;  %909 = vst.msk [vmem:[%s1658_s3 + $0xb0] sm:$0xf] %vm864_vm1, %v1084_v60  ;;  %v1057_v1 = vpack.c.bf16 %v605_v61, %v605_v61  ;;  %v1085_v2 = vpack.c.bf16 %v633_v62, %v633_v62  ;;  %v1157_v3 = vpop.f32.mrb[20].mxu0  ;;  %v1185_v4 = vpop.f32.mrb[20].mxu1 }
 0x10e   :  { %884 = vst.msk [vmem:[%s1658_s3 + $0x4c] sm:$0xf] %vm864_vm1, %v1059_v63  ;;  %912 = vst.msk [vmem:[%s1658_s3 + $0xbc] sm:$0xf] %vm864_vm1, %v1087_v0  ;;  %v455_v5 = vadd.f32 %v1157_v3, %v1378_v32  ;;  %v567_v6 = vadd.f32 %v1185_v4, %v1378_v32  ;;  %v446_v7 = vpop.f32.mrb[21].mxu0  ;;  %v558_v8 = vpop.f32.mrb[21].mxu1 }
 0x10f   :  { %882 = vst.msk [vmem:[%s1658_s3 + $0x44] sm:$0xf] %vm864_vm1, %v1057_v1  ;;  %910 = vst.msk [vmem:[%s1658_s3 + $0xb4] sm:$0xf] %vm864_vm1, %v1085_v2  ;;  %v447_v9 = vadd.f32 %v1378_v32, %v446_v7  ;;  %v559_v10 = vadd.f32 %v1378_v32, %v558_v8  ;;  %v1158_v11 = vpop.f32.mrb[22].mxu0  ;;  %v1186_v12 = vpop.f32.mrb[22].mxu1 }
 0x110   :  { %v610_v13 = vmax.f32 %v455_v5, 0.0  ;;  %v638_v14 = vmax.f32 %v567_v6, 0.0  ;;  %v458_v15 = vadd.f32 %v1158_v11, %v1378_v32  ;;  %v570_v16 = vadd.f32 %v1186_v12, %v1378_v32  ;;  %v449_v17 = vpop.f32.mrb[23].mxu0  ;;  %v561_v18 = vpop.f32.mrb[23].mxu1 }
 0x111   :  { %v608_v19 = vmax.f32 %v447_v9, 0.0  ;;  %v636_v20 = vmax.f32 %v559_v10, 0.0  ;;  %v450_v21 = vadd.f32 %v1378_v32, %v449_v17  ;;  %v562_v22 = vadd.f32 %v1378_v32, %v561_v18 }
 0x112   :  { %v1062_v23 = vpack.c.bf16 %v610_v13, %v610_v13  ;;  %v1090_v24 = vpack.c.bf16 %v638_v14, %v638_v14  ;;  %v611_v25 = vmax.f32 %v458_v15, 0.0  ;;  %v639_v26 = vmax.f32 %v570_v16, 0.0 }
 0x113   :  { %v1060_v27 = vpack.c.bf16 %v608_v19, %v608_v19  ;;  %v1088_v28 = vpack.c.bf16 %v636_v20, %v636_v20  ;;  %v609_v29 = vmax.f32 %v450_v21, 0.0  ;;  %v637_v30 = vmax.f32 %v562_v22, 0.0 }
 0x114   :  { %887 = vst.msk [vmem:[%s1658_s3 + $0x58] sm:$0xf] %vm864_vm1, %v1062_v23  ;;  %915 = vst.msk [vmem:[%s1658_s3 + $0xc8] sm:$0xf] %vm864_vm1, %v1090_v24  ;;  %v1063_v31 = vpack.c.bf16 %v611_v25, %v611_v25  ;;  %v1091_v33 = vpack.c.bf16 %v639_v26, %v639_v26 }
 0x115   :  { %885 = vst.msk [vmem:[%s1658_s3 + $0x50] sm:$0xf] %vm864_vm1, %v1060_v27  ;;  %913 = vst.msk [vmem:[%s1658_s3 + $0xc0] sm:$0xf] %vm864_vm1, %v1088_v28  ;;  %v1061_v34 = vpack.c.bf16 %v609_v29, %v609_v29  ;;  %v1089_v35 = vpack.c.bf16 %v637_v30, %v637_v30  ;;  %v1161_v36 = vpop.f32.mrb[24].mxu0  ;;  %v1189_v37 = vpop.f32.mrb[24].mxu1 }
 0x116   :  { %888 = vst.msk [vmem:[%s1658_s3 + $0x5c] sm:$0xf] %vm864_vm1, %v1063_v31  ;;  %916 = vst.msk [vmem:[%s1658_s3 + $0xcc] sm:$0xf] %vm864_vm1, %v1091_v33  ;;  %v471_v38 = vadd.f32 %v1161_v36, %v1378_v32  ;;  %v583_v39 = vadd.f32 %v1189_v37, %v1378_v32  ;;  %v462_v40 = vpop.f32.mrb[25].mxu0  ;;  %v574_v41 = vpop.f32.mrb[25].mxu1 }
 0x117   :  { %886 = vst.msk [vmem:[%s1658_s3 + $0x54] sm:$0xf] %vm864_vm1, %v1061_v34  ;;  %914 = vst.msk [vmem:[%s1658_s3 + $0xc4] sm:$0xf] %vm864_vm1, %v1089_v35  ;;  %v463_v42 = vadd.f32 %v1378_v32, %v462_v40  ;;  %v575_v43 = vadd.f32 %v1378_v32, %v574_v41  ;;  %v1162_v44 = vpop.f32.mrb[26].mxu0  ;;  %v1190_v45 = vpop.f32.mrb[26].mxu1 }
 0x118   :  { %v614_v46 = vmax.f32 %v471_v38, 0.0  ;;  %v642_v47 = vmax.f32 %v583_v39, 0.0  ;;  %v474_v48 = vadd.f32 %v1162_v44, %v1378_v32  ;;  %v465_v49 = vpop.f32.mrb[27].mxu0  ;;  %v577_v50 = vpop.f32.mrb[27].mxu1 }
 0x119   :  { %v612_v51 = vmax.f32 %v463_v42, 0.0  ;;  %v640_v52 = vmax.f32 %v575_v43, 0.0  ;;  %v466_v53 = vadd.f32 %v1378_v32, %v465_v49  ;;  %v578_v54 = vadd.f32 %v1378_v32, %v577_v50 }
 0x11a   :  { %v1066_v55 = vpack.c.bf16 %v614_v46, %v614_v46  ;;  %v1094_v56 = vpack.c.bf16 %v642_v47, %v642_v47  ;;  %v615_v57 = vmax.f32 %v474_v48, 0.0 }
 0x11b   :  { %v1064_v58 = vpack.c.bf16 %v612_v51, %v612_v51  ;;  %v1092_v59 = vpack.c.bf16 %v640_v52, %v640_v52  ;;  %v613_v60 = vmax.f32 %v466_v53, 0.0  ;;  %v641_v61 = vmax.f32 %v578_v54, 0.0 }
 0x11c   :  { %891 = vst.msk [vmem:[%s1658_s3 + $0x68] sm:$0xf] %vm864_vm1, %v1066_v55  ;;  %919 = vst.msk [vmem:[%s1658_s3 + $0xd8] sm:$0xf] %vm864_vm1, %v1094_v56  ;;  %v1067_v62 = vpack.c.bf16 %v615_v57, %v615_v57 }
 0x11d   :  { %889 = vst.msk [vmem:[%s1658_s3 + $0x60] sm:$0xf] %vm864_vm1, %v1064_v58  ;;  %917 = vst.msk [vmem:[%s1658_s3 + $0xd0] sm:$0xf] %vm864_vm1, %v1092_v59  ;;  %v1065_v32 = vpack.c.bf16 %v613_v60, %v613_v60  ;;  %v1093_v63 = vpack.c.bf16 %v641_v61, %v641_v61 }
 0x11e   :  { %892 = vst.msk [vmem:[%s1658_s3 + $0x6c] sm:$0xf] %vm864_vm1, %v1067_v62 }
 0x11f   :  { %890 = vst.msk [vmem:[%s1658_s3 + $0x64] sm:$0xf] %vm864_vm1, %v1065_v32  ;;  %918 = vst.msk [vmem:[%s1658_s3 + $0xd4] sm:$0xf] %vm864_vm1, %v1093_v63 }

// kernel: actor_forward.5
= control target key start
LH: loop header
LB: loop body
LE: loop exit
PB: predicated region body
PF: predicated region fallthrough
CT: control target
= control target key end

     0   :  { %vm694_vm0 = vcmask 519168   ;;  %vm708_vm1 = vcmask 518144   ;;  %s1267_s1 = inlined_call_operand.vmem [shape: bf16[512,64], index: 1, kind: input, shape index: {}]   ;;  %s1268_s0 = inlined_call_operand.vmem [shape: bf16[110,512], index: 0, kind: input, shape index: {}]   ;;  %s1269_s2 = inlined_call_operand.vmem [shape: f32[1,64], index: 2, kind: input, shape index: {}]   ;;  %s1270_s3 = inlined_call_operand.vmem [shape: bf16[110,64], index: 3, kind: output, shape index: {}]  }
   0x1   :  { %v919_v0 = vld [vmem:[%s1267_s1 + $0x40] sm:$0xff]   ;;  %v923_v4 = vld [vmem:[%s1267_s1 + $0x48] sm:$0xff]   ;;  %v927_v8 = vld [vmem:[%s1267_s1 + $0x50] sm:$0xff]  }
   0x2   :  { %v920_v1 = vld [vmem:[%s1267_s1 + $0xc0] sm:$0xff]   ;;  %803 = vmatprep.subr.bf16.mxu0 %v919_v0  ;;  %v924_v5 = vld [vmem:[%s1267_s1 + $0xc8] sm:$0xff]   ;;  %v928_v9 = vld [vmem:[%s1267_s1 + $0xd0] sm:$0xff]  }
   0x3   :  { %v921_v2 = vld [vmem:[%s1267_s1] sm:$0xff]   ;;  %861 = vmatprep.subr.bf16.mxu1 %v920_v1  ;;  %v925_v6 = vld [vmem:[%s1267_s1 + $0x8] sm:$0xff]   ;;  %v929_v10 = vld [vmem:[%s1267_s1 + $0x10] sm:$0xff]  }
   0x4   :  { %v922_v3 = vld [vmem:[%s1267_s1 + $0x80] sm:$0xff]   ;;  %804 = vmatpush3.bf16.msra.mxu0 %v921_v2  ;;  %v926_v7 = vld [vmem:[%s1267_s1 + $0x88] sm:$0xff]   ;;  %v930_v11 = vld [vmem:[%s1267_s1 + $0x90] sm:$0xff]  }
   0x5   :  { %862 = vmatpush3.bf16.msra.mxu1 %v922_v3  ;;  %805 = vmatprep.subr.bf16.mxu0 %v923_v4  ;;  %v931_v12 = vld [vmem:[%s1267_s1 + $0x58] sm:$0xff]   ;;  %v935_v16 = vld [vmem:[%s1267_s1 + $0x60] sm:$0xff]   ;;  %v939_v20 = vld [vmem:[%s1267_s1 + $0x68] sm:$0xff]  }
   0x6   :  { %863 = vmatprep.subr.bf16.mxu1 %v924_v5  ;;  %v932_v13 = vld [vmem:[%s1267_s1 + $0xd8] sm:$0xff]   ;;  %v936_v17 = vld [vmem:[%s1267_s1 + $0xe0] sm:$0xff]   ;;  %v940_v21 = vld [vmem:[%s1267_s1 + $0xe8] sm:$0xff]  }
   0x7   :  { %v933_v14 = vld [vmem:[%s1267_s1 + $0x18] sm:$0xff]   ;;  %v937_v18 = vld [vmem:[%s1267_s1 + $0x20] sm:$0xff]   ;;  %v941_v22 = vld [vmem:[%s1267_s1 + $0x28] sm:$0xff]  }
   0x8   :  { %806 = vmatpush3.bf16.msra.mxu0 %v925_v6  ;;  %v934_v15 = vld [vmem:[%s1267_s1 + $0x98] sm:$0xff]   ;;  %v938_v19 = vld [vmem:[%s1267_s1 + $0xa0] sm:$0xff]   ;;  %v942_v23 = vld [vmem:[%s1267_s1 + $0xa8] sm:$0xff]  }
   0x9   :  { %864 = vmatpush3.bf16.msra.mxu1 %v926_v7  ;;  %807 = vmatprep.subr.bf16.mxu0 %v927_v8  ;;  %v943_v24 = vld [vmem:[%s1267_s1 + $0x70] sm:$0xff]   ;;  %v947_v28 = vld [vmem:[%s1267_s1 + $0x78] sm:$0xff]   ;;  %v1196_v62 = vld [vmem:[%s1269_s2] ss:$0 sm:$0xff] }
   0xa   :  { %865 = vmatprep.subr.bf16.mxu1 %v928_v9  ;;  %v944_v25 = vld [vmem:[%s1267_s1 + $0xf0] sm:$0xff]   ;;  %v948_v29 = vld [vmem:[%s1267_s1 + $0xf8] sm:$0xff]  }
   0xb   :  { %v945_v26 = vld [vmem:[%s1267_s1 + $0x30] sm:$0xff]   ;;  %v949_v30 = vld [vmem:[%s1267_s1 + $0x38] sm:$0xff]  }
   0xc   :  { %808 = vmatpush3.bf16.msra.mxu0 %v929_v10  ;;  %v946_v27 = vld [vmem:[%s1267_s1 + $0xb0] sm:$0xff]   ;;  %v950_v31 = vld [vmem:[%s1267_s1 + $0xb8] sm:$0xff]  }
   0xd   :  { %866 = vmatpush3.bf16.msra.mxu1 %v930_v11  ;;  %809 = vmatprep.subr.bf16.mxu0 %v931_v12  ;;  %v951_v32 = vld [vmem:[%s1268_s0] ss:$16 sps:$4 sm:$0xff]   ;;  %v953_v33 = vld [vmem:[%s1268_s0 + $0x4] ss:$16 sps:$4 sm:$0xff]   ;;  %v954_v34 = vld [vmem:[%s1268_s0 + $0x8] ss:$16 sps:$4 sm:$0xff]  }
   0xe   :  { %867 = vmatprep.subr.bf16.mxu1 %v932_v13  ;;  %v956_v35 = vld [vmem:[%s1268_s0 + $0xc] ss:$16 sps:$4 sm:$0xff]   ;;  %478 = vmatprep.mubr.bf16.mxu0 %v953_v33  ;;  %v957_v36 = vld [vmem:[%s1268_s0 + $0x24] ss:$16 sps:$4 sm:$0xff]   ;;  %v961_v38 = vld [vmem:[%s1268_s0 + $0x20] ss:$16 sps:$4 sm:$0xff]  }
   0xf   :  { %567 = vmatprep.mubr.bf16.mxu1 %v956_v35  ;;  %v959_v37 = vld [vmem:[%s1268_s0 + $0x2c] ss:$16 sps:$4 sm:$0xff]   ;;  %v962_v39 = vld [vmem:[%s1268_s0 + $0x28] ss:$16 sps:$4 sm:$0xff]   ;;  %v963_v40 = vld [vmem:[%s1268_s0 + $0x44] ss:$16 sps:$4 sm:$0xff]  }
  0x10   :  { %810 = vmatpush3.bf16.msra.mxu0 %v933_v14  ;;  %v965_v41 = vld [vmem:[%s1268_s0 + $0x4c] ss:$16 sps:$4 sm:$0xff]   ;;  %v967_v42 = vld [vmem:[%s1268_s0 + $0x40] ss:$16 sps:$4 sm:$0xff]   ;;  %v968_v43 = vld [vmem:[%s1268_s0 + $0x48] ss:$16 sps:$4 sm:$0xff]  }
  0x11   :  { %868 = vmatpush3.bf16.msra.mxu1 %v934_v15  ;;  %811 = vmatprep.subr.bf16.mxu0 %v935_v16  ;;  %v969_v44 = vld [vmem:[%s1268_s0 + $0x64] ss:$16 sps:$4 sm:$0xff]   ;;  %v971_v45 = vld [vmem:[%s1268_s0 + $0x6c] ss:$16 sps:$4 sm:$0xff]   ;;  %v973_v46 = vld [vmem:[%s1268_s0 + $0x60] ss:$16 sps:$4 sm:$0xff]  }
  0x12   :  { %869 = vmatprep.subr.bf16.mxu1 %v936_v17  ;;  %v974_v47 = vld [vmem:[%s1268_s0 + $0x68] ss:$16 sps:$4 sm:$0xff]   ;;  %v975_v48 = vld [vmem:[%s1268_s0 + $0x84] ss:$16 sps:$4 sm:$0xff]   ;;  %v977_v49 = vld [vmem:[%s1268_s0 + $0x8c] ss:$16 sps:$4 sm:$0xff]  }
  0x13   :  { %v979_v50 = vld [vmem:[%s1268_s0 + $0x80] ss:$16 sps:$4 sm:$0xff]   ;;  %v980_v51 = vld [vmem:[%s1268_s0 + $0x88] ss:$16 sps:$4 sm:$0xff]   ;;  %v981_v52 = vld [vmem:[%s1268_s0 + $0xa4] ss:$16 sps:$4 sm:$0xff]  }
  0x14   :  { %812 = vmatpush3.bf16.msra.mxu0 %v937_v18  ;;  %v983_v53 = vld [vmem:[%s1268_s0 + $0xac] ss:$16 sps:$4 sm:$0xff]   ;;  %v985_v54 = vld [vmem:[%s1268_s0 + $0xa0] ss:$16 sps:$4 sm:$0xff]   ;;  %v986_v55 = vld [vmem:[%s1268_s0 + $0xa8] ss:$16 sps:$4 sm:$0xff]  }
  0x15   :  { %870 = vmatpush3.bf16.msra.mxu1 %v938_v19  ;;  %813 = vmatprep.subr.bf16.mxu0 %v939_v20  ;;  %v987_v56 = vld [vmem:[%s1268_s0 + $0xc4] ss:$16 sps:$4 sm:$0x7f]   ;;  %v989_v57 = vld [vmem:[%s1268_s0 + $0xcc] ss:$16 sps:$4 sm:$0x7f]  }
  0x16   :  { %871 = vmatprep.subr.bf16.mxu1 %v940_v21  ;;  %v991_v58 = vld [vmem:[%s1268_s0 + $0xc0] ss:$16 sps:$4 sm:$0x7f]   ;;  %v992_v59 = vld [vmem:[%s1268_s0 + $0xc8] ss:$16 sps:$4 sm:$0x7f]  }
  0x18   :  { %814 = vmatpush3.bf16.msra.mxu0 %v941_v22 }
  0x19   :  { %872 = vmatpush3.bf16.msra.mxu1 %v942_v23  ;;  %815 = vmatprep.subr.bf16.mxu0 %v943_v24 }
  0x1a   :  { %873 = vmatprep.subr.bf16.mxu1 %v944_v25 }
  0x1c   :  { %816 = vmatpush3.bf16.msra.mxu0 %v945_v26 }
  0x1d   :  { %874 = vmatpush3.bf16.msra.mxu1 %v946_v27  ;;  %817 = vmatprep.subr.bf16.mxu0 %v947_v28 }
  0x1e   :  { %875 = vmatprep.subr.bf16.mxu1 %v948_v29 }
  0x20   :  { %818 = vmatpush3.bf16.msra.mxu0 %v949_v30 }
  0x21   :  { %876 = vmatpush3.bf16.msra.mxu1 %v950_v31 }
  0x23   :  { %479 = vmatmul.mubr.bf16.vlgmr.msra.gmra.mrb[0].mxu0 %v951_v32 }
  0x24   :  { %568 = vmatmul.mubr.bf16.vlgmr.msra.gmra.mrb[0].mxu1 %v954_v34  ;;  %486 = vmatprep.mubr.bf16.mxu0 %v957_v36 }
  0x25   :  { %575 = vmatprep.mubr.bf16.mxu1 %v959_v37 }
  0x2b   :  { %487 = vmatmul.mubr.bf16.gmra.mrb[4].mxu0 %v961_v38 }
  0x2c   :  { %576 = vmatmul.mubr.bf16.gmra.mrb[4].mxu1 %v962_v39  ;;  %494 = vmatprep.mubr.bf16.mxu0 %v963_v40 }
  0x2d   :  { %583 = vmatprep.mubr.bf16.mxu1 %v965_v41 }
  0x33   :  { %495 = vmatmul.mubr.bf16.gmra.mrb[8].mxu0 %v967_v42 }
  0x34   :  { %584 = vmatmul.mubr.bf16.gmra.mrb[8].mxu1 %v968_v43  ;;  %502 = vmatprep.mubr.bf16.mxu0 %v969_v44 }
  0x35   :  { %591 = vmatprep.mubr.bf16.mxu1 %v971_v45 }
  0x3b   :  { %503 = vmatmul.mubr.bf16.gmra.mrb[12].mxu0 %v973_v46 }
  0x3c   :  { %592 = vmatmul.mubr.bf16.gmra.mrb[12].mxu1 %v974_v47  ;;  %510 = vmatprep.mubr.bf16.mxu0 %v975_v48 }
  0x3d   :  { %599 = vmatprep.mubr.bf16.mxu1 %v977_v49 }
  0x43   :  { %511 = vmatmul.mubr.bf16.gmra.mrb[16].mxu0 %v979_v50 }
  0x44   :  { %600 = vmatmul.mubr.bf16.gmra.mrb[16].mxu1 %v980_v51  ;;  %518 = vmatprep.mubr.bf16.mxu0 %v981_v52 }
  0x45   :  { %607 = vmatprep.mubr.bf16.mxu1 %v983_v53 }
  0x4b   :  { %519 = vmatmul.mubr.bf16.gmra.mrb[20].mxu0 %v985_v54 }
  0x4c   :  { %608 = vmatmul.mubr.bf16.gmra.mrb[20].mxu1 %v986_v55  ;;  %526 = vmatprep.mubr.bf16.mxu0 %v987_v56 }
  0x4d   :  { %615 = vmatprep.mubr.bf16.mxu1 %v989_v57 }
  0x53   :  { %527 = vmatmul.mubr.bf16.gmra.mrb[24].mxu0 %v991_v58 }
  0x54   :  { %616 = vmatmul.mubr.bf16.gmra.mrb[24].mxu1 %v992_v59 }
  0xf6   :  { %v819_v60 = vpop.f32.mrb[0].mxu0 }
  0xf7   :  { %v877_v61 = vpop.f32.mrb[0].mxu1  ;;  %v820_v63 = vpop.f32.mrb[1].mxu0 }
  0xf8   :  { %v821_v0 = vadd.f32 %v820_v63, %v819_v60  ;;  %v878_v1 = vpop.f32.mrb[1].mxu1  ;;  %v822_v2 = vpop.f32.mrb[2].mxu0 }
  0xf9   :  { %v879_v3 = vadd.f32 %v878_v1, %v877_v61  ;;  %v880_v4 = vpop.f32.mrb[2].mxu1  ;;  %v823_v5 = vpop.f32.mrb[3].mxu0 }
  0xfa   :  { %v481_v6 = vadd.f32 %v821_v0, %v1196_v62  ;;  %v824_v7 = vadd.f32 %v823_v5, %v822_v2  ;;  %v881_v8 = vpop.f32.mrb[3].mxu1 }
  0xfb   :  { %v882_v9 = vadd.f32 %v881_v8, %v880_v4 }
  0xfc   :  { %v570_v10 = vadd.f32 %v879_v3, %v481_v6  ;;  %v484_v11 = vadd.f32 %v824_v7, %v1196_v62 }
  0xfe   :  { %v624_v12 = vmax.f32 %v570_v10, 0.0  ;;  %v573_v13 = vadd.f32 %v882_v9, %v484_v11  ;;  %v825_v14 = vpop.f32.mrb[4].mxu0 }
  0xff   :  { %v883_v15 = vpop.f32.mrb[4].mxu1  ;;  %v826_v16 = vpop.f32.mrb[5].mxu0 }
 0x100   :  { %v789_v17 = vpack.c.bf16 %v624_v12, %v624_v12  ;;  %v625_v18 = vmax.f32 %v573_v13, 0.0  ;;  %v827_v19 = vadd.f32 %v826_v16, %v825_v14  ;;  %v884_v20 = vpop.f32.mrb[5].mxu1  ;;  %v828_v21 = vpop.f32.mrb[6].mxu0 }
 0x101   :  { %v885_v22 = vadd.f32 %v884_v20, %v883_v15  ;;  %v886_v23 = vpop.f32.mrb[6].mxu1  ;;  %v829_v24 = vpop.f32.mrb[7].mxu0 }
 0x102   :  { %695 = vst.msk [vmem:[%s1270_s3] sm:$0xf] %vm694_vm0, %v789_v17  ;;  %v790_v25 = vpack.c.bf16 %v625_v18, %v625_v18  ;;  %v489_v26 = vadd.f32 %v827_v19, %v1196_v62  ;;  %v830_v27 = vadd.f32 %v829_v24, %v828_v21  ;;  %v887_v28 = vpop.f32.mrb[7].mxu1 }
 0x103   :  { %v888_v29 = vadd.f32 %v887_v28, %v886_v23 }
 0x104   :  { %696 = vst.msk [vmem:[%s1270_s3 + $0x4] sm:$0xf] %vm694_vm0, %v790_v25  ;;  %v578_v30 = vadd.f32 %v885_v22, %v489_v26  ;;  %v492_v31 = vadd.f32 %v830_v27, %v1196_v62 }
 0x106   :  { %v626_v32 = vmax.f32 %v578_v30, 0.0  ;;  %v581_v33 = vadd.f32 %v888_v29, %v492_v31  ;;  %v831_v34 = vpop.f32.mrb[8].mxu0 }
 0x107   :  { %v889_v35 = vpop.f32.mrb[8].mxu1  ;;  %v832_v36 = vpop.f32.mrb[9].mxu0 }
 0x108   :  { %v791_v37 = vpack.c.bf16 %v626_v32, %v626_v32  ;;  %v627_v38 = vmax.f32 %v581_v33, 0.0  ;;  %v833_v39 = vadd.f32 %v832_v36, %v831_v34  ;;  %v890_v40 = vpop.f32.mrb[9].mxu1  ;;  %v834_v41 = vpop.f32.mrb[10].mxu0 }
 0x109   :  { %v891_v42 = vadd.f32 %v890_v40, %v889_v35  ;;  %v892_v43 = vpop.f32.mrb[10].mxu1  ;;  %v835_v44 = vpop.f32.mrb[11].mxu0 }
 0x10a   :  { %697 = vst.msk [vmem:[%s1270_s3 + $0x8] sm:$0xf] %vm694_vm0, %v791_v37  ;;  %v792_v45 = vpack.c.bf16 %v627_v38, %v627_v38  ;;  %v497_v46 = vadd.f32 %v833_v39, %v1196_v62  ;;  %v836_v47 = vadd.f32 %v835_v44, %v834_v41  ;;  %v893_v48 = vpop.f32.mrb[11].mxu1 }
 0x10b   :  { %v894_v49 = vadd.f32 %v893_v48, %v892_v43 }
 0x10c   :  { %698 = vst.msk [vmem:[%s1270_s3 + $0xc] sm:$0xf] %vm694_vm0, %v792_v45  ;;  %v586_v50 = vadd.f32 %v891_v42, %v497_v46  ;;  %v500_v51 = vadd.f32 %v836_v47, %v1196_v62 }
 0x10e   :  { %v628_v52 = vmax.f32 %v586_v50, 0.0  ;;  %v589_v53 = vadd.f32 %v894_v49, %v500_v51  ;;  %v837_v54 = vpop.f32.mrb[12].mxu0 }
 0x10f   :  { %v895_v55 = vpop.f32.mrb[12].mxu1  ;;  %v838_v56 = vpop.f32.mrb[13].mxu0 }
 0x110   :  { %v793_v57 = vpack.c.bf16 %v628_v52, %v628_v52  ;;  %v629_v58 = vmax.f32 %v589_v53, 0.0  ;;  %v839_v59 = vadd.f32 %v838_v56, %v837_v54  ;;  %v896_v60 = vpop.f32.mrb[13].mxu1  ;;  %v840_v61 = vpop.f32.mrb[14].mxu0 }
 0x111   :  { %v897_v63 = vadd.f32 %v896_v60, %v895_v55  ;;  %v898_v0 = vpop.f32.mrb[14].mxu1  ;;  %v841_v1 = vpop.f32.mrb[15].mxu0 }
 0x112   :  { %699 = vst.msk [vmem:[%s1270_s3 + $0x10] sm:$0xf] %vm694_vm0, %v793_v57  ;;  %v794_v2 = vpack.c.bf16 %v629_v58, %v629_v58  ;;  %v505_v3 = vadd.f32 %v839_v59, %v1196_v62  ;;  %v842_v4 = vadd.f32 %v841_v1, %v840_v61  ;;  %v899_v5 = vpop.f32.mrb[15].mxu1 }
 0x113   :  { %v900_v6 = vadd.f32 %v899_v5, %v898_v0 }
 0x114   :  { %700 = vst.msk [vmem:[%s1270_s3 + $0x14] sm:$0xf] %vm694_vm0, %v794_v2  ;;  %v594_v7 = vadd.f32 %v897_v63, %v505_v3  ;;  %v508_v8 = vadd.f32 %v842_v4, %v1196_v62 }
 0x116   :  { %v630_v9 = vmax.f32 %v594_v7, 0.0  ;;  %v597_v10 = vadd.f32 %v900_v6, %v508_v8  ;;  %v843_v11 = vpop.f32.mrb[16].mxu0 }
 0x117   :  { %v901_v12 = vpop.f32.mrb[16].mxu1  ;;  %v844_v13 = vpop.f32.mrb[17].mxu0 }
 0x118   :  { %v795_v14 = vpack.c.bf16 %v630_v9, %v630_v9  ;;  %v631_v15 = vmax.f32 %v597_v10, 0.0  ;;  %v845_v16 = vadd.f32 %v844_v13, %v843_v11  ;;  %v902_v17 = vpop.f32.mrb[17].mxu1  ;;  %v846_v18 = vpop.f32.mrb[18].mxu0 }
 0x119   :  { %v903_v19 = vadd.f32 %v902_v17, %v901_v12  ;;  %v904_v20 = vpop.f32.mrb[18].mxu1  ;;  %v847_v21 = vpop.f32.mrb[19].mxu0 }
 0x11a   :  { %701 = vst.msk [vmem:[%s1270_s3 + $0x18] sm:$0xf] %vm694_vm0, %v795_v14  ;;  %v796_v22 = vpack.c.bf16 %v631_v15, %v631_v15  ;;  %v513_v23 = vadd.f32 %v845_v16, %v1196_v62  ;;  %v848_v24 = vadd.f32 %v847_v21, %v846_v18  ;;  %v905_v25 = vpop.f32.mrb[19].mxu1 }
 0x11b   :  { %v906_v26 = vadd.f32 %v905_v25, %v904_v20 }
 0x11c   :  { %702 = vst.msk [vmem:[%s1270_s3 + $0x1c] sm:$0xf] %vm694_vm0, %v796_v22  ;;  %v602_v27 = vadd.f32 %v903_v19, %v513_v23  ;;  %v516_v28 = vadd.f32 %v848_v24, %v1196_v62 }
 0x11e   :  { %v632_v29 = vmax.f32 %v602_v27, 0.0  ;;  %v605_v30 = vadd.f32 %v906_v26, %v516_v28  ;;  %v849_v31 = vpop.f32.mrb[20].mxu0 }
 0x11f   :  { %v907_v32 = vpop.f32.mrb[20].mxu1  ;;  %v850_v33 = vpop.f32.mrb[21].mxu0 }
 0x120   :  { %v797_v34 = vpack.c.bf16 %v632_v29, %v632_v29  ;;  %v633_v35 = vmax.f32 %v605_v30, 0.0  ;;  %v851_v36 = vadd.f32 %v850_v33, %v849_v31  ;;  %v908_v37 = vpop.f32.mrb[21].mxu1  ;;  %v852_v38 = vpop.f32.mrb[22].mxu0 }
 0x121   :  { %v909_v39 = vadd.f32 %v908_v37, %v907_v32  ;;  %v910_v40 = vpop.f32.mrb[22].mxu1  ;;  %v853_v41 = vpop.f32.mrb[23].mxu0 }
 0x122   :  { %703 = vst.msk [vmem:[%s1270_s3 + $0x20] sm:$0xf] %vm694_vm0, %v797_v34  ;;  %v798_v42 = vpack.c.bf16 %v633_v35, %v633_v35  ;;  %v521_v43 = vadd.f32 %v851_v36, %v1196_v62  ;;  %v854_v44 = vadd.f32 %v853_v41, %v852_v38  ;;  %v911_v45 = vpop.f32.mrb[23].mxu1 }
 0x123   :  { %v912_v46 = vadd.f32 %v911_v45, %v910_v40 }
 0x124   :  { %704 = vst.msk [vmem:[%s1270_s3 + $0x24] sm:$0xf] %vm694_vm0, %v798_v42  ;;  %v610_v47 = vadd.f32 %v909_v39, %v521_v43  ;;  %v524_v48 = vadd.f32 %v854_v44, %v1196_v62 }
 0x126   :  { %v634_v49 = vmax.f32 %v610_v47, 0.0  ;;  %v613_v50 = vadd.f32 %v912_v46, %v524_v48  ;;  %v855_v51 = vpop.f32.mrb[24].mxu0 }
 0x127   :  { %v913_v52 = vpop.f32.mrb[24].mxu1  ;;  %v856_v53 = vpop.f32.mrb[25].mxu0 }
 0x128   :  { %v799_v54 = vpack.c.bf16 %v634_v49, %v634_v49  ;;  %v635_v55 = vmax.f32 %v613_v50, 0.0  ;;  %v857_v56 = vadd.f32 %v856_v53, %v855_v51  ;;  %v914_v57 = vpop.f32.mrb[25].mxu1  ;;  %v858_v58 = vpop.f32.mrb[26].mxu0 }
 0x129   :  { %v915_v59 = vadd.f32 %v914_v57, %v913_v52  ;;  %v916_v60 = vpop.f32.mrb[26].mxu1  ;;  %v859_v61 = vpop.f32.mrb[27].mxu0 }
 0x12a   :  { %705 = vst.msk [vmem:[%s1270_s3 + $0x28] sm:$0xf] %vm694_vm0, %v799_v54  ;;  %v800_v63 = vpack.c.bf16 %v635_v55, %v635_v55  ;;  %v529_v0 = vadd.f32 %v857_v56, %v1196_v62  ;;  %v860_v1 = vadd.f32 %v859_v61, %v858_v58  ;;  %v917_v2 = vpop.f32.mrb[27].mxu1 }
 0x12b   :  { %v918_v3 = vadd.f32 %v917_v2, %v916_v60 }
 0x12c   :  { %706 = vst.msk [vmem:[%s1270_s3 + $0x2c] sm:$0xf] %vm694_vm0, %v800_v63  ;;  %v618_v4 = vadd.f32 %v915_v59, %v529_v0  ;;  %v532_v5 = vadd.f32 %v860_v1, %v1196_v62 }
 0x12e   :  { %v636_v6 = vmax.f32 %v618_v4, 0.0  ;;  %v621_v7 = vadd.f32 %v918_v3, %v532_v5 }
 0x130   :  { %v801_v8 = vpack.c.bf16 %v636_v6, %v636_v6  ;;  %v637_v9 = vmax.f32 %v621_v7, 0.0 }
 0x132   :  { %707 = vst.msk [vmem:[%s1270_s3 + $0x30] sm:$0xf] %vm694_vm0, %v801_v8  ;;  %v802_v10 = vpack.c.bf16 %v637_v9, %v637_v9 }
 0x134   :  { %709 = vst.msk [vmem:[%s1270_s3 + $0x34] sm:$0x7] %vm708_vm1, %v802_v10 }

// kernel: actor_forward.6
= control target key start
LH: loop header
LB: loop body
LE: loop exit
PB: predicated region body
PF: predicated region fallthrough
CT: control target
= control target key end

     0   :  { %v1271_v34 = vmov 0.0   ;;  %vm1272_vm0 = vmmov 0   ;;  %vm527_vm1 = vcmask 523264   ;;  %vm886_vm2 = vcmask 519168   ;;  %s1633_s1 = inlined_call_operand.vmem [shape: bf16[576,64], index: 1, kind: input, shape index: {}]   ;;  %s1634_s0 = inlined_call_operand.vmem [shape: bf16[110,576], index: 0, kind: input, shape index: {}]   ;;  %s1635_s2 = inlined_call_operand.vmem [shape: f32[1,64], index: 2, kind: input, shape index: {}]   ;;  %s1636_s3 = inlined_call_operand.vmem [shape: bf16[110,64], index: 3, kind: output, shape index: {}]  }
   0x1   :  { %v1186_v0 = vld [vmem:[%s1633_s1 + $0x40] sm:$0xff]   ;;  %v1190_v4 = vld [vmem:[%s1633_s1 + $0x48] sm:$0xff]   ;;  %v1194_v8 = vld [vmem:[%s1633_s1 + $0x50] sm:$0xff]   ;;  %vm900_vm3 = vcmask 518144  }
   0x2   :  { %v1187_v1 = vld [vmem:[%s1633_s1 + $0xc0] sm:$0xff]   ;;  %1013 = vmatprep.subr.bf16.mxu0 %v1186_v0  ;;  %v1191_v5 = vld [vmem:[%s1633_s1 + $0xc8] sm:$0xff]   ;;  %v1195_v9 = vld [vmem:[%s1633_s1 + $0xd0] sm:$0xff]  }
   0x3   :  { %v1188_v2 = vld [vmem:[%s1633_s1] sm:$0xff]   ;;  %1071 = vmatprep.subr.bf16.mxu1 %v1187_v1  ;;  %v1192_v6 = vld [vmem:[%s1633_s1 + $0x8] sm:$0xff]   ;;  %v1196_v10 = vld [vmem:[%s1633_s1 + $0x10] sm:$0xff]  }
   0x4   :  { %v1189_v3 = vld [vmem:[%s1633_s1 + $0x80] sm:$0xff]   ;;  %1014 = vmatpush3.bf16.msra.mxu0 %v1188_v2  ;;  %v1193_v7 = vld [vmem:[%s1633_s1 + $0x88] sm:$0xff]   ;;  %v1197_v11 = vld [vmem:[%s1633_s1 + $0x90] sm:$0xff]  }
   0x5   :  { %1072 = vmatpush3.bf16.msra.mxu1 %v1189_v3  ;;  %1015 = vmatprep.subr.bf16.mxu0 %v1190_v4  ;;  %v1198_v12 = vld [vmem:[%s1633_s1 + $0x58] sm:$0xff]   ;;  %v1202_v16 = vld [vmem:[%s1633_s1 + $0x60] sm:$0xff]   ;;  %v1206_v20 = vld [vmem:[%s1633_s1 + $0x68] sm:$0xff]  }
   0x6   :  { %1073 = vmatprep.subr.bf16.mxu1 %v1191_v5  ;;  %v1199_v13 = vld [vmem:[%s1633_s1 + $0xd8] sm:$0xff]   ;;  %v1203_v17 = vld [vmem:[%s1633_s1 + $0xe0] sm:$0xff]   ;;  %v1207_v21 = vld [vmem:[%s1633_s1 + $0xe8] sm:$0xff]  }
   0x7   :  { %v1200_v14 = vld [vmem:[%s1633_s1 + $0x18] sm:$0xff]   ;;  %v1204_v18 = vld [vmem:[%s1633_s1 + $0x20] sm:$0xff]   ;;  %v1208_v22 = vld [vmem:[%s1633_s1 + $0x28] sm:$0xff]  }
   0x8   :  { %1016 = vmatpush3.bf16.msra.mxu0 %v1192_v6  ;;  %v1201_v15 = vld [vmem:[%s1633_s1 + $0x98] sm:$0xff]   ;;  %v1205_v19 = vld [vmem:[%s1633_s1 + $0xa0] sm:$0xff]   ;;  %v1209_v23 = vld [vmem:[%s1633_s1 + $0xa8] sm:$0xff]  }
   0x9   :  { %1074 = vmatpush3.bf16.msra.mxu1 %v1193_v7  ;;  %1017 = vmatprep.subr.bf16.mxu0 %v1194_v8  ;;  %v1210_v24 = vld [vmem:[%s1633_s1 + $0x70] sm:$0xff]   ;;  %v1214_v28 = vld [vmem:[%s1633_s1 + $0x78] sm:$0xff]   ;;  %v1223_v36 = vld [vmem:[%s1634_s0 + $0xc] ss:$20 sps:$4 sm:$0xff]  }
   0xa   :  { %1075 = vmatprep.subr.bf16.mxu1 %v1195_v9  ;;  %v1211_v25 = vld [vmem:[%s1633_s1 + $0xf0] sm:$0xff]   ;;  %v1215_v29 = vld [vmem:[%s1633_s1 + $0xf8] sm:$0xff]   ;;  %v1224_v37 = vld [vmem:[%s1633_s1 + $0x100] sm:$0xff]   ;;  %670 = vmatprep.mubr.bf16.mxu1 %v1223_v36 }
   0xb   :  { %v1212_v26 = vld [vmem:[%s1633_s1 + $0x30] sm:$0xff]   ;;  %v1216_v30 = vld [vmem:[%s1633_s1 + $0x38] sm:$0xff]   ;;  %v1225_v38 = vld [vmem:[%s1634_s0 + $0x2c] ss:$20 sps:$4 sm:$0xff]  }
   0xc   :  { %1018 = vmatpush3.bf16.msra.mxu0 %v1196_v10  ;;  %v1213_v27 = vld [vmem:[%s1633_s1 + $0xb0] sm:$0xff]   ;;  %v1217_v31 = vld [vmem:[%s1633_s1 + $0xb8] sm:$0xff]   ;;  %v1235_v43 = vld [vmem:[%s1633_s1 + $0x108] sm:$0xff]  }
   0xd   :  { %1076 = vmatpush3.bf16.msra.mxu1 %v1197_v11  ;;  %1019 = vmatprep.subr.bf16.mxu0 %v1198_v12  ;;  %v1218_v32 = vld [vmem:[%s1634_s0] ss:$20 sps:$4 sm:$0xff]   ;;  %v1220_v33 = vld [vmem:[%s1634_s0 + $0x4] ss:$20 sps:$4 sm:$0xff]   ;;  %v1221_v35 = vld [vmem:[%s1634_s0 + $0x8] ss:$20 sps:$4 sm:$0xff]  }
   0xe   :  { %1077 = vmatprep.subr.bf16.mxu1 %v1199_v13  ;;  %581 = vmatprep.mubr.bf16.mxu0 %v1220_v33  ;;  %v1227_v39 = vld [vmem:[%s1634_s0 + $0x34] ss:$20 sps:$4 sm:$0xff]   ;;  %v1230_v41 = vld [vmem:[%s1634_s0 + $0x30] ss:$20 sps:$4 sm:$0xff]   ;;  %v1237_v47 = vld [vmem:[%s1634_s0 + $0x58] ss:$20 sps:$4 sm:$0xff]  }
   0xf   :  { %v1229_v40 = vld [vmem:[%s1634_s0 + $0x28] ss:$20 sps:$4 sm:$0xff]   ;;  %v1244_v45 = vld [vmem:[%s1633_s1 + $0x110] sm:$0xff]   ;;  %v1240_v49 = vld [vmem:[%s1634_s0 + $0x84] ss:$20 sps:$4 sm:$0xff]  }
  0x10   :  { %1020 = vmatpush3.bf16.msra.mxu0 %v1200_v14  ;;  %v1231_v42 = vld [vmem:[%s1634_s0 + $0x54] ss:$20 sps:$4 sm:$0xff]   ;;  %v1233_v44 = vld [vmem:[%s1634_s0 + $0x5c] ss:$20 sps:$4 sm:$0xff]   ;;  %v1242_v51 = vld [vmem:[%s1634_s0 + $0x78] ss:$20 sps:$4 sm:$0xff]  }
  0x11   :  { %1078 = vmatpush3.bf16.msra.mxu1 %v1201_v15  ;;  %1021 = vmatprep.subr.bf16.mxu0 %v1202_v16  ;;  %v1236_v46 = vld [vmem:[%s1634_s0 + $0x50] ss:$20 sps:$4 sm:$0xff]   ;;  %v1257_v50 = vld [vmem:[%s1633_s1 + $0x118] sm:$0xff]   ;;  %v1243_v52 = vld [vmem:[%s1634_s0 + $0x80] ss:$20 sps:$4 sm:$0xff]  }
  0x12   :  { %1079 = vmatprep.subr.bf16.mxu1 %v1203_v17  ;;  %v1238_v48 = vld [vmem:[%s1634_s0 + $0x7c] ss:$20 sps:$4 sm:$0xff]   ;;  %v1245_v53 = vld [vmem:[%s1634_s0 + $0xa4] ss:$20 sps:$4 sm:$0xff]   ;;  %v1247_v54 = vld [vmem:[%s1634_s0 + $0xac] ss:$20 sps:$4 sm:$0xff]  }
  0x13   :  { %v1249_v55 = vld [vmem:[%s1634_s0 + $0xa0] ss:$20 sps:$4 sm:$0xff]   ;;  %v1250_v56 = vld [vmem:[%s1634_s0 + $0xa8] ss:$20 sps:$4 sm:$0xff]   ;;  %v1256_v60 = vld [vmem:[%s1634_s0 + $0xd0] ss:$20 sps:$4 sm:$0xff]  }
  0x14   :  { %1022 = vmatpush3.bf16.msra.mxu0 %v1204_v18  ;;  %v1251_v57 = vld [vmem:[%s1634_s0 + $0xcc] ss:$20 sps:$4 sm:$0xff]   ;;  %v1253_v58 = vld [vmem:[%s1634_s0 + $0xd4] ss:$20 sps:$4 sm:$0xff]   ;;  %v1264_v1 = vld [vmem:[%s1634_s0 + $0x10] ss:$20 sps:$4 sm:$0xff]  }
  0x15   :  { %1080 = vmatpush3.bf16.msra.mxu1 %v1205_v19  ;;  %1023 = vmatprep.subr.bf16.mxu0 %v1206_v20  ;;  %v1255_v59 = vld [vmem:[%s1634_s0 + $0xc8] ss:$20 sps:$4 sm:$0xff]   ;;  %v1262_v63 = vld [vmem:[%s1634_s0 + $0xf0] ss:$20 sps:$4 sm:$0x7f]  }
  0x16   :  { %1081 = vmatprep.subr.bf16.mxu1 %v1207_v21  ;;  %v1258_v61 = vld [vmem:[%s1634_s0 + $0xf4] ss:$20 sps:$4 sm:$0x7f]   ;;  %v1260_v62 = vld [vmem:[%s1634_s0 + $0xfc] ss:$20 sps:$4 sm:$0x7f]  }
  0x17   :  { %v1263_v0 = vld [vmem:[%s1634_s0 + $0xf8] ss:$20 sps:$4 sm:$0x7f]   ;;  %v1265_v2 = vld [vmem:[%s1634_s0 + $0xb0] ss:$20 sps:$4 sm:$0xff]  }
  0x18   :  { %1024 = vmatpush3.bf16.msra.mxu0 %v1208_v22  ;;  %v1266_v3 = vld [vmem:[%s1634_s0 + $0x38] ss:$20 sps:$4 sm:$0xff]   ;;  %v1268_v5 = vld [vmem:[%s1634_s0 + $0x60] ss:$20 sps:$4 sm:$0xff]   ;;  %v1270_v7 = vld [vmem:[%s1634_s0 + $0x88] ss:$20 sps:$4 sm:$0xff]  }
  0x19   :  { %1082 = vmatpush3.bf16.msra.mxu1 %v1209_v23  ;;  %1025 = vmatprep.subr.bf16.mxu0 %v1210_v24  ;;  %v1267_v4 = vld [vmem:[%s1634_s0 + $0xd8] ss:$20 sps:$4 sm:$0xff]   ;;  %v1269_v6 = vld [vmem:[%s1634_s0 + $0x100] ss:$20 sps:$4 sm:$0x7f]  }
  0x1a   :  { %1083 = vmatprep.subr.bf16.mxu1 %v1211_v25  ;;  %v1538_v9 = vld [vmem:[%s1635_s2] ss:$0 sm:$0xff] }
  0x1c   :  { %1026 = vmatpush3.bf16.msra.mxu0 %v1212_v26 }
  0x1d   :  { %1084 = vmatpush3.bf16.msra.mxu1 %v1213_v27  ;;  %1027 = vmatprep.subr.bf16.mxu0 %v1214_v28 }
  0x1e   :  { %1085 = vmatprep.subr.bf16.mxu1 %v1215_v29 }
  0x20   :  { %1028 = vmatpush3.bf16.msra.mxu0 %v1216_v30 }
  0x21   :  { %1086 = vmatpush3.bf16.msra.mxu1 %v1217_v31  ;;  %1140 = vmatprep.subr.bf16.mxu0 %v1271_v34 }
  0x22   :  { %1176 = vmatprep.subr.bf16.mxu1 %v1271_v34 }
  0x23   :  { %582 = vmatmul.mubr.bf16.vlgmr.msra.gmra.mrb[0].mxu0 %v1218_v32 }
  0x24   :  { %671 = vmatmul.mubr.bf16.vlgmr.msra.gmra.mrb[0].mxu1 %v1221_v35  ;;  %1141 = vmatpush3.bf16.msra.mxu0 %v1224_v37 }
  0x25   :  { %589 = vmatprep.mubr.bf16.mxu0 %v1225_v38  ;;  %1180 = vmatpush3.bf16.msra.mxu1 %v1224_v37 }
  0x26   :  { %678 = vmatprep.mubr.bf16.mxu1 %v1227_v39  ;;  %1142 = vmatprep.subr.bf16.mxu0 %v1271_v34 }
  0x27   :  { %1177 = vmatprep.subr.bf16.mxu1 %v1271_v34 }
  0x28   :  { %1143 = vmatpush3.bf16.msra.mxu0 %v1235_v43 }
  0x29   :  { %1181 = vmatpush3.bf16.msra.mxu1 %v1235_v43  ;;  %1144 = vmatprep.subr.bf16.mxu0 %v1271_v34 }
  0x2a   :  { %1178 = vmatprep.subr.bf16.mxu1 %v1271_v34 }
  0x2b   :  { %590 = vmatmul.mubr.bf16.gmra.mrb[4].mxu0 %v1229_v40 }
  0x2c   :  { %679 = vmatmul.mubr.bf16.gmra.mrb[4].mxu1 %v1230_v41  ;;  %597 = vmatprep.mubr.bf16.mxu0 %v1231_v42 }
  0x2d   :  { %686 = vmatprep.mubr.bf16.mxu1 %v1233_v44  ;;  %1145 = vmatpush3.bf16.msra.mxu0 %v1244_v45 }
  0x2e   :  { %1182 = vmatpush3.bf16.msra.mxu1 %v1244_v45  ;;  %1146 = vmatprep.subr.bf16.mxu0 %v1271_v34 }
  0x2f   :  { %1179 = vmatprep.subr.bf16.mxu1 %v1271_v34 }
  0x31   :  { %1147 = vmatpush3.bf16.msra.mxu0 %v1257_v50 }
  0x32   :  { %1183 = vmatpush3.bf16.msra.mxu1 %v1257_v50 }
  0x33   :  { %598 = vmatmul.mubr.bf16.gmra.mrb[8].mxu0 %v1236_v46 }
  0x34   :  { %687 = vmatmul.mubr.bf16.gmra.mrb[8].mxu1 %v1237_v47  ;;  %605 = vmatprep.mubr.bf16.mxu0 %v1238_v48 }
  0x35   :  { %694 = vmatprep.mubr.bf16.mxu1 %v1240_v49 }
  0x3b   :  { %606 = vmatmul.mubr.bf16.gmra.mrb[12].mxu0 %v1242_v51 }
  0x3c   :  { %695 = vmatmul.mubr.bf16.gmra.mrb[12].mxu1 %v1243_v52  ;;  %613 = vmatprep.mubr.bf16.mxu0 %v1245_v53 }
  0x3d   :  { %702 = vmatprep.mubr.bf16.mxu1 %v1247_v54 }
  0x43   :  { %614 = vmatmul.mubr.bf16.gmra.mrb[16].mxu0 %v1249_v55 }
  0x44   :  { %703 = vmatmul.mubr.bf16.gmra.mrb[16].mxu1 %v1250_v56  ;;  %621 = vmatprep.mubr.bf16.mxu0 %v1251_v57 }
  0x45   :  { %710 = vmatprep.mubr.bf16.mxu1 %v1253_v58 }
  0x4b   :  { %622 = vmatmul.mubr.bf16.gmra.mrb[20].mxu0 %v1255_v59 }
  0x4c   :  { %711 = vmatmul.mubr.bf16.gmra.mrb[20].mxu1 %v1256_v60  ;;  %629 = vmatprep.mubr.bf16.mxu0 %v1258_v61 }
  0x4d   :  { %718 = vmatprep.mubr.bf16.mxu1 %v1260_v62 }
  0x53   :  { %630 = vmatmul.mubr.bf16.gmra.mrb[24].mxu0 %v1262_v63 }
  0x54   :  { %719 = vmatmul.mubr.bf16.gmra.mrb[24].mxu1 %v1263_v0  ;;  %1148 = vmatprep.mubr.msk.bf16.mxu0 %vm1272_vm0, %v1271_v34 }
  0x55   :  { %1164 = vmatprep.mubr.msk.bf16.mxu1 %vm1272_vm0, %v1271_v34 }
  0x5b   :  { %1149 = vmatmul.mubr.msk.bf16.vlgmr.msra.gmra.mrb[28].mxu0 %vm527_vm1, %v1264_v1 }
  0x5c   :  { %1165 = vmatmul.mubr.msk.bf16.vlgmr.msra.gmra.mrb[28].mxu1 %vm527_vm1, %v1265_v2  ;;  %1152 = vmatprep.mubr.msk.bf16.mxu0 %vm1272_vm0, %v1271_v34 }
  0x5d   :  { %1168 = vmatprep.mubr.msk.bf16.mxu1 %vm1272_vm0, %v1271_v34 }
  0x63   :  { %1153 = vmatmul.mubr.msk.bf16.gmra.mrb[32].mxu0 %vm527_vm1, %v1266_v3 }
  0x64   :  { %1169 = vmatmul.mubr.msk.bf16.gmra.mrb[32].mxu1 %vm527_vm1, %v1267_v4  ;;  %1156 = vmatprep.mubr.msk.bf16.mxu0 %vm1272_vm0, %v1271_v34 }
  0x65   :  { %1172 = vmatprep.mubr.msk.bf16.mxu1 %vm1272_vm0, %v1271_v34 }
  0x6b   :  { %1157 = vmatmul.mubr.msk.bf16.gmra.mrb[36].mxu0 %vm527_vm1, %v1268_v5 }
  0x6c   :  { %1173 = vmatmul.mubr.msk.bf16.gmra.mrb[36].mxu1 %vm527_vm1, %v1269_v6  ;;  %1160 = vmatprep.mubr.msk.bf16.mxu0 %vm1272_vm0, %v1271_v34 }
  0x73   :  { %1161 = vmatmul.mubr.msk.bf16.gmra.mrb[40].mxu0 %vm527_vm1, %v1270_v7 }
  0xf6   :  { %v1029_v8 = vpop.f32.mrb[0].mxu0 }
  0xf7   :  { %v1030_v10 = vpop.f32.mrb[1].mxu0  ;;  %v1087_v11 = vpop.f32.mrb[0].mxu1 }
  0xf8   :  { %v1031_v12 = vadd.f32 %v1030_v10, %v1029_v8  ;;  %v1032_v13 = vpop.f32.mrb[2].mxu0  ;;  %v1088_v14 = vpop.f32.mrb[1].mxu1 }
  0xf9   :  { %v1033_v15 = vpop.f32.mrb[3].mxu0  ;;  %v1089_v16 = vadd.f32 %v1088_v14, %v1087_v11  ;;  %v1090_v17 = vpop.f32.mrb[2].mxu1 }
  0xfa   :  { %v584_v18 = vadd.f32 %v1031_v12, %v1538_v9  ;;  %v1034_v19 = vadd.f32 %v1033_v15, %v1032_v13  ;;  %v1091_v20 = vpop.f32.mrb[3].mxu1 }
  0xfb   :  { %v1092_v21 = vadd.f32 %v1091_v20, %v1090_v17 }
  0xfc   :  { %v587_v22 = vadd.f32 %v1034_v19, %v1538_v9  ;;  %v1542_v23 = vadd.f32 %v1089_v16, %v584_v18 }
  0xfe   :  { %v1035_v24 = vpop.f32.mrb[4].mxu0  ;;  %v1544_v25 = vadd.f32 %v1092_v21, %v587_v22 }
  0xff   :  { %v1036_v26 = vpop.f32.mrb[5].mxu0  ;;  %v1093_v27 = vpop.f32.mrb[4].mxu1 }
 0x100   :  { %v1037_v28 = vadd.f32 %v1036_v26, %v1035_v24  ;;  %v1038_v29 = vpop.f32.mrb[6].mxu0  ;;  %v1094_v30 = vpop.f32.mrb[5].mxu1 }
 0x101   :  { %v1039_v31 = vpop.f32.mrb[7].mxu0  ;;  %v1095_v32 = vadd.f32 %v1094_v30, %v1093_v27  ;;  %v1096_v33 = vpop.f32.mrb[6].mxu1 }
 0x102   :  { %v592_v34 = vadd.f32 %v1037_v28, %v1538_v9  ;;  %v1040_v35 = vadd.f32 %v1039_v31, %v1038_v29  ;;  %v1097_v36 = vpop.f32.mrb[7].mxu1 }
 0x103   :  { %v1098_v37 = vadd.f32 %v1097_v36, %v1096_v33 }
 0x104   :  { %v595_v38 = vadd.f32 %v1040_v35, %v1538_v9  ;;  %v1548_v39 = vadd.f32 %v1095_v32, %v592_v34 }
 0x106   :  { %v1041_v40 = vpop.f32.mrb[8].mxu0  ;;  %v1550_v41 = vadd.f32 %v1098_v37, %v595_v38 }
 0x107   :  { %v1042_v42 = vpop.f32.mrb[9].mxu0  ;;  %v1099_v43 = vpop.f32.mrb[8].mxu1 }
 0x108   :  { %v1043_v44 = vadd.f32 %v1042_v42, %v1041_v40  ;;  %v1044_v45 = vpop.f32.mrb[10].mxu0  ;;  %v1100_v46 = vpop.f32.mrb[9].mxu1 }
 0x109   :  { %v1045_v47 = vpop.f32.mrb[11].mxu0  ;;  %v1101_v48 = vadd.f32 %v1100_v46, %v1099_v43  ;;  %v1102_v49 = vpop.f32.mrb[10].mxu1 }
 0x10a   :  { %v600_v50 = vadd.f32 %v1043_v44, %v1538_v9  ;;  %v1046_v51 = vadd.f32 %v1045_v47, %v1044_v45  ;;  %v1103_v52 = vpop.f32.mrb[11].mxu1 }
 0x10b   :  { %v1104_v53 = vadd.f32 %v1103_v52, %v1102_v49 }
 0x10c   :  { %v603_v54 = vadd.f32 %v1046_v51, %v1538_v9  ;;  %v1554_v55 = vadd.f32 %v1101_v48, %v600_v50 }
 0x10e   :  { %v1047_v56 = vpop.f32.mrb[12].mxu0  ;;  %v1556_v57 = vadd.f32 %v1104_v53, %v603_v54 }
 0x10f   :  { %v1048_v58 = vpop.f32.mrb[13].mxu0  ;;  %v1105_v59 = vpop.f32.mrb[12].mxu1 }
 0x110   :  { %v1049_v60 = vadd.f32 %v1048_v58, %v1047_v56  ;;  %v1050_v61 = vpop.f32.mrb[14].mxu0  ;;  %v1106_v62 = vpop.f32.mrb[13].mxu1 }
 0x111   :  { %v1051_v63 = vpop.f32.mrb[15].mxu0  ;;  %v1107_v0 = vadd.f32 %v1106_v62, %v1105_v59  ;;  %v1108_v1 = vpop.f32.mrb[14].mxu1 }
 0x112   :  { %v608_v2 = vadd.f32 %v1049_v60, %v1538_v9  ;;  %v1052_v3 = vadd.f32 %v1051_v63, %v1050_v61  ;;  %v1109_v4 = vpop.f32.mrb[15].mxu1 }
 0x113   :  { %v1110_v5 = vadd.f32 %v1109_v4, %v1108_v1 }
 0x114   :  { %v611_v6 = vadd.f32 %v1052_v3, %v1538_v9  ;;  %v1560_v7 = vadd.f32 %v1107_v0, %v608_v2 }
 0x116   :  { %v1053_v8 = vpop.f32.mrb[16].mxu0  ;;  %v1562_v10 = vadd.f32 %v1110_v5, %v611_v6 }
 0x117   :  { %v1054_v11 = vpop.f32.mrb[17].mxu0  ;;  %v1111_v12 = vpop.f32.mrb[16].mxu1 }
 0x118   :  { %v1055_v13 = vadd.f32 %v1054_v11, %v1053_v8  ;;  %v1056_v14 = vpop.f32.mrb[18].mxu0  ;;  %v1112_v15 = vpop.f32.mrb[17].mxu1 }
 0x119   :  { %v1057_v16 = vpop.f32.mrb[19].mxu0  ;;  %v1113_v17 = vadd.f32 %v1112_v15, %v1111_v12  ;;  %v1114_v18 = vpop.f32.mrb[18].mxu1 }
 0x11a   :  { %v616_v19 = vadd.f32 %v1055_v13, %v1538_v9  ;;  %v1058_v20 = vadd.f32 %v1057_v16, %v1056_v14  ;;  %v1115_v21 = vpop.f32.mrb[19].mxu1 }
 0x11b   :  { %v1116_v22 = vadd.f32 %v1115_v21, %v1114_v18 }
 0x11c   :  { %v619_v24 = vadd.f32 %v1058_v20, %v1538_v9  ;;  %v705_v26 = vadd.f32 %v1113_v17, %v616_v19 }
 0x11e   :  { %v1059_v27 = vpop.f32.mrb[20].mxu0  ;;  %v708_v28 = vadd.f32 %v1116_v22, %v619_v24 }
 0x11f   :  { %v1060_v29 = vpop.f32.mrb[21].mxu0  ;;  %v1117_v30 = vpop.f32.mrb[20].mxu1 }
 0x120   :  { %v1061_v31 = vadd.f32 %v1060_v29, %v1059_v27  ;;  %v1062_v32 = vpop.f32.mrb[22].mxu0  ;;  %v1118_v33 = vpop.f32.mrb[21].mxu1 }
 0x121   :  { %v1063_v34 = vpop.f32.mrb[23].mxu0  ;;  %v1119_v35 = vadd.f32 %v1118_v33, %v1117_v30  ;;  %v1120_v36 = vpop.f32.mrb[22].mxu1 }
 0x122   :  { %v624_v37 = vadd.f32 %v1061_v31, %v1538_v9  ;;  %v1064_v38 = vadd.f32 %v1063_v34, %v1062_v32  ;;  %v1121_v40 = vpop.f32.mrb[23].mxu1 }
 0x123   :  { %v1122_v42 = vadd.f32 %v1121_v40, %v1120_v36 }
 0x124   :  { %v627_v43 = vadd.f32 %v1064_v38, %v1538_v9  ;;  %v713_v44 = vadd.f32 %v1119_v35, %v624_v37 }
 0x126   :  { %v1065_v45 = vpop.f32.mrb[24].mxu0  ;;  %v716_v46 = vadd.f32 %v1122_v42, %v627_v43 }
 0x127   :  { %v1066_v47 = vpop.f32.mrb[25].mxu0  ;;  %v1123_v48 = vpop.f32.mrb[24].mxu1 }
 0x128   :  { %v1067_v49 = vadd.f32 %v1066_v47, %v1065_v45  ;;  %v1068_v50 = vpop.f32.mrb[26].mxu0  ;;  %v1124_v51 = vpop.f32.mrb[25].mxu1 }
 0x129   :  { %v1069_v52 = vpop.f32.mrb[27].mxu0  ;;  %v1125_v53 = vadd.f32 %v1124_v51, %v1123_v48  ;;  %v1126_v54 = vpop.f32.mrb[26].mxu1 }
 0x12a   :  { %v632_v56 = vadd.f32 %v1067_v49, %v1538_v9  ;;  %v1070_v58 = vadd.f32 %v1069_v52, %v1068_v50  ;;  %v1127_v59 = vpop.f32.mrb[27].mxu1 }
 0x12b   :  { %v1128_v60 = vadd.f32 %v1127_v59, %v1126_v54 }
 0x12c   :  { %v635_v61 = vadd.f32 %v1070_v58, %v1538_v9  ;;  %v721_v62 = vadd.f32 %v1125_v53, %v632_v56 }
 0x12e   :  { %v761_v63 = vpop.f32.mrb[28].mxu0  ;;  %v724_v0 = vadd.f32 %v1128_v60, %v635_v61 }
 0x12f   :  { %v762_v1 = vadd.f32 %v761_v63, %v1542_v23  ;;  %v793_v2 = vpop.f32.mrb[28].mxu1  ;;  %v1150_v3 = vpop.f32.mrb[29].mxu0 }
 0x130   :  { %v794_v4 = vadd.f32 %v793_v2, %v705_v26  ;;  %v1166_v5 = vpop.f32.mrb[29].mxu1  ;;  %v764_v6 = vpop.f32.mrb[30].mxu0 }
 0x131   :  { %v816_v8 = vmax.f32 %v762_v1, 0.0  ;;  %v765_v11 = vadd.f32 %v764_v6, %v1544_v25  ;;  %v796_v12 = vpop.f32.mrb[30].mxu1  ;;  %v1151_v13 = vpop.f32.mrb[31].mxu0 }
 0x132   :  { %v824_v14 = vmax.f32 %v794_v4, 0.0  ;;  %v797_v15 = vadd.f32 %v796_v12, %v708_v28  ;;  %v1167_v16 = vpop.f32.mrb[31].mxu1 }
 0x133   :  { %v999_v9 = vpack.c.bf16 %v816_v8, %v816_v8  ;;  %v817_v17 = vmax.f32 %v765_v11, 0.0 }
 0x134   :  { %v1007_v18 = vpack.c.bf16 %v824_v14, %v824_v14  ;;  %v825_v19 = vmax.f32 %v797_v15, 0.0 }
 0x135   :  { %887 = vst.msk [vmem:[%s1636_s3] sm:$0xf] %vm886_vm2, %v999_v9  ;;  %v1000_v23 = vpack.c.bf16 %v817_v17, %v817_v17 }
 0x136   :  { %895 = vst.msk [vmem:[%s1636_s3 + $0x20] sm:$0xf] %vm886_vm2, %v1007_v18  ;;  %v1008_v25 = vpack.c.bf16 %v825_v19, %v825_v19  ;;  %v769_v20 = vpop.f32.mrb[32].mxu0 }
 0x137   :  { %888 = vst.msk [vmem:[%s1636_s3 + $0x4] sm:$0xf] %vm886_vm2, %v1000_v23  ;;  %v770_v21 = vadd.f32 %v769_v20, %v1548_v39  ;;  %v801_v22 = vpop.f32.mrb[32].mxu1  ;;  %v1154_v24 = vpop.f32.mrb[33].mxu0 }
 0x138   :  { %896 = vst.msk [vmem:[%s1636_s3 + $0x24] sm:$0xf] %vm886_vm2, %v1008_v25  ;;  %v802_v26 = vadd.f32 %v801_v22, %v713_v44  ;;  %v1170_v27 = vpop.f32.mrb[33].mxu1  ;;  %v772_v28 = vpop.f32.mrb[34].mxu0 }
 0x139   :  { %v818_v29 = vmax.f32 %v770_v21, 0.0  ;;  %v773_v30 = vadd.f32 %v772_v28, %v1550_v41  ;;  %v804_v31 = vpop.f32.mrb[34].mxu1  ;;  %v1155_v32 = vpop.f32.mrb[35].mxu0 }
 0x13a   :  { %v826_v33 = vmax.f32 %v802_v26, 0.0  ;;  %v805_v34 = vadd.f32 %v804_v31, %v716_v46  ;;  %v1171_v35 = vpop.f32.mrb[35].mxu1 }
 0x13b   :  { %v1001_v36 = vpack.c.bf16 %v818_v29, %v818_v29  ;;  %v819_v39 = vmax.f32 %v773_v30, 0.0 }
 0x13c   :  { %v1009_v37 = vpack.c.bf16 %v826_v33, %v826_v33  ;;  %v827_v38 = vmax.f32 %v805_v34, 0.0 }
 0x13d   :  { %889 = vst.msk [vmem:[%s1636_s3 + $0x8] sm:$0xf] %vm886_vm2, %v1001_v36  ;;  %v1002_v40 = vpack.c.bf16 %v819_v39, %v819_v39 }
 0x13e   :  { %897 = vst.msk [vmem:[%s1636_s3 + $0x28] sm:$0xf] %vm886_vm2, %v1009_v37  ;;  %v1010_v41 = vpack.c.bf16 %v827_v38, %v827_v38  ;;  %v777_v42 = vpop.f32.mrb[36].mxu0 }
 0x13f   :  { %890 = vst.msk [vmem:[%s1636_s3 + $0xc] sm:$0xf] %vm886_vm2, %v1002_v40  ;;  %v778_v43 = vadd.f32 %v777_v42, %v1554_v55  ;;  %v809_v44 = vpop.f32.mrb[36].mxu1  ;;  %v1158_v45 = vpop.f32.mrb[37].mxu0 }
 0x140   :  { %898 = vst.msk [vmem:[%s1636_s3 + $0x2c] sm:$0xf] %vm886_vm2, %v1010_v41  ;;  %v810_v46 = vadd.f32 %v809_v44, %v721_v62  ;;  %v1174_v47 = vpop.f32.mrb[37].mxu1  ;;  %v780_v48 = vpop.f32.mrb[38].mxu0 }
 0x141   :  { %v820_v49 = vmax.f32 %v778_v43, 0.0  ;;  %v781_v50 = vadd.f32 %v780_v48, %v1556_v57  ;;  %v812_v51 = vpop.f32.mrb[38].mxu1  ;;  %v1159_v52 = vpop.f32.mrb[39].mxu0 }
 0x142   :  { %v828_v53 = vmax.f32 %v810_v46, 0.0  ;;  %v813_v54 = vadd.f32 %v812_v51, %v724_v0  ;;  %v1175_v56 = vpop.f32.mrb[39].mxu1 }
 0x143   :  { %v1003_v58 = vpack.c.bf16 %v820_v49, %v820_v49  ;;  %v821_v55 = vmax.f32 %v781_v50, 0.0 }
 0x144   :  { %v1011_v59 = vpack.c.bf16 %v828_v53, %v828_v53  ;;  %v829_v60 = vmax.f32 %v813_v54, 0.0 }
 0x145   :  { %891 = vst.msk [vmem:[%s1636_s3 + $0x10] sm:$0xf] %vm886_vm2, %v1003_v58  ;;  %v1004_v61 = vpack.c.bf16 %v821_v55, %v821_v55 }
 0x146   :  { %899 = vst.msk [vmem:[%s1636_s3 + $0x30] sm:$0xf] %vm886_vm2, %v1011_v59  ;;  %v1012_v57 = vpack.c.bf16 %v829_v60, %v829_v60  ;;  %v785_v62 = vpop.f32.mrb[40].mxu0 }
 0x147   :  { %892 = vst.msk [vmem:[%s1636_s3 + $0x14] sm:$0xf] %vm886_vm2, %v1004_v61  ;;  %v786_v63 = vadd.f32 %v785_v62, %v1560_v7  ;;  %v1162_v0 = vpop.f32.mrb[41].mxu0 }
 0x148   :  { %901 = vst.msk [vmem:[%s1636_s3 + $0x34] sm:$0x7] %vm900_vm3, %v1012_v57  ;;  %v788_v1 = vpop.f32.mrb[42].mxu0 }
 0x149   :  { %v822_v2 = vmax.f32 %v786_v63, 0.0  ;;  %v789_v3 = vadd.f32 %v788_v1, %v1562_v10  ;;  %v1163_v4 = vpop.f32.mrb[43].mxu0 }
 0x14b   :  { %v1005_v5 = vpack.c.bf16 %v822_v2, %v822_v2  ;;  %v823_v6 = vmax.f32 %v789_v3, 0.0 }
 0x14d   :  { %893 = vst.msk [vmem:[%s1636_s3 + $0x18] sm:$0xf] %vm886_vm2, %v1005_v5  ;;  %v1006_v8 = vpack.c.bf16 %v823_v6, %v823_v6 }
 0x14f   :  { %894 = vst.msk [vmem:[%s1636_s3 + $0x1c] sm:$0xf] %vm886_vm2, %v1006_v8 }

// kernel: actor_forward.7
= control target key start
LH: loop header
LB: loop body
LE: loop exit
PB: predicated region body
PF: predicated region fallthrough
CT: control target
= control target key end

     0   :  { %17 = vsyncpa [#allocation4], 0  ;;  %s5690_s0 = inlined_call_operand.vmem [shape: bf16[1,7040], index: 0, kind: input, shape index: {}]   ;;  %s5691_s1 = inlined_call_operand.vmem [shape: bf16[7040,512], index: 1, kind: input, shape index: {}]   ;;  %s5692_s2 = inlined_call_operand.vmem [shape: f32[1,512], index: 2, kind: input, shape index: {}]   ;;  %s5693_s3 = inlined_call_operand.vmem [shape: bf16[512,128], index: 3, kind: input, shape index: {}]   ;;  %s5694_s4 = inlined_call_operand.vmem [shape: f32[1,128], index: 4, kind: input, shape index: {}]   ;;  %s5695_s5 = inlined_call_operand.vmem [shape: bf16[128,32], index: 5, kind: input, shape index: {}]   ;;  %s5696_s6 = inlined_call_operand.vmem [shape: f32[1,32], index: 6, kind: input, shape index: {}]   ;;  %s5697_s7 = inlined_call_operand.vmem [shape: bf16[32,4], index: 7, kind: input, shape index: {}]   ;;  %s5698_s8 = inlined_call_operand.vmem [shape: f32[1,4], index: 8, kind: input, shape index: {}]   ;;  %s5699_s9 = inlined_call_operand.hbm [shape: f32[1,4], index: 9, kind: output, shape index: {0}]   ;;  %s5700_s10 = inlined_call_operand.vmem [shape: f32[1,4], index: 10, kind: output, shape index: {1}]   ;;  %s5701_s11 = inlined_call_operand.hbm [shape: f32[1,1], index: 11, kind: output, shape index: {2}]  }
   0x1   :  { %18 = vsyncpa [#allocation6], 0  ;;  %s5056_s17 = smov 0  }
   0x2 LB: > { %s5062_s18 = sadd.s32 4294967295, %s4987_s17   ;;  %p3783_p0 = scmp.ge.s32.totalorder %s4987_s17, 1  ;;  %s4987_s17 = sphi %s5056_s17, %s24_s17  }
   0x3   : > { %p341_p1 = scmp.lt.s32.totalorder %s4987_s17, 6 }
   0x5   : > { %p342_p2 = pnand %p3783_p0, %p341_p1 }
   0x6   : > { %s381_s19 = smul.u32 (!%p342_p2), 11, %s5062_s18  ;;  %p3786_p5 = scmp.ne.s32.totalorder (!%p342_p2), %s5062_s18, 0 }
   0x7   : > { %345 = sbr.rel (%p342_p2) target bundleno = 1959 (0x7a7), region = 56 }
   0x8   : > { %s386_s20 = smul.u32 (!%p342_p2), 176, %s5062_s18  ;;  %p382_p3 = scmp.lt.s32.totalorder (!%p342_p2), %s381_s19, 54 }
   0xa   : > { %p387_p4 = scmp.lt.s32.totalorder (!%p342_p2), %s386_s20, 879 }
   0xe   : > { %s5703_s19 = smov (!%p382_p3, %s381_s19), 54  ;;  %s5705_s20 = smov (!%p387_p4, %s386_s20), 879 }
   0xf   : > { %s5071_s23 = scalar_lea.vmem %s5690_s0, %s5703_s19  ;;  %s4190_s24 = sshll.u32 %s5705_s20, 4  ;;  %v398_v0 = vlaneseq (!%p3786_p5)  ;;  %v4989_v1 = vmov (!%p3786_p5), 0.0  }
  0x10   : > { %s5076_s27 = scalar_lea.vmem %s5691_s1, %s4190_s24  ;;  %397 = sbr.rel (%p3786_p5) target bundleno = 23 (0x17), region = 60 }
  0x11   : > { %vm400_vm0 = vcmp.lt.s32.totalorder (!%p3786_p5), %v398_v0, 512 }
  0x12   : > { %402 = vst.msk [vmem:[#allocation2] sm:$0xf] (!%p3786_p5), %vm400_vm0, %v4989_v1 }
  0x17 PF: > { %v4342_v2 = vld [vmem:[%s5076_s27 + $0x4] ss:$16 sps:$4 sm:$0xff]   ;;  %v4344_v3 = vld [vmem:[%s5076_s27 + $0xc] ss:$16 sps:$4 sm:$0xff]   ;;  %v4346_v4 = vld [vmem:[%s5076_s27] ss:$16 sps:$4 sm:$0xff]   ;;  %v764_v40 = vlaneseq }
  0x18   : > { %2603 = vmatprep.subr.bf16.mxu0 %v4342_v2  ;;  %v4347_v5 = vld [vmem:[%s5076_s27 + $0x8] ss:$16 sps:$4 sm:$0xff]   ;;  %2849 = vmatprep.subr.bf16.mxu1 %v4344_v3  ;;  %v4348_v6 = vld [vmem:[%s5076_s27 + $0x24] ss:$16 sps:$4 sm:$0xff]   ;;  %v4350_v7 = vld [vmem:[%s5076_s27 + $0x2c] ss:$16 sps:$4 sm:$0xff]  }
  0x19   : > { %2604 = vmatpush1.bf16.msra.mxu0 %v4346_v4  ;;  %2850 = vmatpush1.bf16.msra.mxu1 %v4347_v5  ;;  %v4352_v8 = vld [vmem:[%s5076_s27 + $0x20] ss:$16 sps:$4 sm:$0xff]   ;;  %v4353_v9 = vld [vmem:[%s5076_s27 + $0x28] ss:$16 sps:$4 sm:$0xff]   ;;  %v4354_v10 = vld [vmem:[%s5076_s27 + $0x44] ss:$16 sps:$4 sm:$0xff]  }
  0x1a   : > { %2605 = vmatprep.subr.bf16.mxu0 %v4348_v6  ;;  %2851 = vmatprep.subr.bf16.mxu1 %v4350_v7  ;;  %v4356_v11 = vld [vmem:[%s5076_s27 + $0x4c] ss:$16 sps:$4 sm:$0xff]   ;;  %v4358_v12 = vld [vmem:[%s5076_s27 + $0x40] ss:$16 sps:$4 sm:$0xff]   ;;  %v4359_v13 = vld [vmem:[%s5076_s27 + $0x48] ss:$16 sps:$4 sm:$0xff]  }
  0x1b   : > { %v4360_v14 = vld [vmem:[%s5076_s27 + $0x64] ss:$16 sps:$4 sm:$0xff]   ;;  %v4362_v15 = vld [vmem:[%s5076_s27 + $0x6c] ss:$16 sps:$4 sm:$0xff]   ;;  %v4364_v16 = vld [vmem:[%s5076_s27 + $0x60] ss:$16 sps:$4 sm:$0xff]  }
  0x1c   : > { %v4365_v17 = vld [vmem:[%s5076_s27 + $0x68] ss:$16 sps:$4 sm:$0xff]   ;;  %v4366_v18 = vld [vmem:[%s5076_s27 + $0x84] ss:$16 sps:$4 sm:$0xff]   ;;  %v4368_v19 = vld [vmem:[%s5076_s27 + $0x8c] ss:$16 sps:$4 sm:$0xff]  }
  0x1d   : > { %2606 = vmatpush1.bf16.msra.mxu0 %v4352_v8  ;;  %2852 = vmatpush1.bf16.msra.mxu1 %v4353_v9  ;;  %v4370_v20 = vld [vmem:[%s5076_s27 + $0x80] ss:$16 sps:$4 sm:$0xff]   ;;  %v4371_v21 = vld [vmem:[%s5076_s27 + $0x88] ss:$16 sps:$4 sm:$0xff]   ;;  %v4372_v22 = vld [vmem:[%s5076_s27 + $0xa4] ss:$16 sps:$4 sm:$0xff]  }
  0x1e   : > { %2607 = vmatprep.subr.bf16.mxu0 %v4354_v10  ;;  %2853 = vmatprep.subr.bf16.mxu1 %v4356_v11  ;;  %v4374_v23 = vld [vmem:[%s5076_s27 + $0xac] ss:$16 sps:$4 sm:$0xff]   ;;  %v4376_v24 = vld [vmem:[%s5076_s27 + $0xa0] ss:$16 sps:$4 sm:$0xff]   ;;  %v4377_v25 = vld [vmem:[%s5076_s27 + $0xa8] ss:$16 sps:$4 sm:$0xff]  }
  0x1f   : > { %v4378_v26 = vld [vmem:[%s5076_s27 + $0xc4] ss:$16 sps:$4 sm:$0xff]   ;;  %v4380_v27 = vld [vmem:[%s5076_s27 + $0xcc] ss:$16 sps:$4 sm:$0xff]   ;;  %v4382_v28 = vld [vmem:[%s5076_s27 + $0xc0] ss:$16 sps:$4 sm:$0xff]  }
  0x20   : > { %v4383_v29 = vld [vmem:[%s5076_s27 + $0xc8] ss:$16 sps:$4 sm:$0xff]   ;;  %v4384_v30 = vld [vmem:[%s5076_s27 + $0xe4] ss:$16 sps:$4 sm:$0xff]   ;;  %v4386_v31 = vld [vmem:[%s5076_s27 + $0xec] ss:$16 sps:$4 sm:$0xff]  }
  0x21   : > { %2608 = vmatpush1.bf16.msra.mxu0 %v4358_v12  ;;  %2854 = vmatpush1.bf16.msra.mxu1 %v4359_v13  ;;  %v4388_v32 = vld [vmem:[%s5076_s27 + $0xe0] ss:$16 sps:$4 sm:$0xff]   ;;  %v4389_v33 = vld [vmem:[%s5076_s27 + $0xe8] ss:$16 sps:$4 sm:$0xff]   ;;  %v4390_v34 = vld [vmem:[%s5076_s27 + $0x104] ss:$16 sps:$4 sm:$0xff]  }
  0x22   : > { %2609 = vmatprep.subr.bf16.mxu0 %v4360_v14  ;;  %2855 = vmatprep.subr.bf16.mxu1 %v4362_v15  ;;  %v4392_v35 = vld [vmem:[%s5076_s27 + $0x10c] ss:$16 sps:$4 sm:$0xff]   ;;  %v4394_v36 = vld [vmem:[%s5076_s27 + $0x100] ss:$16 sps:$4 sm:$0xff]   ;;  %v4395_v37 = vld [vmem:[%s5076_s27 + $0x108] ss:$16 sps:$4 sm:$0xff]  }
  0x23   : > { %v4990_v38 = vmov 1966171168   ;;  %v4396_v41 = vld [vmem:[%s5076_s27 + $0x124] ss:$16 sps:$4 sm:$0xff]   ;;  %v4398_v42 = vld [vmem:[%s5076_s27 + $0x12c] ss:$16 sps:$4 sm:$0xff]  }
  0x24   : > { %v762_v39 = vunpack.c.l.s4 %v4990_v38  ;;  %v4400_v43 = vld [vmem:[%s5076_s27 + $0x120] ss:$16 sps:$4 sm:$0xff]   ;;  %v5119_v45 = vshrl.u32 %v764_v40, 7  ;;  %v4401_v46 = vld [vmem:[%s5076_s27 + $0x128] ss:$16 sps:$4 sm:$0xff]   ;;  %vm3127_vm1 = vcmp.lt.s32.totalorder %v764_v40, 512 }
  0x25   : > { %2610 = vmatpush1.bf16.msra.mxu0 %v4364_v16  ;;  %2856 = vmatpush1.bf16.msra.mxu1 %v4365_v17  ;;  %v4402_v47 = vld [vmem:[%s5076_s27 + $0x144] ss:$16 sps:$4 sm:$0xff]   ;;  %v4404_v48 = vld [vmem:[%s5076_s27 + $0x14c] ss:$16 sps:$4 sm:$0xff]   ;;  %v4406_v49 = vld [vmem:[%s5076_s27 + $0x140] ss:$16 sps:$4 sm:$0xff]  }
  0x26   : > { %2611 = vmatprep.subr.bf16.mxu0 %v4366_v18  ;;  %2857 = vmatprep.subr.bf16.mxu1 %v4368_v19  ;;  %v763_v44 = vunpack.c.0.s8 %v762_v39  ;;  %v4407_v50 = vld [vmem:[%s5076_s27 + $0x148] ss:$16 sps:$4 sm:$0xff]   ;;  %v4408_v52 = vld [vmem:[%s5076_s27 + $0x164] ss:$16 sps:$4 sm:$0xff]   ;;  %v4410_v53 = vld [vmem:[%s5076_s27 + $0x16c] ss:$16 sps:$4 sm:$0xff]  }
  0x27   : > { %v5132_v54 = vld [vmem:[%s5071_s23] sm:$0xff]  ;;  %v4413_v57 = vld [vmem:[%s5076_s27 + $0x168] ss:$16 sps:$4 sm:$0xff]   ;;  %v4416_v59 = vld [vmem:[%s5076_s27 + $0x18c] ss:$16 sps:$4 sm:$0xff]   ;;  %p4140_p6 = scmp.ne.s32.totalorder %s5062_s18, 4 }
  0x28   : > { %v5127_v51 = vsub.s32 %v763_v44, %v5119_v45  ;;  %v4412_v55 = vld [vmem:[%s5076_s27 + $0x160] ss:$16 sps:$4 sm:$0xff]   ;;  %v4414_v58 = vld [vmem:[%s5076_s27 + $0x184] ss:$16 sps:$4 sm:$0xff]   ;;  %v4419_v63 = vld [vmem:[%s5076_s27 + $0x188] ss:$16 sps:$4 sm:$0xff]  }
  0x29   : > { %2612 = vmatpush1.bf16.msra.mxu0 %v4370_v20  ;;  %2858 = vmatpush1.bf16.msra.mxu1 %v4371_v21  ;;  %v4418_v61 = vld [vmem:[%s5076_s27 + $0x180] ss:$16 sps:$4 sm:$0xff]   ;;  %v4420_v0 = vld [vmem:[%s5076_s27 + $0x1a4] ss:$16 sps:$4 sm:$0xff]   ;;  %v4422_v1 = vld [vmem:[%s5076_s27 + $0x1ac] ss:$16 sps:$4 sm:$0xff]  }
  0x2a   : > { %2613 = vmatprep.subr.bf16.mxu0 %v4372_v22  ;;  %2859 = vmatprep.subr.bf16.mxu1 %v4374_v23  ;;  %v767_v56 = vrot.slane %v5132_v54, %v5127_v51  ;;  %v4424_v2 = vld [vmem:[%s5076_s27 + $0x1a0] ss:$16 sps:$4 sm:$0xff]   ;;  %v4425_v3 = vld [vmem:[%s5076_s27 + $0x1a8] ss:$16 sps:$4 sm:$0xff]   ;;  %v4426_v4 = vld [vmem:[%s5076_s27 + $0x1c4] ss:$16 sps:$4 sm:$0xff]  }
  0x2b   : > { %v4428_v5 = vld [vmem:[%s5076_s27 + $0x1cc] ss:$16 sps:$4 sm:$0xff]   ;;  %v4430_v6 = vld [vmem:[%s5076_s27 + $0x1c0] ss:$16 sps:$4 sm:$0xff]   ;;  %v4431_v7 = vld [vmem:[%s5076_s27 + $0x1c8] ss:$16 sps:$4 sm:$0xff]  }
  0x2c   : > { %v775_v60 = vcombine.high %v767_v56, %v767_v56  ;;  %v4432_v8 = vld [vmem:[%s5076_s27 + $0x1e4] ss:$16 sps:$4 sm:$0xff]   ;;  %v4434_v9 = vld [vmem:[%s5076_s27 + $0x1ec] ss:$16 sps:$4 sm:$0xff]   ;;  %v4436_v10 = vld [vmem:[%s5076_s27 + $0x1e0] ss:$16 sps:$4 sm:$0xff]   ;;  %v5159_v15 = vrot.slane %v767_v56, %v5127_v51 }
  0x2d   : > { %2614 = vmatpush1.bf16.msra.mxu0 %v4376_v24  ;;  %2860 = vmatpush1.bf16.msra.mxu1 %v4377_v25  ;;  %v4437_v11 = vld [vmem:[%s5076_s27 + $0x1e8] ss:$16 sps:$4 sm:$0xff]   ;;  %v4440_v12 = vld [vmem:[%s5076_s27 + $0x204] ss:$16 sps:$4 sm:$0xff]   ;;  %v4443_v13 = vld [vmem:[%s5076_s27 + $0x20c] ss:$16 sps:$4 sm:$0xff]  }
  0x2e   : > { %2615 = vmatprep.subr.bf16.mxu0 %v4378_v26  ;;  %2861 = vmatprep.subr.bf16.mxu1 %v4380_v27  ;;  %v797_v62 = vrot.slane %v775_v60, %v5127_v51  ;;  %v4438_v14 = vld [vmem:[%s5076_s27 + $0x200] ss:$16 sps:$4 sm:$0xff]   ;;  %v4441_v16 = vld [vmem:[%s5076_s27 + $0x208] ss:$16 sps:$4 sm:$0xff]   ;;  %v4446_v17 = vld [vmem:[%s5076_s27 + $0x224] ss:$16 sps:$4 sm:$0xff]  }
  0x2f   : > { %v4449_v18 = vld [vmem:[%s5076_s27 + $0x22c] ss:$16 sps:$4 sm:$0xff]   ;;  %v4444_v20 = vld [vmem:[%s5076_s27 + $0x220] ss:$16 sps:$4 sm:$0xff]   ;;  %v4447_v21 = vld [vmem:[%s5076_s27 + $0x228] ss:$16 sps:$4 sm:$0xff]  }
  0x30   : > { %2635 = vmatprep.mubr.bf16.mxu0 %v797_v62  ;;  %2881 = vmatprep.mubr.bf16.mxu1 %v797_v62  ;;  %v807_v19 = vcombine.high %v797_v62, %v797_v62  ;;  %v4452_v22 = vld [vmem:[%s5076_s27 + $0x244] ss:$16 sps:$4 sm:$0xff]   ;;  %v4455_v23 = vld [vmem:[%s5076_s27 + $0x24c] ss:$16 sps:$4 sm:$0xff]   ;;  %v4450_v24 = vld [vmem:[%s5076_s27 + $0x240] ss:$16 sps:$4 sm:$0xff]  }
  0x31   : > { %2616 = vmatpush1.bf16.msra.mxu0 %v4382_v28  ;;  %2862 = vmatpush1.bf16.msra.mxu1 %v4383_v29  ;;  %v4453_v25 = vld [vmem:[%s5076_s27 + $0x248] ss:$16 sps:$4 sm:$0xff]   ;;  %v4458_v26 = vld [vmem:[%s5076_s27 + $0x264] ss:$16 sps:$4 sm:$0xff]   ;;  %v4461_v27 = vld [vmem:[%s5076_s27 + $0x26c] ss:$16 sps:$4 sm:$0xff]  }
  0x32   : > { %2617 = vmatprep.subr.bf16.mxu0 %v4384_v30  ;;  %2863 = vmatprep.subr.bf16.mxu1 %v4386_v31  ;;  %v4456_v28 = vld [vmem:[%s5076_s27 + $0x260] ss:$16 sps:$4 sm:$0xff]   ;;  %v4459_v29 = vld [vmem:[%s5076_s27 + $0x268] ss:$16 sps:$4 sm:$0xff]   ;;  %v4464_v30 = vld [vmem:[%s5076_s27 + $0x284] ss:$16 sps:$4 sm:$0xff]  }
  0x33   : > { %v4467_v31 = vld [vmem:[%s5076_s27 + $0x28c] ss:$16 sps:$4 sm:$0xff]   ;;  %v4476_v38 = vld [vmem:[%s5076_s27 + $0x2c4] ss:$16 sps:$4 sm:$0xff]   ;;  %v4492_v56 = vld [vmem:[%s5076_s27 + $0x320] ss:$16 sps:$4 sm:$0xff]  }
  0x34   : > { %v4479_v39 = vld [vmem:[%s5076_s27 + $0x2cc] ss:$16 sps:$4 sm:$0xff]   ;;  %v4498_v60 = vld [vmem:[%s5076_s27 + $0x340] ss:$16 sps:$4 sm:$0xff]   ;;  %v4506_v62 = vld [vmem:[%s5076_s27 + $0x364] ss:$16 sps:$4 sm:$0xff]  }
  0x35   : > { %2618 = vmatpush1.bf16.msra.mxu0 %v4388_v32  ;;  %2864 = vmatpush1.bf16.msra.mxu1 %v4389_v33  ;;  %v4462_v32 = vld [vmem:[%s5076_s27 + $0x280] ss:$16 sps:$4 sm:$0xff]   ;;  %v4465_v33 = vld [vmem:[%s5076_s27 + $0x288] ss:$16 sps:$4 sm:$0xff]   ;;  %v4485_v44 = vld [vmem:[%s5076_s27 + $0x2ec] ss:$16 sps:$4 sm:$0xff]  }
  0x36   : > { %2619 = vmatprep.subr.bf16.mxu0 %v4390_v34  ;;  %2865 = vmatprep.subr.bf16.mxu1 %v4392_v35  ;;  %v4470_v34 = vld [vmem:[%s5076_s27 + $0x2a4] ss:$16 sps:$4 sm:$0xff]   ;;  %v4473_v35 = vld [vmem:[%s5076_s27 + $0x2ac] ss:$16 sps:$4 sm:$0xff]   ;;  %vm4993_vm2 = vmmov (!%p4140_p6), 0   ;;  %vm3626_vm3 = vcmask (!%p4140_p6), 261120  }
  0x37   : > { %v4874_v40 = vld [vmem:[%s5693_s3 + $0x80] sm:$0xff] (!%p4140_p6)   ;;  %vm3670_vm4 = vcmask (!%p4140_p6), 24576   ;;  %vm3695_vm5 = vcmask (!%p4140_p6), 0  }
  0x39   : > { %2620 = vmatpush1.bf16.msra.mxu0 %v4394_v36  ;;  %2866 = vmatpush1.bf16.msra.mxu1 %v4395_v37  ;;  %v4468_v36 = vld [vmem:[%s5076_s27 + $0x2a0] ss:$16 sps:$4 sm:$0xff]   ;;  %v4471_v37 = vld [vmem:[%s5076_s27 + $0x2a8] ss:$16 sps:$4 sm:$0xff]  }
  0x3a   : > { %2621 = vmatprep.subr.bf16.mxu0 %v4396_v41  ;;  %2867 = vmatprep.subr.bf16.mxu1 %v4398_v42  ;;  %v4474_v41 = vld [vmem:[%s5076_s27 + $0x2c0] ss:$16 sps:$4 sm:$0xff]   ;;  %v4477_v42 = vld [vmem:[%s5076_s27 + $0x2c8] ss:$16 sps:$4 sm:$0xff]  }
  0x3d   : > { %2622 = vmatpush1.bf16.msra.mxu0 %v4400_v43  ;;  %2868 = vmatpush1.bf16.msra.mxu1 %v4401_v46  ;;  %v4482_v43 = vld [vmem:[%s5076_s27 + $0x2e4] ss:$16 sps:$4 sm:$0xff]   ;;  %v4480_v46 = vld [vmem:[%s5076_s27 + $0x2e0] ss:$16 sps:$4 sm:$0xff]  }
  0x3e   : > { %2623 = vmatprep.subr.bf16.mxu0 %v4402_v47  ;;  %2869 = vmatprep.subr.bf16.mxu1 %v4404_v48  ;;  %v4483_v47 = vld [vmem:[%s5076_s27 + $0x2e8] ss:$16 sps:$4 sm:$0xff]   ;;  %v4488_v48 = vld [vmem:[%s5076_s27 + $0x304] ss:$16 sps:$4 sm:$0xff]  }
  0x41   : > { %2624 = vmatpush1.bf16.msra.mxu0 %v4406_v49  ;;  %2870 = vmatpush1.bf16.msra.mxu1 %v4407_v50  ;;  %v4491_v49 = vld [vmem:[%s5076_s27 + $0x30c] ss:$16 sps:$4 sm:$0xff]   ;;  %v4486_v50 = vld [vmem:[%s5076_s27 + $0x300] ss:$16 sps:$4 sm:$0xff]  }
  0x42   : > { %2625 = vmatprep.subr.bf16.mxu0 %v4408_v52  ;;  %2871 = vmatprep.subr.bf16.mxu1 %v4410_v53  ;;  %v4489_v52 = vld [vmem:[%s5076_s27 + $0x308] ss:$16 sps:$4 sm:$0xff]   ;;  %v4494_v53 = vld [vmem:[%s5076_s27 + $0x324] ss:$16 sps:$4 sm:$0xff]  }
  0x45   : > { %2626 = vmatpush1.bf16.msra.mxu0 %v4412_v55  ;;  %2872 = vmatpush1.bf16.msra.mxu1 %v4413_v57  ;;  %v4497_v55 = vld [vmem:[%s5076_s27 + $0x32c] ss:$16 sps:$4 sm:$0xff]   ;;  %v4495_v57 = vld [vmem:[%s5076_s27 + $0x328] ss:$16 sps:$4 sm:$0xff]  }
  0x46   : > { %2627 = vmatprep.subr.bf16.mxu0 %v4414_v58  ;;  %2873 = vmatprep.subr.bf16.mxu1 %v4416_v59  ;;  %v4500_v58 = vld [vmem:[%s5076_s27 + $0x344] ss:$16 sps:$4 sm:$0xff]   ;;  %v4503_v59 = vld [vmem:[%s5076_s27 + $0x34c] ss:$16 sps:$4 sm:$0xff]  }
  0x49   : > { %2628 = vmatpush1.bf16.msra.mxu0 %v4418_v61  ;;  %2874 = vmatpush1.bf16.msra.mxu1 %v4419_v63  ;;  %v4501_v61 = vld [vmem:[%s5076_s27 + $0x348] ss:$16 sps:$4 sm:$0xff]   ;;  %v4509_v63 = vld [vmem:[%s5076_s27 + $0x36c] ss:$16 sps:$4 sm:$0xff]  }
  0x4a   : > { %2629 = vmatprep.subr.bf16.mxu0 %v4420_v0  ;;  %2875 = vmatprep.subr.bf16.mxu1 %v4422_v1  ;;  %v4504_v0 = vld [vmem:[%s5076_s27 + $0x360] ss:$16 sps:$4 sm:$0xff]   ;;  %v4507_v1 = vld [vmem:[%s5076_s27 + $0x368] ss:$16 sps:$4 sm:$0xff]  }
  0x4d   : > { %2630 = vmatpush1.bf16.msra.mxu0 %v4424_v2  ;;  %2876 = vmatpush1.bf16.msra.mxu1 %v4425_v3  ;;  %v4512_v2 = vld [vmem:[%s5076_s27 + $0x384] ss:$16 sps:$4 sm:$0xff]   ;;  %v4515_v3 = vld [vmem:[%s5076_s27 + $0x38c] ss:$16 sps:$4 sm:$0xff]  }
  0x4e   : > { %2631 = vmatprep.subr.bf16.mxu0 %v4426_v4  ;;  %2877 = vmatprep.subr.bf16.mxu1 %v4428_v5  ;;  %v4510_v4 = vld [vmem:[%s5076_s27 + $0x380] ss:$16 sps:$4 sm:$0xff]   ;;  %v4513_v5 = vld [vmem:[%s5076_s27 + $0x388] ss:$16 sps:$4 sm:$0xff]  }
  0x51   : > { %2632 = vmatpush1.bf16.msra.mxu0 %v4430_v6  ;;  %2878 = vmatpush1.bf16.msra.mxu1 %v4431_v7  ;;  %v4518_v6 = vld [vmem:[%s5076_s27 + $0x3a4] ss:$16 sps:$4 sm:$0xff]   ;;  %v4521_v7 = vld [vmem:[%s5076_s27 + $0x3ac] ss:$16 sps:$4 sm:$0xff]  }
  0x52   : > { %2633 = vmatprep.subr.bf16.mxu0 %v4432_v8  ;;  %2879 = vmatprep.subr.bf16.mxu1 %v4434_v9  ;;  %v4516_v8 = vld [vmem:[%s5076_s27 + $0x3a0] ss:$16 sps:$4 sm:$0xff]   ;;  %v4519_v9 = vld [vmem:[%s5076_s27 + $0x3a8] ss:$16 sps:$4 sm:$0xff]  }
  0x55   : > { %2634 = vmatpush1.bf16.msra.mxu0 %v4436_v10  ;;  %2880 = vmatpush1.bf16.msra.mxu1 %v4437_v11  ;;  %v4524_v10 = vld [vmem:[%s5076_s27 + $0x3c4] ss:$16 sps:$4 sm:$0xff]   ;;  %v4527_v11 = vld [vmem:[%s5076_s27 + $0x3cc] ss:$16 sps:$4 sm:$0xff]  }
  0x56   : > { %2644 = vmatprep.subr.bf16.mxu0 %v4440_v12  ;;  %2890 = vmatprep.subr.bf16.mxu1 %v4443_v13  ;;  %v760_v12 = vcombine.high %v5132_v54, %v5132_v54  ;;  %v4522_v13 = vld [vmem:[%s5076_s27 + $0x3c0] ss:$16 sps:$4 sm:$0xff]   ;;  %v4531_v54 = vld [vmem:[%s5076_s27 + $0x3e8] ss:$16 sps:$4 sm:$0xff]  }
  0x58   : > { %2636 = vmatmul.mubr.bf16.vlgmr.msra.gmra.mrb[0].mxu0 %v5159_v15  ;;  %2882 = vmatmul.mubr.bf16.vlgmr.msra.gmra.mrb[0].mxu1 %v5159_v15 }
  0x59   : > { %2645 = vmatpush1.bf16.msra.mxu0 %v4438_v14  ;;  %2891 = vmatpush1.bf16.msra.mxu1 %v4441_v16  ;;  %v4525_v14 = vld [vmem:[%s5076_s27 + $0x3c8] ss:$16 sps:$4 sm:$0xff]   ;;  %v4530_v16 = vld [vmem:[%s5076_s27 + $0x3e4] ss:$16 sps:$4 sm:$0xff]  }
  0x5a   : > { %2646 = vmatprep.subr.bf16.mxu0 %v4446_v17  ;;  %2892 = vmatprep.subr.bf16.mxu1 %v4449_v18  ;;  %v4533_v17 = vld [vmem:[%s5076_s27 + $0x3ec] ss:$16 sps:$4 sm:$0xff]   ;;  %v5225_v18 = vrot.slane %v760_v12, %v5127_v51  ;;  %v4606_v12 = vld [vmem:[%s5076_s27 + $0x580] ss:$16 sps:$4 sm:$0xff]  }
  0x5b   : > { %2676 = vmatprep.mubr.bf16.mxu0 %v807_v19  ;;  %2922 = vmatprep.mubr.bf16.mxu1 %v807_v19  ;;  %v4528_v19 = vld [vmem:[%s5076_s27 + $0x3e0] ss:$16 sps:$4 sm:$0xff]  }
  0x5d   : > { %2647 = vmatpush1.bf16.msra.mxu0 %v4444_v20  ;;  %2893 = vmatpush1.bf16.msra.mxu1 %v4447_v21  ;;  %v4536_v20 = vld [vmem:[%s5076_s27 + $0x404] ss:$16 sps:$4 sm:$0xff]   ;;  %v4539_v21 = vld [vmem:[%s5076_s27 + $0x40c] ss:$16 sps:$4 sm:$0xff]  }
  0x5e   : > { %2648 = vmatprep.subr.bf16.mxu0 %v4452_v22  ;;  %2894 = vmatprep.subr.bf16.mxu1 %v4455_v23  ;;  %v776_v22 = vcombine.high %v5225_v18, %v5225_v18  ;;  %v4534_v23 = vld [vmem:[%s5076_s27 + $0x400] ss:$16 sps:$4 sm:$0xff]  }
  0x61   : > { %2649 = vmatpush1.bf16.msra.mxu0 %v4450_v24  ;;  %2895 = vmatpush1.bf16.msra.mxu1 %v4453_v25  ;;  %v805_v24 = vcombine.high %v5159_v15, %v5159_v15  ;;  %v4537_v25 = vld [vmem:[%s5076_s27 + $0x408] ss:$16 sps:$4 sm:$0xff]  }
  0x62   : > { %2650 = vmatprep.subr.bf16.mxu0 %v4458_v26  ;;  %2896 = vmatprep.subr.bf16.mxu1 %v4461_v27  ;;  %v4542_v26 = vld [vmem:[%s5076_s27 + $0x424] ss:$16 sps:$4 sm:$0xff]   ;;  %v4545_v27 = vld [vmem:[%s5076_s27 + $0x42c] ss:$16 sps:$4 sm:$0xff]   ;;  %v4543_v15 = vld [vmem:[%s5076_s27 + $0x428] ss:$16 sps:$4 sm:$0xff]  }
  0x65   : > { %2651 = vmatpush1.bf16.msra.mxu0 %v4456_v28  ;;  %2897 = vmatpush1.bf16.msra.mxu1 %v4459_v29  ;;  %v5240_v28 = vrot.slane %v776_v22, %v5127_v51  ;;  %v4540_v29 = vld [vmem:[%s5076_s27 + $0x420] ss:$16 sps:$4 sm:$0xff]   ;;  %v4621_v22 = vld [vmem:[%s5076_s27 + $0x5c8] ss:$16 sps:$4 sm:$0xff]  }
  0x66   : > { %2652 = vmatprep.subr.bf16.mxu0 %v4464_v30  ;;  %2898 = vmatprep.subr.bf16.mxu1 %v4467_v31  ;;  %v4548_v30 = vld [vmem:[%s5076_s27 + $0x444] ss:$16 sps:$4 sm:$0xff]   ;;  %v4551_v31 = vld [vmem:[%s5076_s27 + $0x44c] ss:$16 sps:$4 sm:$0xff]  }
  0x69   : > { %2653 = vmatpush1.bf16.msra.mxu0 %v4462_v32  ;;  %2899 = vmatpush1.bf16.msra.mxu1 %v4465_v33  ;;  %v4546_v32 = vld [vmem:[%s5076_s27 + $0x440] ss:$16 sps:$4 sm:$0xff]   ;;  %v4549_v33 = vld [vmem:[%s5076_s27 + $0x448] ss:$16 sps:$4 sm:$0xff]  }
  0x6a   : > { %2654 = vmatprep.subr.bf16.mxu0 %v4470_v34  ;;  %2900 = vmatprep.subr.bf16.mxu1 %v4473_v35  ;;  %v4554_v34 = vld [vmem:[%s5076_s27 + $0x464] ss:$16 sps:$4 sm:$0xff]   ;;  %v4557_v35 = vld [vmem:[%s5076_s27 + $0x46c] ss:$16 sps:$4 sm:$0xff]  }
  0x6d   : > { %2655 = vmatpush1.bf16.msra.mxu0 %v4468_v36  ;;  %2901 = vmatpush1.bf16.msra.mxu1 %v4471_v37  ;;  %v4552_v36 = vld [vmem:[%s5076_s27 + $0x460] ss:$16 sps:$4 sm:$0xff]   ;;  %v4555_v37 = vld [vmem:[%s5076_s27 + $0x468] ss:$16 sps:$4 sm:$0xff]  }
  0x6e   : > { %2656 = vmatprep.subr.bf16.mxu0 %v4476_v38  ;;  %2902 = vmatprep.subr.bf16.mxu1 %v4479_v39  ;;  %v4560_v38 = vld [vmem:[%s5076_s27 + $0x484] ss:$16 sps:$4 sm:$0xff]   ;;  %v4563_v39 = vld [vmem:[%s5076_s27 + $0x48c] ss:$16 sps:$4 sm:$0xff]  }
  0x71   : > { %2657 = vmatpush1.bf16.msra.mxu0 %v4474_v41  ;;  %2903 = vmatpush1.bf16.msra.mxu1 %v4477_v42  ;;  %v4558_v41 = vld [vmem:[%s5076_s27 + $0x480] ss:$16 sps:$4 sm:$0xff]   ;;  %v4561_v42 = vld [vmem:[%s5076_s27 + $0x488] ss:$16 sps:$4 sm:$0xff]  }
  0x72   : > { %2658 = vmatprep.subr.bf16.mxu0 %v4482_v43  ;;  %2904 = vmatprep.subr.bf16.mxu1 %v4485_v44  ;;  %v4566_v43 = vld [vmem:[%s5076_s27 + $0x4a4] ss:$16 sps:$4 sm:$0xff]   ;;  %v4569_v44 = vld [vmem:[%s5076_s27 + $0x4ac] ss:$16 sps:$4 sm:$0xff]  }
  0x75   : > { %2659 = vmatpush1.bf16.msra.mxu0 %v4480_v46  ;;  %2905 = vmatpush1.bf16.msra.mxu1 %v4483_v47  ;;  %v4564_v46 = vld [vmem:[%s5076_s27 + $0x4a0] ss:$16 sps:$4 sm:$0xff]   ;;  %v4567_v47 = vld [vmem:[%s5076_s27 + $0x4a8] ss:$16 sps:$4 sm:$0xff]  }
  0x76   : > { %2660 = vmatprep.subr.bf16.mxu0 %v4488_v48  ;;  %2906 = vmatprep.subr.bf16.mxu1 %v4491_v49  ;;  %v4572_v48 = vld [vmem:[%s5076_s27 + $0x4c4] ss:$16 sps:$4 sm:$0xff]   ;;  %v4575_v49 = vld [vmem:[%s5076_s27 + $0x4cc] ss:$16 sps:$4 sm:$0xff]  }
  0x79   : > { %2661 = vmatpush1.bf16.msra.mxu0 %v4486_v50  ;;  %2907 = vmatpush1.bf16.msra.mxu1 %v4489_v52  ;;  %v4570_v50 = vld [vmem:[%s5076_s27 + $0x4c0] ss:$16 sps:$4 sm:$0xff]   ;;  %v4573_v52 = vld [vmem:[%s5076_s27 + $0x4c8] ss:$16 sps:$4 sm:$0xff]  }
  0x7a   : > { %2662 = vmatprep.subr.bf16.mxu0 %v4494_v53  ;;  %2908 = vmatprep.subr.bf16.mxu1 %v4497_v55  ;;  %v4578_v53 = vld [vmem:[%s5076_s27 + $0x4e4] ss:$16 sps:$4 sm:$0xff]   ;;  %v4581_v55 = vld [vmem:[%s5076_s27 + $0x4ec] ss:$16 sps:$4 sm:$0xff]  }
  0x7d   : > { %2663 = vmatpush1.bf16.msra.mxu0 %v4492_v56  ;;  %2909 = vmatpush1.bf16.msra.mxu1 %v4495_v57  ;;  %v4576_v56 = vld [vmem:[%s5076_s27 + $0x4e0] ss:$16 sps:$4 sm:$0xff]   ;;  %v4579_v57 = vld [vmem:[%s5076_s27 + $0x4e8] ss:$16 sps:$4 sm:$0xff]  }
  0x7e   : > { %2664 = vmatprep.subr.bf16.mxu0 %v4500_v58  ;;  %2910 = vmatprep.subr.bf16.mxu1 %v4503_v59  ;;  %v4584_v58 = vld [vmem:[%s5076_s27 + $0x504] ss:$16 sps:$4 sm:$0xff]   ;;  %v4587_v59 = vld [vmem:[%s5076_s27 + $0x50c] ss:$16 sps:$4 sm:$0xff]  }
  0x81   : > { %2665 = vmatpush1.bf16.msra.mxu0 %v4498_v60  ;;  %2911 = vmatpush1.bf16.msra.mxu1 %v4501_v61  ;;  %v4582_v60 = vld [vmem:[%s5076_s27 + $0x500] ss:$16 sps:$4 sm:$0xff]   ;;  %v4585_v61 = vld [vmem:[%s5076_s27 + $0x508] ss:$16 sps:$4 sm:$0xff]  }
  0x82   : > { %2666 = vmatprep.subr.bf16.mxu0 %v4506_v62  ;;  %2912 = vmatprep.subr.bf16.mxu1 %v4509_v63  ;;  %v4590_v62 = vld [vmem:[%s5076_s27 + $0x524] ss:$16 sps:$4 sm:$0xff]   ;;  %v4593_v63 = vld [vmem:[%s5076_s27 + $0x52c] ss:$16 sps:$4 sm:$0xff]  }
  0x85   : > { %2667 = vmatpush1.bf16.msra.mxu0 %v4504_v0  ;;  %2913 = vmatpush1.bf16.msra.mxu1 %v4507_v1  ;;  %v4588_v0 = vld [vmem:[%s5076_s27 + $0x520] ss:$16 sps:$4 sm:$0xff]   ;;  %v4591_v1 = vld [vmem:[%s5076_s27 + $0x528] ss:$16 sps:$4 sm:$0xff]  }
  0x86   : > { %2668 = vmatprep.subr.bf16.mxu0 %v4512_v2  ;;  %2914 = vmatprep.subr.bf16.mxu1 %v4515_v3  ;;  %v4596_v2 = vld [vmem:[%s5076_s27 + $0x544] ss:$16 sps:$4 sm:$0xff]   ;;  %v4599_v3 = vld [vmem:[%s5076_s27 + $0x54c] ss:$16 sps:$4 sm:$0xff]  }
  0x89   : > { %2669 = vmatpush1.bf16.msra.mxu0 %v4510_v4  ;;  %2915 = vmatpush1.bf16.msra.mxu1 %v4513_v5  ;;  %v4594_v4 = vld [vmem:[%s5076_s27 + $0x540] ss:$16 sps:$4 sm:$0xff]   ;;  %v4597_v5 = vld [vmem:[%s5076_s27 + $0x548] ss:$16 sps:$4 sm:$0xff]  }
  0x8a   : > { %2670 = vmatprep.subr.bf16.mxu0 %v4518_v6  ;;  %2916 = vmatprep.subr.bf16.mxu1 %v4521_v7  ;;  %v4602_v6 = vld [vmem:[%s5076_s27 + $0x564] ss:$16 sps:$4 sm:$0xff]   ;;  %v4605_v7 = vld [vmem:[%s5076_s27 + $0x56c] ss:$16 sps:$4 sm:$0xff]  }
  0x8d   : > { %2671 = vmatpush1.bf16.msra.mxu0 %v4516_v8  ;;  %2917 = vmatpush1.bf16.msra.mxu1 %v4519_v9  ;;  %v4600_v8 = vld [vmem:[%s5076_s27 + $0x560] ss:$16 sps:$4 sm:$0xff]   ;;  %v4603_v9 = vld [vmem:[%s5076_s27 + $0x568] ss:$16 sps:$4 sm:$0xff]  }
  0x8e   : > { %2672 = vmatprep.subr.bf16.mxu0 %v4524_v10  ;;  %2918 = vmatprep.subr.bf16.mxu1 %v4527_v11  ;;  %v4608_v10 = vld [vmem:[%s5076_s27 + $0x584] ss:$16 sps:$4 sm:$0xff]   ;;  %v4611_v11 = vld [vmem:[%s5076_s27 + $0x58c] ss:$16 sps:$4 sm:$0xff]  }
  0x91   : > { %2673 = vmatpush1.bf16.msra.mxu0 %v4522_v13  ;;  %2919 = vmatpush1.bf16.msra.mxu1 %v4525_v14  ;;  %v4609_v13 = vld [vmem:[%s5076_s27 + $0x588] ss:$16 sps:$4 sm:$0xff]   ;;  %v4614_v14 = vld [vmem:[%s5076_s27 + $0x5a4] ss:$16 sps:$4 sm:$0xff]  }
  0x92   : > { %2674 = vmatprep.subr.bf16.mxu0 %v4530_v16  ;;  %2920 = vmatprep.subr.bf16.mxu1 %v4533_v17  ;;  %v4617_v16 = vld [vmem:[%s5076_s27 + $0x5ac] ss:$16 sps:$4 sm:$0xff]   ;;  %v4612_v17 = vld [vmem:[%s5076_s27 + $0x5a0] ss:$16 sps:$4 sm:$0xff]  }
  0x95   : > { %2675 = vmatpush1.bf16.msra.mxu0 %v4528_v19  ;;  %2921 = vmatpush1.bf16.msra.mxu1 %v4531_v54  ;;  %v4615_v19 = vld [vmem:[%s5076_s27 + $0x5a8] ss:$16 sps:$4 sm:$0xff]   ;;  %v4620_v54 = vld [vmem:[%s5076_s27 + $0x5c4] ss:$16 sps:$4 sm:$0xff]  }
  0x96   : > { %2685 = vmatprep.subr.bf16.mxu0 %v4536_v20  ;;  %2931 = vmatprep.subr.bf16.mxu1 %v4539_v21  ;;  %v4623_v20 = vld [vmem:[%s5076_s27 + $0x5cc] ss:$16 sps:$4 sm:$0xff]   ;;  %v4618_v21 = vld [vmem:[%s5076_s27 + $0x5c0] ss:$16 sps:$4 sm:$0xff]  }
  0x98   : > { %2677 = vmatmul.mubr.bf16.vlgmr.msra.gmra.mrb[0].mxu0 %v805_v24  ;;  %2923 = vmatmul.mubr.bf16.vlgmr.msra.gmra.mrb[0].mxu1 %v805_v24  ;;  %v4629_v24 = vld [vmem:[%s5076_s27 + $0x5ec] ss:$16 sps:$4 sm:$0xff]  }
  0x99   : > { %2686 = vmatpush1.bf16.msra.mxu0 %v4534_v23  ;;  %2932 = vmatpush1.bf16.msra.mxu1 %v4537_v25  ;;  %v4626_v23 = vld [vmem:[%s5076_s27 + $0x5e4] ss:$16 sps:$4 sm:$0xff]   ;;  %v4624_v25 = vld [vmem:[%s5076_s27 + $0x5e0] ss:$16 sps:$4 sm:$0xff]  }
  0x9a   : > { %2687 = vmatprep.subr.bf16.mxu0 %v4542_v26  ;;  %2933 = vmatprep.subr.bf16.mxu1 %v4545_v27  ;;  %v4627_v26 = vld [vmem:[%s5076_s27 + $0x5e8] ss:$16 sps:$4 sm:$0xff]   ;;  %v4633_v27 = vld [vmem:[%s5076_s27 + $0x604] ss:$16 sps:$4 sm:$0xff]  }
  0x9b   : > { %2717 = vmatprep.mubr.bf16.mxu0 %v5240_v28  ;;  %2963 = vmatprep.mubr.bf16.mxu1 %v5240_v28 }
  0x9d   : > { %2688 = vmatpush1.bf16.msra.mxu0 %v4540_v29  ;;  %2934 = vmatpush1.bf16.msra.mxu1 %v4543_v15  ;;  %v4636_v29 = vld [vmem:[%s5076_s27 + $0x60c] ss:$16 sps:$4 sm:$0xff]   ;;  %v4631_v15 = vld [vmem:[%s5076_s27 + $0x600] ss:$16 sps:$4 sm:$0xff]  }
  0x9e   : > { %2689 = vmatprep.subr.bf16.mxu0 %v4548_v30  ;;  %2935 = vmatprep.subr.bf16.mxu1 %v4551_v31  ;;  %v5307_v30 = vrot.slane %v5225_v18, %v5127_v51  ;;  %v4634_v31 = vld [vmem:[%s5076_s27 + $0x608] ss:$16 sps:$4 sm:$0xff]   ;;  %v4637_v18 = vld [vmem:[%s5076_s27 + $0x620] ss:$16 sps:$4 sm:$0xff]  }
  0xa1   : > { %2690 = vmatpush1.bf16.msra.mxu0 %v4546_v32  ;;  %2936 = vmatpush1.bf16.msra.mxu1 %v4549_v33  ;;  %v4639_v32 = vld [vmem:[%s5076_s27 + $0x624] ss:$16 sps:$4 sm:$0xff]   ;;  %v4642_v33 = vld [vmem:[%s5076_s27 + $0x62c] ss:$16 sps:$4 sm:$0xff]  }
  0xa2   : > { %2691 = vmatprep.subr.bf16.mxu0 %v4554_v34  ;;  %2937 = vmatprep.subr.bf16.mxu1 %v4557_v35  ;;  %v808_v34 = vcombine.high %v5240_v28, %v5240_v28  ;;  %v4640_v35 = vld [vmem:[%s5076_s27 + $0x628] ss:$16 sps:$4 sm:$0xff]   ;;  %v4643_v28 = vld [vmem:[%s5076_s27 + $0x640] ss:$16 sps:$4 sm:$0xff]  }
  0xa5   : > { %2692 = vmatpush1.bf16.msra.mxu0 %v4552_v36  ;;  %2938 = vmatpush1.bf16.msra.mxu1 %v4555_v37  ;;  %v4645_v36 = vld [vmem:[%s5076_s27 + $0x644] ss:$16 sps:$4 sm:$0xff]   ;;  %v4648_v37 = vld [vmem:[%s5076_s27 + $0x64c] ss:$16 sps:$4 sm:$0xff]  }
  0xa6   : > { %2693 = vmatprep.subr.bf16.mxu0 %v4560_v38  ;;  %2939 = vmatprep.subr.bf16.mxu1 %v4563_v39  ;;  %v4646_v38 = vld [vmem:[%s5076_s27 + $0x648] ss:$16 sps:$4 sm:$0xff]   ;;  %v4651_v39 = vld [vmem:[%s5076_s27 + $0x664] ss:$16 sps:$4 sm:$0xff]  }
  0xa9   : > { %2694 = vmatpush1.bf16.msra.mxu0 %v4558_v41  ;;  %2940 = vmatpush1.bf16.msra.mxu1 %v4561_v42  ;;  %v4654_v41 = vld [vmem:[%s5076_s27 + $0x66c] ss:$16 sps:$4 sm:$0xff]   ;;  %v4649_v42 = vld [vmem:[%s5076_s27 + $0x660] ss:$16 sps:$4 sm:$0xff]  }
  0xaa   : > { %2695 = vmatprep.subr.bf16.mxu0 %v4566_v43  ;;  %2941 = vmatprep.subr.bf16.mxu1 %v4569_v44  ;;  %v4652_v43 = vld [vmem:[%s5076_s27 + $0x668] ss:$16 sps:$4 sm:$0xff]   ;;  %v4657_v44 = vld [vmem:[%s5076_s27 + $0x684] ss:$16 sps:$4 sm:$0xff]  }
  0xad   : > { %2696 = vmatpush1.bf16.msra.mxu0 %v4564_v46  ;;  %2942 = vmatpush1.bf16.msra.mxu1 %v4567_v47  ;;  %v4660_v46 = vld [vmem:[%s5076_s27 + $0x68c] ss:$16 sps:$4 sm:$0xff]   ;;  %v4655_v47 = vld [vmem:[%s5076_s27 + $0x680] ss:$16 sps:$4 sm:$0xff]  }
  0xae   : > { %2697 = vmatprep.subr.bf16.mxu0 %v4572_v48  ;;  %2943 = vmatprep.subr.bf16.mxu1 %v4575_v49  ;;  %v4658_v48 = vld [vmem:[%s5076_s27 + $0x688] ss:$16 sps:$4 sm:$0xff]   ;;  %v4663_v49 = vld [vmem:[%s5076_s27 + $0x6a4] ss:$16 sps:$4 sm:$0xff]  }
  0xb1   : > { %2698 = vmatpush1.bf16.msra.mxu0 %v4570_v50  ;;  %2944 = vmatpush1.bf16.msra.mxu1 %v4573_v52  ;;  %v4666_v50 = vld [vmem:[%s5076_s27 + $0x6ac] ss:$16 sps:$4 sm:$0xff]   ;;  %v4661_v52 = vld [vmem:[%s5076_s27 + $0x6a0] ss:$16 sps:$4 sm:$0xff]  }
  0xb2   : > { %2699 = vmatprep.subr.bf16.mxu0 %v4578_v53  ;;  %2945 = vmatprep.subr.bf16.mxu1 %v4581_v55  ;;  %v4664_v53 = vld [vmem:[%s5076_s27 + $0x6a8] ss:$16 sps:$4 sm:$0xff]   ;;  %v4669_v55 = vld [vmem:[%s5076_s27 + $0x6c4] ss:$16 sps:$4 sm:$0xff]  }
  0xb5   : > { %2700 = vmatpush1.bf16.msra.mxu0 %v4576_v56  ;;  %2946 = vmatpush1.bf16.msra.mxu1 %v4579_v57  ;;  %v4672_v56 = vld [vmem:[%s5076_s27 + $0x6cc] ss:$16 sps:$4 sm:$0xff]   ;;  %v4667_v57 = vld [vmem:[%s5076_s27 + $0x6c0] ss:$16 sps:$4 sm:$0xff]  }
  0xb6   : > { %2701 = vmatprep.subr.bf16.mxu0 %v4584_v58  ;;  %2947 = vmatprep.subr.bf16.mxu1 %v4587_v59  ;;  %v4670_v58 = vld [vmem:[%s5076_s27 + $0x6c8] ss:$16 sps:$4 sm:$0xff]   ;;  %v4675_v59 = vld [vmem:[%s5076_s27 + $0x6e4] ss:$16 sps:$4 sm:$0xff]  }
  0xb9   : > { %2702 = vmatpush1.bf16.msra.mxu0 %v4582_v60  ;;  %2948 = vmatpush1.bf16.msra.mxu1 %v4585_v61  ;;  %v4678_v60 = vld [vmem:[%s5076_s27 + $0x6ec] ss:$16 sps:$4 sm:$0xff]   ;;  %v4673_v61 = vld [vmem:[%s5076_s27 + $0x6e0] ss:$16 sps:$4 sm:$0xff]  }
  0xba   : > { %2703 = vmatprep.subr.bf16.mxu0 %v4590_v62  ;;  %2949 = vmatprep.subr.bf16.mxu1 %v4593_v63  ;;  %v4676_v62 = vld [vmem:[%s5076_s27 + $0x6e8] ss:$16 sps:$4 sm:$0xff]   ;;  %v4681_v63 = vld [vmem:[%s5076_s27 + $0x704] ss:$16 sps:$4 sm:$0xff]  }
  0xbd   : > { %2704 = vmatpush1.bf16.msra.mxu0 %v4588_v0  ;;  %2950 = vmatpush1.bf16.msra.mxu1 %v4591_v1  ;;  %v4684_v0 = vld [vmem:[%s5076_s27 + $0x70c] ss:$16 sps:$4 sm:$0xff]   ;;  %v4679_v1 = vld [vmem:[%s5076_s27 + $0x700] ss:$16 sps:$4 sm:$0xff]  }
  0xbe   : > { %2705 = vmatprep.subr.bf16.mxu0 %v4596_v2  ;;  %2951 = vmatprep.subr.bf16.mxu1 %v4599_v3  ;;  %v4682_v2 = vld [vmem:[%s5076_s27 + $0x708] ss:$16 sps:$4 sm:$0xff]   ;;  %v4687_v3 = vld [vmem:[%s5076_s27 + $0x724] ss:$16 sps:$4 sm:$0xff]  }
  0xc1   : > { %2706 = vmatpush1.bf16.msra.mxu0 %v4594_v4  ;;  %2952 = vmatpush1.bf16.msra.mxu1 %v4597_v5  ;;  %v4690_v4 = vld [vmem:[%s5076_s27 + $0x72c] ss:$16 sps:$4 sm:$0xff]   ;;  %v4685_v5 = vld [vmem:[%s5076_s27 + $0x720] ss:$16 sps:$4 sm:$0xff]  }
  0xc2   : > { %2707 = vmatprep.subr.bf16.mxu0 %v4602_v6  ;;  %2953 = vmatprep.subr.bf16.mxu1 %v4605_v7  ;;  %v4688_v6 = vld [vmem:[%s5076_s27 + $0x728] ss:$16 sps:$4 sm:$0xff]   ;;  %v4693_v7 = vld [vmem:[%s5076_s27 + $0x744] ss:$16 sps:$4 sm:$0xff]  }
  0xc5   : > { %2708 = vmatpush1.bf16.msra.mxu0 %v4600_v8  ;;  %2954 = vmatpush1.bf16.msra.mxu1 %v4603_v9  ;;  %v4696_v8 = vld [vmem:[%s5076_s27 + $0x74c] ss:$16 sps:$4 sm:$0xff]   ;;  %v4691_v9 = vld [vmem:[%s5076_s27 + $0x740] ss:$16 sps:$4 sm:$0xff]  }
  0xc6   : > { %2709 = vmatprep.subr.bf16.mxu0 %v4608_v10  ;;  %2955 = vmatprep.subr.bf16.mxu1 %v4611_v11  ;;  %v4694_v10 = vld [vmem:[%s5076_s27 + $0x748] ss:$16 sps:$4 sm:$0xff]   ;;  %v4699_v11 = vld [vmem:[%s5076_s27 + $0x764] ss:$16 sps:$4 sm:$0xff]  }
  0xc9   : > { %2710 = vmatpush1.bf16.msra.mxu0 %v4606_v12  ;;  %2956 = vmatpush1.bf16.msra.mxu1 %v4609_v13  ;;  %v4702_v12 = vld [vmem:[%s5076_s27 + $0x76c] ss:$16 sps:$4 sm:$0xff]   ;;  %v4697_v13 = vld [vmem:[%s5076_s27 + $0x760] ss:$16 sps:$4 sm:$0xff]  }
  0xca   : > { %2711 = vmatprep.subr.bf16.mxu0 %v4614_v14  ;;  %2957 = vmatprep.subr.bf16.mxu1 %v4617_v16  ;;  %v4700_v14 = vld [vmem:[%s5076_s27 + $0x768] ss:$16 sps:$4 sm:$0xff]   ;;  %v4705_v16 = vld [vmem:[%s5076_s27 + $0x784] ss:$16 sps:$4 sm:$0xff]  }
  0xcd   : > { %2712 = vmatpush1.bf16.msra.mxu0 %v4612_v17  ;;  %2958 = vmatpush1.bf16.msra.mxu1 %v4615_v19  ;;  %v4708_v17 = vld [vmem:[%s5076_s27 + $0x78c] ss:$16 sps:$4 sm:$0xff]   ;;  %v4703_v19 = vld [vmem:[%s5076_s27 + $0x780] ss:$16 sps:$4 sm:$0xff]  }
  0xce   : > { %2713 = vmatprep.subr.bf16.mxu0 %v4620_v54  ;;  %2959 = vmatprep.subr.bf16.mxu1 %v4623_v20  ;;  %v4706_v54 = vld [vmem:[%s5076_s27 + $0x788] ss:$16 sps:$4 sm:$0xff]   ;;  %v4711_v20 = vld [vmem:[%s5076_s27 + $0x7a4] ss:$16 sps:$4 sm:$0xff]  }
  0xd1   : > { %2714 = vmatpush1.bf16.msra.mxu0 %v4618_v21  ;;  %2960 = vmatpush1.bf16.msra.mxu1 %v4621_v22  ;;  %v4714_v21 = vld [vmem:[%s5076_s27 + $0x7ac] ss:$16 sps:$4 sm:$0xff]   ;;  %v4709_v22 = vld [vmem:[%s5076_s27 + $0x7a0] ss:$16 sps:$4 sm:$0xff]  }
  0xd2   : > { %2715 = vmatprep.subr.bf16.mxu0 %v4626_v23  ;;  %2961 = vmatprep.subr.bf16.mxu1 %v4629_v24  ;;  %v4712_v23 = vld [vmem:[%s5076_s27 + $0x7a8] ss:$16 sps:$4 sm:$0xff]   ;;  %v4717_v24 = vld [vmem:[%s5076_s27 + $0x7c4] ss:$16 sps:$4 sm:$0xff]  }
  0xd5   : > { %2716 = vmatpush1.bf16.msra.mxu0 %v4624_v25  ;;  %2962 = vmatpush1.bf16.msra.mxu1 %v4627_v26  ;;  %v4720_v25 = vld [vmem:[%s5076_s27 + $0x7cc] ss:$16 sps:$4 sm:$0xff]   ;;  %v4715_v26 = vld [vmem:[%s5076_s27 + $0x7c0] ss:$16 sps:$4 sm:$0xff]  }
  0xd6   : > { %2726 = vmatprep.subr.bf16.mxu0 %v4633_v27  ;;  %2972 = vmatprep.subr.bf16.mxu1 %v4636_v29  ;;  %v4718_v27 = vld [vmem:[%s5076_s27 + $0x7c8] ss:$16 sps:$4 sm:$0xff]   ;;  %v4723_v29 = vld [vmem:[%s5076_s27 + $0x7e4] ss:$16 sps:$4 sm:$0xff]  }
  0xd8   : > { %2718 = vmatmul.mubr.bf16.vlgmr.msra.gmra.mrb[0].mxu0 %v5307_v30  ;;  %2964 = vmatmul.mubr.bf16.vlgmr.msra.gmra.mrb[0].mxu1 %v5307_v30 }
  0xd9   : > { %2727 = vmatpush1.bf16.msra.mxu0 %v4631_v15  ;;  %2973 = vmatpush1.bf16.msra.mxu1 %v4634_v31  ;;  %v4726_v15 = vld [vmem:[%s5076_s27 + $0x7ec] ss:$16 sps:$4 sm:$0xff]   ;;  %v5373_v31 = vld.sshfl [vmem:[%s5071_s23 + $0x8] sm:$0x13 pattern:$0x75316420] }
  0xda   : > { %2728 = vmatprep.subr.bf16.mxu0 %v4639_v32  ;;  %2974 = vmatprep.subr.bf16.mxu1 %v4642_v33  ;;  %v4721_v32 = vld [vmem:[%s5076_s27 + $0x7e0] ss:$16 sps:$4 sm:$0xff]   ;;  %v4724_v33 = vld [vmem:[%s5076_s27 + $0x7e8] ss:$16 sps:$4 sm:$0xff]  }
  0xdb   : > { %2758 = vmatprep.mubr.bf16.mxu0 %v808_v34  ;;  %3004 = vmatprep.mubr.bf16.mxu1 %v808_v34  ;;  %v4729_v34 = vld [vmem:[%s5076_s27 + $0x804] ss:$16 sps:$4 sm:$0xff]  }
  0xdd   : > { %2729 = vmatpush1.bf16.msra.mxu0 %v4637_v18  ;;  %2975 = vmatpush1.bf16.msra.mxu1 %v4640_v35  ;;  %v4732_v18 = vld [vmem:[%s5076_s27 + $0x80c] ss:$16 sps:$4 sm:$0xff]   ;;  %v816_v35 = vcombine.high %v5373_v31, %v5373_v31 }
  0xde   : > { %2730 = vmatprep.subr.bf16.mxu0 %v4645_v36  ;;  %2976 = vmatprep.subr.bf16.mxu1 %v4648_v37  ;;  %v806_v36 = vcombine.high %v5307_v30, %v5307_v30  ;;  %v4727_v37 = vld [vmem:[%s5076_s27 + $0x800] ss:$16 sps:$4 sm:$0xff]  }
  0xdf   : > { %v4733_v30 = vld [vmem:[%s5076_s27 + $0x820] ss:$16 sps:$4 sm:$0xff]  }
  0xe1   : > { %2731 = vmatpush1.bf16.msra.mxu0 %v4643_v28  ;;  %2977 = vmatpush1.bf16.msra.mxu1 %v4646_v38  ;;  %v4730_v28 = vld [vmem:[%s5076_s27 + $0x808] ss:$16 sps:$4 sm:$0xff]   ;;  %v4735_v38 = vld [vmem:[%s5076_s27 + $0x824] ss:$16 sps:$4 sm:$0xff]  }
  0xe2   : > { %2732 = vmatprep.subr.bf16.mxu0 %v4651_v39  ;;  %2978 = vmatprep.subr.bf16.mxu1 %v4654_v41  ;;  %v4738_v39 = vld [vmem:[%s5076_s27 + $0x82c] ss:$16 sps:$4 sm:$0xff]   ;;  %v830_v41 = vrot.slane %v816_v35, %v5127_v51  ;;  %v4814_v35 = vld [vmem:[%s5076_s27 + $0x9c8] ss:$16 sps:$4 sm:$0xff]  }
  0xe5   : > { %2733 = vmatpush1.bf16.msra.mxu0 %v4649_v42  ;;  %2979 = vmatpush1.bf16.msra.mxu1 %v4652_v43  ;;  %v4736_v42 = vld [vmem:[%s5076_s27 + $0x828] ss:$16 sps:$4 sm:$0xff]   ;;  %v4741_v43 = vld [vmem:[%s5076_s27 + $0x844] ss:$16 sps:$4 sm:$0xff]  }
  0xe6   : > { %2734 = vmatprep.subr.bf16.mxu0 %v4657_v44  ;;  %2980 = vmatprep.subr.bf16.mxu1 %v4660_v46  ;;  %v4744_v44 = vld [vmem:[%s5076_s27 + $0x84c] ss:$16 sps:$4 sm:$0xff]   ;;  %v4739_v46 = vld [vmem:[%s5076_s27 + $0x840] ss:$16 sps:$4 sm:$0xff]  }
  0xe9   : > { %2735 = vmatpush1.bf16.msra.mxu0 %v4655_v47  ;;  %2981 = vmatpush1.bf16.msra.mxu1 %v4658_v48  ;;  %v4742_v47 = vld [vmem:[%s5076_s27 + $0x848] ss:$16 sps:$4 sm:$0xff]   ;;  %v4747_v48 = vld [vmem:[%s5076_s27 + $0x864] ss:$16 sps:$4 sm:$0xff]  }
  0xea   : > { %2736 = vmatprep.subr.bf16.mxu0 %v4663_v49  ;;  %2982 = vmatprep.subr.bf16.mxu1 %v4666_v50  ;;  %v4750_v49 = vld [vmem:[%s5076_s27 + $0x86c] ss:$16 sps:$4 sm:$0xff]   ;;  %v4745_v50 = vld [vmem:[%s5076_s27 + $0x860] ss:$16 sps:$4 sm:$0xff]  }
  0xed   : > { %2737 = vmatpush1.bf16.msra.mxu0 %v4661_v52  ;;  %2983 = vmatpush1.bf16.msra.mxu1 %v4664_v53  ;;  %v4748_v52 = vld [vmem:[%s5076_s27 + $0x868] ss:$16 sps:$4 sm:$0xff]   ;;  %v4753_v53 = vld [vmem:[%s5076_s27 + $0x884] ss:$16 sps:$4 sm:$0xff]  }
  0xee   : > { %2738 = vmatprep.subr.bf16.mxu0 %v4669_v55  ;;  %2984 = vmatprep.subr.bf16.mxu1 %v4672_v56  ;;  %v4756_v55 = vld [vmem:[%s5076_s27 + $0x88c] ss:$16 sps:$4 sm:$0xff]   ;;  %v4751_v56 = vld [vmem:[%s5076_s27 + $0x880] ss:$16 sps:$4 sm:$0xff]  }
  0xf1   : > { %2739 = vmatpush1.bf16.msra.mxu0 %v4667_v57  ;;  %2985 = vmatpush1.bf16.msra.mxu1 %v4670_v58  ;;  %v4754_v57 = vld [vmem:[%s5076_s27 + $0x888] ss:$16 sps:$4 sm:$0xff]   ;;  %v4759_v58 = vld [vmem:[%s5076_s27 + $0x8a4] ss:$16 sps:$4 sm:$0xff]  }
  0xf2   : > { %2740 = vmatprep.subr.bf16.mxu0 %v4675_v59  ;;  %2986 = vmatprep.subr.bf16.mxu1 %v4678_v60  ;;  %v4762_v59 = vld [vmem:[%s5076_s27 + $0x8ac] ss:$16 sps:$4 sm:$0xff]   ;;  %v4757_v60 = vld [vmem:[%s5076_s27 + $0x8a0] ss:$16 sps:$4 sm:$0xff]  }
  0xf5   : > { %2741 = vmatpush1.bf16.msra.mxu0 %v4673_v61  ;;  %2987 = vmatpush1.bf16.msra.mxu1 %v4676_v62  ;;  %v4760_v61 = vld [vmem:[%s5076_s27 + $0x8a8] ss:$16 sps:$4 sm:$0xff]   ;;  %v4765_v62 = vld [vmem:[%s5076_s27 + $0x8c4] ss:$16 sps:$4 sm:$0xff]  }
  0xf6   : > { %2742 = vmatprep.subr.bf16.mxu0 %v4681_v63  ;;  %2988 = vmatprep.subr.bf16.mxu1 %v4684_v0  ;;  %v4768_v63 = vld [vmem:[%s5076_s27 + $0x8cc] ss:$16 sps:$4 sm:$0xff]   ;;  %v4763_v0 = vld [vmem:[%s5076_s27 + $0x8c0] ss:$16 sps:$4 sm:$0xff]  }
  0xf9   : > { %2743 = vmatpush1.bf16.msra.mxu0 %v4679_v1  ;;  %2989 = vmatpush1.bf16.msra.mxu1 %v4682_v2  ;;  %v4766_v1 = vld [vmem:[%s5076_s27 + $0x8c8] ss:$16 sps:$4 sm:$0xff]   ;;  %v4771_v2 = vld [vmem:[%s5076_s27 + $0x8e4] ss:$16 sps:$4 sm:$0xff]  }
  0xfa   : > { %2744 = vmatprep.subr.bf16.mxu0 %v4687_v3  ;;  %2990 = vmatprep.subr.bf16.mxu1 %v4690_v4  ;;  %v4774_v3 = vld [vmem:[%s5076_s27 + $0x8ec] ss:$16 sps:$4 sm:$0xff]   ;;  %v4769_v4 = vld [vmem:[%s5076_s27 + $0x8e0] ss:$16 sps:$4 sm:$0xff]  }
  0xfd   : > { %2745 = vmatpush1.bf16.msra.mxu0 %v4685_v5  ;;  %2991 = vmatpush1.bf16.msra.mxu1 %v4688_v6  ;;  %v4772_v5 = vld [vmem:[%s5076_s27 + $0x8e8] ss:$16 sps:$4 sm:$0xff]   ;;  %v4777_v6 = vld [vmem:[%s5076_s27 + $0x904] ss:$16 sps:$4 sm:$0xff]  }
  0xfe   : > { %2746 = vmatprep.subr.bf16.mxu0 %v4693_v7  ;;  %2992 = vmatprep.subr.bf16.mxu1 %v4696_v8  ;;  %v4780_v7 = vld [vmem:[%s5076_s27 + $0x90c] ss:$16 sps:$4 sm:$0xff]   ;;  %v4775_v8 = vld [vmem:[%s5076_s27 + $0x900] ss:$16 sps:$4 sm:$0xff]  }
 0x101   : > { %2747 = vmatpush1.bf16.msra.mxu0 %v4691_v9  ;;  %2993 = vmatpush1.bf16.msra.mxu1 %v4694_v10  ;;  %v4778_v9 = vld [vmem:[%s5076_s27 + $0x908] ss:$16 sps:$4 sm:$0xff]   ;;  %v4783_v10 = vld [vmem:[%s5076_s27 + $0x924] ss:$16 sps:$4 sm:$0xff]  }
 0x102   : > { %2748 = vmatprep.subr.bf16.mxu0 %v4699_v11  ;;  %2994 = vmatprep.subr.bf16.mxu1 %v4702_v12  ;;  %v4786_v11 = vld [vmem:[%s5076_s27 + $0x92c] ss:$16 sps:$4 sm:$0xff]   ;;  %v4781_v12 = vld [vmem:[%s5076_s27 + $0x920] ss:$16 sps:$4 sm:$0xff]  }
 0x105   : > { %2749 = vmatpush1.bf16.msra.mxu0 %v4697_v13  ;;  %2995 = vmatpush1.bf16.msra.mxu1 %v4700_v14  ;;  %v4784_v13 = vld [vmem:[%s5076_s27 + $0x928] ss:$16 sps:$4 sm:$0xff]   ;;  %v4789_v14 = vld [vmem:[%s5076_s27 + $0x944] ss:$16 sps:$4 sm:$0xff]  }
 0x106   : > { %2750 = vmatprep.subr.bf16.mxu0 %v4705_v16  ;;  %2996 = vmatprep.subr.bf16.mxu1 %v4708_v17  ;;  %v4792_v16 = vld [vmem:[%s5076_s27 + $0x94c] ss:$16 sps:$4 sm:$0xff]   ;;  %v4787_v17 = vld [vmem:[%s5076_s27 + $0x940] ss:$16 sps:$4 sm:$0xff]  }
 0x109   : > { %2751 = vmatpush1.bf16.msra.mxu0 %v4703_v19  ;;  %2997 = vmatpush1.bf16.msra.mxu1 %v4706_v54  ;;  %v4790_v19 = vld [vmem:[%s5076_s27 + $0x948] ss:$16 sps:$4 sm:$0xff]   ;;  %v4795_v54 = vld [vmem:[%s5076_s27 + $0x964] ss:$16 sps:$4 sm:$0xff]  }
 0x10a   : > { %2752 = vmatprep.subr.bf16.mxu0 %v4711_v20  ;;  %2998 = vmatprep.subr.bf16.mxu1 %v4714_v21  ;;  %v4798_v20 = vld [vmem:[%s5076_s27 + $0x96c] ss:$16 sps:$4 sm:$0xff]   ;;  %v4793_v21 = vld [vmem:[%s5076_s27 + $0x960] ss:$16 sps:$4 sm:$0xff]  }
 0x10d   : > { %2753 = vmatpush1.bf16.msra.mxu0 %v4709_v22  ;;  %2999 = vmatpush1.bf16.msra.mxu1 %v4712_v23  ;;  %v4796_v22 = vld [vmem:[%s5076_s27 + $0x968] ss:$16 sps:$4 sm:$0xff]   ;;  %v4801_v23 = vld [vmem:[%s5076_s27 + $0x984] ss:$16 sps:$4 sm:$0xff]  }
 0x10e   : > { %2754 = vmatprep.subr.bf16.mxu0 %v4717_v24  ;;  %3000 = vmatprep.subr.bf16.mxu1 %v4720_v25  ;;  %v4804_v24 = vld [vmem:[%s5076_s27 + $0x98c] ss:$16 sps:$4 sm:$0xff]   ;;  %v4799_v25 = vld [vmem:[%s5076_s27 + $0x980] ss:$16 sps:$4 sm:$0xff]  }
 0x111   : > { %2755 = vmatpush1.bf16.msra.mxu0 %v4715_v26  ;;  %3001 = vmatpush1.bf16.msra.mxu1 %v4718_v27  ;;  %v4802_v26 = vld [vmem:[%s5076_s27 + $0x988] ss:$16 sps:$4 sm:$0xff]   ;;  %v4807_v27 = vld [vmem:[%s5076_s27 + $0x9a4] ss:$16 sps:$4 sm:$0xff]  }
 0x112   : > { %2756 = vmatprep.subr.bf16.mxu0 %v4723_v29  ;;  %3002 = vmatprep.subr.bf16.mxu1 %v4726_v15  ;;  %v4810_v29 = vld [vmem:[%s5076_s27 + $0x9ac] ss:$16 sps:$4 sm:$0xff]   ;;  %v4805_v15 = vld [vmem:[%s5076_s27 + $0x9a0] ss:$16 sps:$4 sm:$0xff]  }
 0x115   : > { %2757 = vmatpush1.bf16.msra.mxu0 %v4721_v32  ;;  %3003 = vmatpush1.bf16.msra.mxu1 %v4724_v33  ;;  %v4808_v32 = vld [vmem:[%s5076_s27 + $0x9a8] ss:$16 sps:$4 sm:$0xff]   ;;  %v4813_v33 = vld [vmem:[%s5076_s27 + $0x9c4] ss:$16 sps:$4 sm:$0xff]  }
 0x116   : > { %2767 = vmatprep.subr.bf16.mxu0 %v4729_v34  ;;  %3013 = vmatprep.subr.bf16.mxu1 %v4732_v18  ;;  %v4816_v34 = vld [vmem:[%s5076_s27 + $0x9cc] ss:$16 sps:$4 sm:$0xff]   ;;  %v4811_v18 = vld [vmem:[%s5076_s27 + $0x9c0] ss:$16 sps:$4 sm:$0xff]  }
 0x118   : > { %2759 = vmatmul.mubr.bf16.vlgmr.msra.gmra.mrb[0].mxu0 %v806_v36  ;;  %3005 = vmatmul.mubr.bf16.vlgmr.msra.gmra.mrb[0].mxu1 %v806_v36  ;;  %v4819_v36 = vld [vmem:[%s5076_s27 + $0x9e4] ss:$16 sps:$4 sm:$0xff]  }
 0x119   : > { %2768 = vmatpush1.bf16.msra.mxu0 %v4727_v37  ;;  %3014 = vmatpush1.bf16.msra.mxu1 %v4730_v28  ;;  %v4822_v37 = vld [vmem:[%s5076_s27 + $0x9ec] ss:$16 sps:$4 sm:$0xff]   ;;  %v4817_v28 = vld [vmem:[%s5076_s27 + $0x9e0] ss:$16 sps:$4 sm:$0xff]  }
 0x11a   : > { %2769 = vmatprep.subr.bf16.mxu0 %v4735_v38  ;;  %3015 = vmatprep.subr.bf16.mxu1 %v4738_v39  ;;  %v4820_v38 = vld [vmem:[%s5076_s27 + $0x9e8] ss:$16 sps:$4 sm:$0xff]   ;;  %v4825_v39 = vld [vmem:[%s5076_s27 + $0xa04] ss:$16 sps:$4 sm:$0xff]  }
 0x11b   : > { %2799 = vmatprep.mubr.bf16.mxu0 %v830_v41  ;;  %3045 = vmatprep.mubr.bf16.mxu1 %v830_v41  ;;  %v4828_v41 = vld [vmem:[%s5076_s27 + $0xa0c] ss:$16 sps:$4 sm:$0xff]  }
 0x11d   : > { %2770 = vmatpush1.bf16.msra.mxu0 %v4733_v30  ;;  %3016 = vmatpush1.bf16.msra.mxu1 %v4736_v42  ;;  %v5450_v30 = vrot.slane %v5373_v31, %v5127_v51  ;;  %v4823_v42 = vld [vmem:[%s5076_s27 + $0xa00] ss:$16 sps:$4 sm:$0xff]  }
 0x11e   : > { %2771 = vmatprep.subr.bf16.mxu0 %v4741_v43  ;;  %3017 = vmatprep.subr.bf16.mxu1 %v4744_v44  ;;  %v4826_v43 = vld [vmem:[%s5076_s27 + $0xa08] ss:$16 sps:$4 sm:$0xff]   ;;  %v4831_v44 = vld [vmem:[%s5076_s27 + $0xa24] ss:$16 sps:$4 sm:$0xff]   ;;  %v4829_v31 = vld [vmem:[%s5076_s27 + $0xa20] ss:$16 sps:$4 sm:$0xff]  }
 0x121   : > { %2772 = vmatpush1.bf16.msra.mxu0 %v4739_v46  ;;  %3018 = vmatpush1.bf16.msra.mxu1 %v4742_v47  ;;  %v4834_v46 = vld [vmem:[%s5076_s27 + $0xa2c] ss:$16 sps:$4 sm:$0xff]   ;;  %v4832_v47 = vld [vmem:[%s5076_s27 + $0xa28] ss:$16 sps:$4 sm:$0xff]  }
 0x122   : > { %2773 = vmatprep.subr.bf16.mxu0 %v4747_v48  ;;  %3019 = vmatprep.subr.bf16.mxu1 %v4750_v49  ;;  %v4837_v48 = vld [vmem:[%s5076_s27 + $0xa44] ss:$16 sps:$4 sm:$0xff]   ;;  %v4840_v49 = vld [vmem:[%s5076_s27 + $0xa4c] ss:$16 sps:$4 sm:$0xff]  }
 0x125   : > { %2774 = vmatpush1.bf16.msra.mxu0 %v4745_v50  ;;  %3020 = vmatpush1.bf16.msra.mxu1 %v4748_v52  ;;  %v4991_v50 = vmov 0   ;;  %v4835_v52 = vld [vmem:[%s5076_s27 + $0xa40] ss:$16 sps:$4 sm:$0xff]  }
 0x126   : > { %2775 = vmatprep.subr.bf16.mxu0 %v4753_v53  ;;  %3021 = vmatprep.subr.bf16.mxu1 %v4756_v55  ;;  %v4838_v53 = vld [vmem:[%s5076_s27 + $0xa48] ss:$16 sps:$4 sm:$0xff]   ;;  %v4843_v55 = vld [vmem:[%s5076_s27 + $0xa64] ss:$16 sps:$4 sm:$0xff]  }
 0x129   : > { %2776 = vmatpush1.bf16.msra.mxu0 %v4751_v56  ;;  %3022 = vmatpush1.bf16.msra.mxu1 %v4754_v57  ;;  %v4846_v56 = vld [vmem:[%s5076_s27 + $0xa6c] ss:$16 sps:$4 sm:$0xff]   ;;  %v4841_v57 = vld [vmem:[%s5076_s27 + $0xa60] ss:$16 sps:$4 sm:$0xff]  }
 0x12a   : > { %2777 = vmatprep.subr.bf16.mxu0 %v4759_v58  ;;  %3023 = vmatprep.subr.bf16.mxu1 %v4762_v59  ;;  %v4844_v58 = vld [vmem:[%s5076_s27 + $0xa68] ss:$16 sps:$4 sm:$0xff]   ;;  %v4849_v59 = vld [vmem:[%s5076_s27 + $0xa84] ss:$16 sps:$4 sm:$0xff]  }
 0x12d   : > { %2778 = vmatpush1.bf16.msra.mxu0 %v4757_v60  ;;  %3024 = vmatpush1.bf16.msra.mxu1 %v4760_v61  ;;  %v4852_v60 = vld [vmem:[%s5076_s27 + $0xa8c] ss:$16 sps:$4 sm:$0xff]   ;;  %v4847_v61 = vld [vmem:[%s5076_s27 + $0xa80] ss:$16 sps:$4 sm:$0xff]  }
 0x12e   : > { %2779 = vmatprep.subr.bf16.mxu0 %v4765_v62  ;;  %3025 = vmatprep.subr.bf16.mxu1 %v4768_v63  ;;  %v4850_v62 = vld [vmem:[%s5076_s27 + $0xa88] ss:$16 sps:$4 sm:$0xff]   ;;  %v4855_v63 = vld [vmem:[%s5076_s27 + $0xaa4] ss:$16 sps:$4 sm:$0xff]  }
 0x131   : > { %2780 = vmatpush1.bf16.msra.mxu0 %v4763_v0  ;;  %3026 = vmatpush1.bf16.msra.mxu1 %v4766_v1  ;;  %v4858_v0 = vld [vmem:[%s5076_s27 + $0xaac] ss:$16 sps:$4 sm:$0xff]   ;;  %v4853_v1 = vld [vmem:[%s5076_s27 + $0xaa0] ss:$16 sps:$4 sm:$0xff]  }
 0x132   : > { %2781 = vmatprep.subr.bf16.mxu0 %v4771_v2  ;;  %3027 = vmatprep.subr.bf16.mxu1 %v4774_v3  ;;  %v4856_v2 = vld [vmem:[%s5076_s27 + $0xaa8] ss:$16 sps:$4 sm:$0xff]   ;;  %v4861_v3 = vld [vmem:[%s5076_s27 + $0xac4] ss:$16 sps:$4 sm:$0xff]  }
 0x135   : > { %2782 = vmatpush1.bf16.msra.mxu0 %v4769_v4  ;;  %3028 = vmatpush1.bf16.msra.mxu1 %v4772_v5  ;;  %v4864_v4 = vld [vmem:[%s5076_s27 + $0xacc] ss:$16 sps:$4 sm:$0xff]   ;;  %v4859_v5 = vld [vmem:[%s5076_s27 + $0xac0] ss:$16 sps:$4 sm:$0xff]  }
 0x136   : > { %2783 = vmatprep.subr.bf16.mxu0 %v4777_v6  ;;  %3029 = vmatprep.subr.bf16.mxu1 %v4780_v7  ;;  %v4862_v6 = vld [vmem:[%s5076_s27 + $0xac8] ss:$16 sps:$4 sm:$0xff]   ;;  %v4867_v7 = vld [vmem:[%s5076_s27 + $0xae4] ss:$16 sps:$4 sm:$0xff]  }
 0x139   : > { %2784 = vmatpush1.bf16.msra.mxu0 %v4775_v8  ;;  %3030 = vmatpush1.bf16.msra.mxu1 %v4778_v9  ;;  %v4870_v8 = vld [vmem:[%s5076_s27 + $0xaec] ss:$16 sps:$4 sm:$0xff]   ;;  %v4865_v9 = vld [vmem:[%s5076_s27 + $0xae0] ss:$16 sps:$4 sm:$0xff]  }
 0x13a   : > { %2785 = vmatprep.subr.bf16.mxu0 %v4783_v10  ;;  %3031 = vmatprep.subr.bf16.mxu1 %v4786_v11  ;;  %v4868_v10 = vld [vmem:[%s5076_s27 + $0xae8] ss:$16 sps:$4 sm:$0xff]   ;;  %v831_v11 = vcombine.high %v5450_v30, %v5450_v30 }
 0x13d   : > { %2786 = vmatpush1.bf16.msra.mxu0 %v4781_v12  ;;  %3032 = vmatpush1.bf16.msra.mxu1 %v4784_v13 }
 0x13e   : > { %2787 = vmatprep.subr.bf16.mxu0 %v4789_v14  ;;  %3033 = vmatprep.subr.bf16.mxu1 %v4792_v16 }
 0x141   : > { %2788 = vmatpush1.bf16.msra.mxu0 %v4787_v17  ;;  %3034 = vmatpush1.bf16.msra.mxu1 %v4790_v19 }
 0x142   : > { %2789 = vmatprep.subr.bf16.mxu0 %v4795_v54  ;;  %3035 = vmatprep.subr.bf16.mxu1 %v4798_v20 }
 0x145   : > { %2790 = vmatpush1.bf16.msra.mxu0 %v4793_v21  ;;  %3036 = vmatpush1.bf16.msra.mxu1 %v4796_v22 }
 0x146   : > { %2791 = vmatprep.subr.bf16.mxu0 %v4801_v23  ;;  %3037 = vmatprep.subr.bf16.mxu1 %v4804_v24 }
 0x149   : > { %2792 = vmatpush1.bf16.msra.mxu0 %v4799_v25  ;;  %3038 = vmatpush1.bf16.msra.mxu1 %v4802_v26  ;;  %v403_v26 = vld [vmem:[#allocation2] sm:$0xf] }
 0x14a   : > { %2793 = vmatprep.subr.bf16.mxu0 %v4807_v27  ;;  %3039 = vmatprep.subr.bf16.mxu1 %v4810_v29 }
 0x14d   : > { %2794 = vmatpush1.bf16.msra.mxu0 %v4805_v15  ;;  %3040 = vmatpush1.bf16.msra.mxu1 %v4808_v32  ;;  %v4871_v15 = vld [vmem:[%s5693_s3 + $0x40] sm:$0xff] (!%p4140_p6)  }
 0x14e   : > { %2795 = vmatprep.subr.bf16.mxu0 %v4813_v33  ;;  %3041 = vmatprep.subr.bf16.mxu1 %v4816_v34  ;;  %v4872_v32 = vld [vmem:[%s5693_s3 + $0xc0] sm:$0xff] (!%p4140_p6)   ;;  %v4875_v33 = vld [vmem:[%s5693_s3 + $0x48] sm:$0xff] (!%p4140_p6)  }
 0x14f   : > { %v4876_v34 = vld [vmem:[%s5693_s3 + $0xc8] sm:$0xff] (!%p4140_p6)  }
 0x151   : > { %2796 = vmatpush1.bf16.msra.mxu0 %v4811_v18  ;;  %3042 = vmatpush1.bf16.msra.mxu1 %v4814_v35  ;;  %v4877_v18 = vld [vmem:[%s5693_s3 + $0x8] sm:$0xff] (!%p4140_p6)  }
 0x152   : > { %2797 = vmatprep.subr.bf16.mxu0 %v4819_v36  ;;  %3043 = vmatprep.subr.bf16.mxu1 %v4822_v37  ;;  %v4878_v35 = vld [vmem:[%s5693_s3 + $0x88] sm:$0xff] (!%p4140_p6)   ;;  %v4879_v36 = vld [vmem:[%s5693_s3 + $0x50] sm:$0xff] (!%p4140_p6)  }
 0x153   : > { %v4880_v37 = vld [vmem:[%s5693_s3 + $0xd0] sm:$0xff] (!%p4140_p6)  }
 0x155   : > { %2798 = vmatpush1.bf16.msra.mxu0 %v4817_v28  ;;  %3044 = vmatpush1.bf16.msra.mxu1 %v4820_v38  ;;  %v4881_v28 = vld [vmem:[%s5693_s3 + $0x10] sm:$0xff] (!%p4140_p6)  }
 0x156   : > { %2808 = vmatprep.subr.bf16.mxu0 %v4825_v39  ;;  %3054 = vmatprep.subr.bf16.mxu1 %v4828_v41  ;;  %v4882_v38 = vld [vmem:[%s5693_s3 + $0x90] sm:$0xff] (!%p4140_p6)   ;;  %v4883_v39 = vld [vmem:[%s5693_s3 + $0x58] sm:$0xff] (!%p4140_p6)  }
 0x157   : > { %v4884_v41 = vld [vmem:[%s5693_s3 + $0xd8] sm:$0xff] (!%p4140_p6)  }
 0x158   : > { %2800 = vmatmul.mubr.bf16.vlgmr.msra.gmra.mrb[0].mxu0 %v5450_v30  ;;  %3046 = vmatmul.mubr.bf16.vlgmr.msra.gmra.mrb[0].mxu1 %v5450_v30  ;;  %v4885_v30 = vld [vmem:[%s5693_s3 + $0x18] sm:$0xff] (!%p4140_p6)  }
 0x159   : > { %2809 = vmatpush1.bf16.msra.mxu0 %v4823_v42  ;;  %3055 = vmatpush1.bf16.msra.mxu1 %v4826_v43  ;;  %v4886_v42 = vld [vmem:[%s5693_s3 + $0x98] sm:$0xff] (!%p4140_p6)   ;;  %v4887_v43 = vld [vmem:[%s5693_s3 + $0x60] sm:$0xff] (!%p4140_p6)  }
 0x15a   : > { %2810 = vmatprep.subr.bf16.mxu0 %v4831_v44  ;;  %3056 = vmatprep.subr.bf16.mxu1 %v4834_v46  ;;  %v4888_v44 = vld [vmem:[%s5693_s3 + $0xe0] sm:$0xff] (!%p4140_p6)  }
 0x15b   : > { %2840 = vmatprep.mubr.bf16.mxu0 %v4991_v50  ;;  %3086 = vmatprep.mubr.bf16.mxu1 %v4991_v50  ;;  %v4889_v46 = vld [vmem:[%s5693_s3 + $0x20] sm:$0xff] (!%p4140_p6)   ;;  %v4894_v50 = vld [vmem:[%s5693_s3 + $0xa8] sm:$0xff] (!%p4140_p6)  }
 0x15d   : > { %2811 = vmatpush1.bf16.msra.mxu0 %v4829_v31  ;;  %3057 = vmatpush1.bf16.msra.mxu1 %v4832_v47  ;;  %v4890_v31 = vld [vmem:[%s5693_s3 + $0xa0] sm:$0xff] (!%p4140_p6)   ;;  %v4891_v47 = vld [vmem:[%s5693_s3 + $0x68] sm:$0xff] (!%p4140_p6)  }
 0x15e   : > { %2812 = vmatprep.subr.bf16.mxu0 %v4837_v48  ;;  %3058 = vmatprep.subr.bf16.mxu1 %v4840_v49  ;;  %v4892_v48 = vld [vmem:[%s5693_s3 + $0xe8] sm:$0xff] (!%p4140_p6)  }
 0x15f   : > { %v4893_v49 = vld [vmem:[%s5693_s3 + $0x28] sm:$0xff] (!%p4140_p6)  }
 0x161   : > { %2813 = vmatpush1.bf16.msra.mxu0 %v4835_v52  ;;  %3059 = vmatpush1.bf16.msra.mxu1 %v4838_v53  ;;  %v4895_v52 = vld [vmem:[%s5693_s3 + $0x70] sm:$0xff] (!%p4140_p6)  }
 0x162   : > { %2814 = vmatprep.subr.bf16.mxu0 %v4843_v55  ;;  %3060 = vmatprep.subr.bf16.mxu1 %v4846_v56  ;;  %v4896_v53 = vld [vmem:[%s5693_s3 + $0xf0] sm:$0xff] (!%p4140_p6)  }
 0x163   : > { %v4897_v55 = vld [vmem:[%s5693_s3 + $0x30] sm:$0xff] (!%p4140_p6)  }
 0x164   : > { %v4898_v56 = vld [vmem:[%s5693_s3 + $0xb0] sm:$0xff] (!%p4140_p6)  }
 0x165   : > { %2815 = vmatpush1.bf16.msra.mxu0 %v4841_v57  ;;  %3061 = vmatpush1.bf16.msra.mxu1 %v4844_v58  ;;  %v4899_v57 = vld [vmem:[%s5693_s3 + $0x78] sm:$0xff] (!%p4140_p6)  }
 0x166   : > { %2816 = vmatprep.subr.bf16.mxu0 %v4849_v59  ;;  %3062 = vmatprep.subr.bf16.mxu1 %v4852_v60  ;;  %v4900_v58 = vld [vmem:[%s5693_s3 + $0xf8] sm:$0xff] (!%p4140_p6)   ;;  %v3145_v59 = vsub.s32 (!%p4140_p6), 1, %v5119_v45 }
 0x167   : > { %v4901_v60 = vld [vmem:[%s5693_s3 + $0x38] sm:$0xff] (!%p4140_p6)  }
 0x169   : > { %2817 = vmatpush1.bf16.msra.mxu0 %v4847_v61  ;;  %3063 = vmatpush1.bf16.msra.mxu1 %v4850_v62  ;;  %v4902_v61 = vld [vmem:[%s5693_s3 + $0xb8] sm:$0xff] (!%p4140_p6)   ;;  %v3153_v62 = vsub.s32 (!%p4140_p6), 3, %v5119_v45 }
 0x16a   : > { %2818 = vmatprep.subr.bf16.mxu0 %v4855_v63  ;;  %3064 = vmatprep.subr.bf16.mxu1 %v4858_v0  ;;  %v3135_v0 = vld [vmem:[%s5692_s2] sm:$0xf] (!%p4140_p6) }
 0x16d   : > { %2819 = vmatpush1.bf16.msra.mxu0 %v4853_v1  ;;  %3065 = vmatpush1.bf16.msra.mxu1 %v4856_v2  ;;  %v3141_v2 = vsub.s32 (!%p4140_p6), 0, %v5119_v45 }
 0x16e   : > { %2820 = vmatprep.subr.bf16.mxu0 %v4861_v3  ;;  %3066 = vmatprep.subr.bf16.mxu1 %v4864_v4  ;;  %v3149_v3 = vsub.s32 (!%p4140_p6), 2, %v5119_v45  ;;  %v4992_v4 = vmov (!%p4140_p6), 0.0   ;;  %v4904_v45 = vld [vmem:[%s5695_s5 + $0x8] sm:$0xff] (!%p4140_p6)  }
 0x171   : > { %2821 = vmatpush1.bf16.msra.mxu0 %v4859_v5  ;;  %3067 = vmatpush1.bf16.msra.mxu1 %v4862_v6 }
 0x172   : > { %2822 = vmatprep.subr.bf16.mxu0 %v4867_v7  ;;  %3068 = vmatprep.subr.bf16.mxu1 %v4870_v8 }
 0x175   : > { %2823 = vmatpush1.bf16.msra.mxu0 %v4865_v9  ;;  %3069 = vmatpush1.bf16.msra.mxu1 %v4868_v10  ;;  %v4903_v10 = vld [vmem:[%s5695_s5] sm:$0xff] (!%p4140_p6)  }
 0x176   : > { %4191 = vmatprep.subr.bf16.mxu0 (!%p4140_p6), %v4871_v15  ;;  %4213 = vmatprep.subr.bf16.mxu1 (!%p4140_p6), %v4872_v32 }
 0x178   : > { %2841 = vmatmul.mubr.bf16.vlgmr.msra.gmra.mrb[0].mxu0 %v831_v11  ;;  %3087 = vmatmul.mubr.bf16.vlgmr.msra.gmra.mrb[0].mxu1 %v831_v11 }
 0x179   : > { %4214 = vmatpush3.bf16.msra.mxu1 (!%p4140_p6), %v4874_v40 }
 0x17a   : > { %4215 = vmatprep.subr.bf16.mxu1 (!%p4140_p6), %v4876_v34 }
 0x17d   : > { %4216 = vmatpush3.bf16.msra.mxu1 (!%p4140_p6), %v4878_v35 }
 0x17e   : > { %4217 = vmatprep.subr.bf16.mxu1 (!%p4140_p6), %v4880_v37  ;;  %v4912_v37 = vld [vmem:[%s5697_s7 + $0x8] sm:$0xff] (!%p4140_p6)  }
 0x181   : > { %4218 = vmatpush3.bf16.msra.mxu1 (!%p4140_p6), %v4882_v38 }
 0x182   : > { %4219 = vmatprep.subr.bf16.mxu1 (!%p4140_p6), %v4884_v41 }
 0x185   : > { %4220 = vmatpush3.bf16.msra.mxu1 (!%p4140_p6), %v4886_v42 }
 0x186   : > { %4221 = vmatprep.subr.bf16.mxu1 (!%p4140_p6), %v4888_v44 }
 0x189   : > { %4222 = vmatpush3.bf16.msra.mxu1 (!%p4140_p6), %v4890_v31 }
 0x18a   : > { %4223 = vmatprep.subr.bf16.mxu1 (!%p4140_p6), %v4892_v48 }
 0x18d   : > { %4224 = vmatpush3.bf16.msra.mxu1 (!%p4140_p6), %v4894_v50 }
 0x18e   : > { %4225 = vmatprep.subr.bf16.mxu1 (!%p4140_p6), %v4896_v53 }
 0x191   : > { %4226 = vmatpush3.bf16.msra.mxu1 (!%p4140_p6), %v4898_v56 }
 0x192   : > { %4227 = vmatprep.subr.bf16.mxu1 (!%p4140_p6), %v4900_v58 }
 0x195   : > { %4228 = vmatpush3.bf16.msra.mxu1 (!%p4140_p6), %v4902_v61 }
 0x196   : > { %4267 = vmatprep.subr.bf16.mxu1 (!%p4140_p6), %v4992_v4 }
 0x24b   : > { %v2842_v12 = vpop.f32.mrb[0].mxu0  ;;  %v3088_v13 = vpop.f32.mrb[0].mxu1 }
 0x24c   : > { %v2844_v14 = vpop.f32.mrb[1].mxu0  ;;  %v3090_v16 = vpop.f32.mrb[1].mxu1 }
 0x24d   : > { %v3099_v17 = vcombine.low %v2842_v12, %v2844_v14  ;;  %v3100_v19 = vcombine.low %v3088_v13, %v3090_v16  ;;  %v2846_v54 = vpop.f32.mrb[2].mxu0  ;;  %v3092_v20 = vpop.f32.mrb[2].mxu1  ;;  %v4905_v16 = vld [vmem:[%s5695_s5 + $0x10] sm:$0xff] (!%p4140_p6)  }
 0x24e   : > { %v2847_v21 = vpop.f32.mrb[3].mxu0  ;;  %v3093_v22 = vpop.f32.mrb[3].mxu1  ;;  %v4908_v54 = vld [vmem:[%s5695_s5 + $0x28] sm:$0xff] (!%p4140_p6)   ;;  %v4909_v20 = vld [vmem:[%s5695_s5 + $0x30] sm:$0xff] (!%p4140_p6)  }
 0x24f   : > { %v3107_v23 = vrot.slane %v3099_v17, %v5127_v51  ;;  %v3114_v24 = vrot.slane %v3100_v19, %v5127_v51  ;;  %v4906_v17 = vld [vmem:[%s5695_s5 + $0x18] sm:$0xff] (!%p4140_p6)   ;;  %v4907_v19 = vld [vmem:[%s5695_s5 + $0x20] sm:$0xff] (!%p4140_p6)  }
 0x250   : > { %v4910_v21 = vld [vmem:[%s5695_s5 + $0x38] sm:$0xff] (!%p4140_p6)   ;;  %v4911_v22 = vld [vmem:[%s5697_s7] sm:$0xff] (!%p4140_p6)  }
 0x251   : > { %v3115_v25 = vcombine.low %v3107_v23, %v3114_v24  ;;  %3133 = sbr.rel (%p4140_p6) target bundleno = 1911 (0x777), region = 64 }
 0x253   : > { %v3122_v27 = vrot.slane %v3115_v25, %v5127_v51  ;;  %v4873_v51 = vld [vmem:[%s5693_s3] sm:$0xff] (!%p4140_p6)  }
 0x254   : > { %4192 = vmatpush3.bf16.msra.mxu0 (!%p4140_p6), %v4873_v51  ;;  %v3227_v25 = vld [vmem:[%s5694_s4] sm:$0x1] (!%p4140_p6) }
 0x255   : > { %v3124_v29 = vadd.f32 %v3122_v27, %v403_v26  ;;  %4193 = vmatprep.subr.bf16.mxu0 (!%p4140_p6), %v4875_v33 }
 0x257   : > { %3129 = vst.msk [vmem:[#allocation2] sm:$0xf] %vm3127_vm1, %v3124_v29 }
 0x258   : > { %4194 = vmatpush3.bf16.msra.mxu0 %v4877_v18 }
 0x259   : > { %4195 = vmatprep.subr.bf16.mxu0 %v4879_v36 }
 0x25c   : > { %4196 = vmatpush3.bf16.msra.mxu0 %v4881_v28  ;;  %v3518_v28 = vld [vmem:[%s5696_s6] sm:$0x1] }
 0x25d   : > { %4197 = vmatprep.subr.bf16.mxu0 %v4883_v39 }
 0x25e   : > { %v3134_v63 = vld [vmem:[#allocation2] sm:$0xf] }
 0x25f   : > { %v3136_v1 = vadd.f32 %v3135_v0, %v3134_v63 }
 0x260   : > { %4198 = vmatpush3.bf16.msra.mxu0 %v4885_v30 }
 0x261   : > { %4199 = vmatprep.subr.bf16.mxu0 %v4887_v43  ;;  %v3137_v5 = vmax.f32 %v3136_v1, 0.0 }
 0x263   : > { %v3146_v6 = vrot.slane %v3137_v5, %v3145_v59  ;;  %v3154_v7 = vrot.slane %v3137_v5, %v3153_v62  ;;  %v3142_v8 = vrot.slane %v3137_v5, %v3141_v2  ;;  %v3150_v9 = vrot.slane %v3137_v5, %v3149_v3 }
 0x264   : > { %4200 = vmatpush3.bf16.msra.mxu0 %v4889_v46  ;;  %v3613_v46 = vld [vmem:[%s5698_s8] sm:$0x1] }
 0x265   : > { %4201 = vmatprep.subr.bf16.mxu0 %v4891_v47  ;;  %v3160_v11 = vpack.c.bf16 %v3146_v6, %v3146_v6  ;;  %v3162_v12 = vpack.c.bf16 %v3154_v7, %v3154_v7  ;;  %v3159_v13 = vpack.c.bf16 %v3142_v8, %v3142_v8  ;;  %v3161_v14 = vpack.c.bf16 %v3150_v9, %v3150_v9 }
 0x267   : > { %3452 = vmatprep.mubr.bf16.mxu0 %v3160_v11  ;;  %3492 = vmatprep.mubr.bf16.mxu1 %v3162_v12 }
 0x268   : > { %4202 = vmatpush3.bf16.msra.mxu0 %v4893_v49  ;;  %3493 = vmatmul.mubr.bf16.vlgmr.msra.gmra.mrb[0].mxu1 %v3161_v14 }
 0x269   : > { %4203 = vmatprep.subr.bf16.mxu0 %v4895_v52  ;;  %4271 = vmatprep.mubr.msk.bf16.mxu1 %vm4993_vm2, %v4992_v4 }
 0x26a   : > { %4268 = vmatpush3.bf16.msra.mxu1 %v4911_v22 }
 0x26b   : > { %4269 = vmatprep.subr.bf16.mxu1 %v4992_v4 }
 0x26c   : > { %4204 = vmatpush3.bf16.msra.mxu0 %v4897_v55 }
 0x26d   : > { %4205 = vmatprep.subr.bf16.mxu0 %v4899_v57 }
 0x26e   : > { %4270 = vmatpush3.bf16.msra.mxu1 %v4912_v37 }
 0x270   : > { %4206 = vmatpush3.bf16.msra.mxu0 %v4901_v60 }
 0x271   : > { %4247 = vmatprep.subr.bf16.mxu0 %v4992_v4 }
 0x273   : > { %3453 = vmatmul.mubr.bf16.vlgmr.msra.gmra.mrb[0].mxu0 %v3159_v13 }
 0x274   : > { %4248 = vmatpush3.bf16.msra.mxu0 %v4903_v10  ;;  %4263 = vmatprep.mubr.msk.bf16.mxu0 %vm4993_vm2, %v4992_v4 }
 0x275   : > { %4249 = vmatprep.subr.bf16.mxu0 %v4992_v4 }
 0x278   : > { %4250 = vmatpush3.bf16.msra.mxu0 %v4904_v45 }
 0x279   : > { %4251 = vmatprep.subr.bf16.mxu0 %v4992_v4 }
 0x27c   : > { %4252 = vmatpush3.bf16.msra.mxu0 %v4905_v16 }
 0x27d   : > { %4253 = vmatprep.subr.bf16.mxu0 %v4992_v4 }
 0x280   : > { %4254 = vmatpush3.bf16.msra.mxu0 %v4906_v17 }
 0x281   : > { %4255 = vmatprep.subr.bf16.mxu0 %v4992_v4 }
 0x284   : > { %4256 = vmatpush3.bf16.msra.mxu0 %v4907_v19 }
 0x285   : > { %4257 = vmatprep.subr.bf16.mxu0 %v4992_v4 }
 0x288   : > { %4258 = vmatpush3.bf16.msra.mxu0 %v4908_v54 }
 0x289   : > { %4259 = vmatprep.subr.bf16.mxu0 %v4992_v4 }
 0x28c   : > { %4260 = vmatpush3.bf16.msra.mxu0 %v4909_v20 }
 0x28d   : > { %4261 = vmatprep.subr.bf16.mxu0 %v4992_v4 }
 0x290   : > { %4262 = vmatpush3.bf16.msra.mxu0 %v4910_v21 }
 0x33b   : > { %v4229_v24 = vpop.f32.mrb[0].mxu1 }
 0x33c   : > { %v4230_v27 = vpop.f32.mrb[1].mxu1 }
 0x33d   : > { %v4231_v15 = vadd.f32 %v4230_v27, %v4229_v24  ;;  %v4232_v51 = vpop.f32.mrb[2].mxu1 }
 0x33e   : > { %v4233_v33 = vpop.f32.mrb[3].mxu1 }
 0x346   : > { %v4207_v23 = vpop.f32.mrb[0].mxu0 }
 0x347   : > { %v4208_v26 = vpop.f32.mrb[1].mxu0 }
 0x348   : > { %v4209_v29 = vadd.f32 %v4208_v26, %v4207_v23  ;;  %v4210_v32 = vpop.f32.mrb[2].mxu0 }
 0x349   : > { %v4211_v40 = vpop.f32.mrb[3].mxu0 }
 0x34a   : > { %v3455_v34 = vadd.f32 %v4209_v29, %v3227_v25 }
 0x34c   : > { %v3495_v18 = vadd.f32 %v4231_v15, %v3455_v34 }
 0x34e   : > { %v3500_v35 = vmax.f32 %v3495_v18, 0.0 }
 0x350   : > { %v3501_v36 = vpack.c.bf16 %v3500_v35, %v3500_v35 }
 0x352   : > { %4264 = vmatmul.mubr.bf16.vlgmr.msra.gmra.mrb[4].mxu0 %v3501_v36 }
 0x425   : > { %v3601_v38 = vpop.f32.mrb[4].mxu0 }
 0x426   : > { %v3602_v39 = vadd.f32 %v3601_v38, %v3518_v28  ;;  %v4265_v41 = vpop.f32.mrb[5].mxu0 }
 0x427   : > { %v3604_v30 = vpop.f32.mrb[6].mxu0 }
 0x428   : > { %v3607_v42 = vmax.f32 %v3602_v39, 0.0  ;;  %v4266_v43 = vpop.f32.mrb[7].mxu0 }
 0x42a   : > { %v3608_v44 = vpack.c.bf16 %v3607_v42, %v3607_v42 }
 0x42c   : > { %4272 = vmatmul.mubr.msk.bf16.vlgmr.msra.gmra.mrb[4].mxu1 %vm3626_vm3, %v3608_v44 }
 0x4ff   : > { %v3664_v31 = vpop.f32.mrb[4].mxu1 }
 0x500   : > { %v3665_v47 = vadd.f32 %v3664_v31, %v3613_v46  ;;  %v4273_v48 = vpop.f32.mrb[5].mxu1 }
 0x501   : > { %v3667_v49 = vpop.f32.mrb[6].mxu1 }
 0x502   : > { %v4274_v50 = vpop.f32.mrb[7].mxu1  ;;  %v3671_v52 = vsel %vm3670_vm4, %v3665_v47, -inf }
 0x503   : > { %3672 = vmax.xlane.f32.xlu0 %v3671_v52 }
 0x590   : > { %v3673_v53 = vpop.xlane.xlu0 %3672 }
 0x591   : > { %v3674_v55 = vsub.f32 %v3665_v47, %v3673_v53 }
 0x593   : > { %v3675_v56 = vmul.f32 1.442695, %v3674_v55  ;;  %3683 = vst.msk [vmem:[%s5700_s10] sm:$0x1] %vm3670_vm4, %v3674_v55 }
 0x595   : > { %4913 = vpow2.f32 %v3675_v56 }
 0x59f   : > { %v4914_v57 = vpop.eup %4913 }
 0x5a0   : > { %v3677_v58 = vsel %vm3670_vm4, %v4914_v57, 0.0 }
 0x5a1   : > { %3678 = vadd.xlane.f32.xlu0 %v3677_v58 }
 0x62e   : > { %v3679_v59 = vpop.xlane.xlu0 %3678 }
 0x62f   : > { %4915 = vrcp.f32 %v3679_v59 }
 0x639   : > { %v4916_v60 = vpop.eup %4915 }
 0x63a   : > { %v3681_v61 = vmul.f32 %v4916_v60, %v4914_v57 }
 0x63c   : > { %3682 = vst.msk [vmem:[#allocation3] sm:$0x1] %vm3670_vm4, %v3681_v61  ;;  %v3684_v62 = vmul.f32 1.442695, %v3681_v61 }
 0x63e   : > { %4917 = vpow2.f32 %v3684_v62 }
 0x648   : > { %v4918_v63 = vpop.eup %4917 }
 0x649   : > { %v3686_v0 = vsel %vm3670_vm4, %v4918_v63, 0.0 }
 0x64a   : > { %3687 = vadd.xlane.f32.xlu1 %v3686_v0 }
 0x6d7   : > { %v3688_v1 = vpop.xlane.xlu1 %3687 }
 0x6d8   : > { %4919 = vlog2.f32 %v3688_v1 }
 0x6e2   : > { %v4920_v2 = vpop.eup %4919 }
 0x6e3   : > { %v3690_v3 = vmul.f32 0.6931472, %v4920_v2 }
 0x6e5   : > { %v3691_v4 = vsub.f32 %v3681_v61, %v3690_v3 }
 0x6e7   : > { %v3692_v5 = vsel %vm3670_vm4, %v3691_v4, 0.0 }
 0x6e8   : > { %3693 = vadd.xlane.f32.xlu1 %v3692_v5 }
 0x775   : > { %v3694_v6 = vpop.xlane.xlu1 %3693 }
 0x776   : > { %3696 = vst.msk [vmem:[#allocation5] sm:$0x1] %vm3695_vm5, %v3694_v6 }
 0x777 PF: > { %p4323_p7 = scmp.eq.s32.totalorder %s5062_s18, 4  ;;  %s4994_s20 = smov [#allocation3]  }
 0x778   : > { %s3704_s21 = sshll.u32 %s4994_s20, 4  ;;  %s4995_s22 = smov [#allocation5]   ;;  %s3705_s21 = int_to_ptr.vmem [resolvable:$true] %s3704_s21 }
 0x779   : > { %s3718_s23 = sshll.u32 %s4995_s22, 4  ;;  %s4921_s24 = scalar_lea.vmem %s3705_s21, 16  ;;  %s3719_s23 = int_to_ptr.vmem [resolvable:$true] %s3718_s23 }
 0x77a   : > { %p4922_p8 = scmp.ne.s32.totalorder %s3705_s21, %s4921_s24  ;;  %s4927_s25 = scalar_lea.vmem %s3705_s21, 32 }
 0x77b   : > { %p4928_p11 = scmp.lt.s32.totalorder %s3705_s21, %s3705_s21  ;;  %p4929_p12 = scmp.lt.s32.totalorder %s4927_s25, %s4921_s24 }
 0x77c   : > { %p4923_p9 = pnand %p4922_p8, %p4323_p7 }
 0x77d   : > { %p4930_p13 = por %p4929_p12, %p4928_p11 }
 0x77e   : > { %p4924_p10 = pneg %p4923_p9 }
 0x780   : > { %p4931_p0 = pnand %p4930_p13, %p4924_p10 }
 0x782   : > { %4934 = shalt.err (!%p4931_p0)
}
 0x783   : > { %s4935_s28 = scalar_lea.hbm %s5699_s9, 16 }
 0x784   : > { %p4936_p1 = scmp.ne.s32.totalorder %s5699_s9, %s4935_s28  ;;  %p4941_p4 = scmp.lt.u32.totalorder %s4935_s28, %s5699_s9 }
 0x786   : > { %p4937_p2 = pnand %p4936_p1, %p4323_p7 }
 0x788   : > { %p4938_p3 = pneg %p4937_p2 }
 0x78a   : > { %p4943_p5 = pnand %p4941_p4, %p4938_p3 }
 0x78c   : > { %4946 = shalt.err (!%p4943_p5)
}
 0x78d   : > { %4316 = dma.vmem_to_hbm [thread:$0]  (%p4323_p7), %s3705_s21, 16, %s5699_s9, [#allocation4]  }
 0x78e   : > { %s4947_s16 = scalar_lea.vmem %s3719_s23, 16  ;;  %s4953_s19 = scalar_lea.vmem %s3719_s23, 32 }
 0x78f   : > { %p4948_p6 = scmp.ne.s32.totalorder %s3719_s23, %s4947_s16  ;;  %p4954_p10 = scmp.lt.s32.totalorder %s3719_s23, %s3719_s23 }
 0x790   : > { %p4955_p11 = scmp.lt.s32.totalorder %s4953_s19, %s4947_s16 }
 0x791   : > { %p4949_p8 = pnand %p4948_p6, %p4323_p7 }
 0x792   : > { %p4956_p12 = por %p4955_p11, %p4954_p10 }
 0x793   : > { %p4950_p9 = pneg %p4949_p8 }
 0x795   : > { %p4957_p13 = pnand %p4956_p12, %p4950_p9 }
 0x797   : > { %4960 = shalt.err (!%p4957_p13)
}
 0x798   : > { %s4961_s24 = scalar_lea.hbm %s5701_s11, 16 }
 0x799   : > { %p4962_p0 = scmp.ne.s32.totalorder %s5701_s11, %s4961_s24  ;;  %p4967_p3 = scmp.lt.u32.totalorder %s4961_s24, %s5701_s11 }
 0x79b   : > { %p4963_p1 = pnand %p4962_p0, %p4323_p7 }
 0x79d   : > { %p4964_p2 = pneg %p4963_p1 }
 0x79f   : > { %p4969_p4 = pnand %p4967_p3, %p4964_p2 }
 0x7a1   : > { %4972 = shalt.err (!%p4969_p4)
}
 0x7a2   : > { %4318 = dma.vmem_to_hbm [thread:$0]  (%p4323_p7), %s3719_s23, 16, %s5701_s11, [#allocation6]  }
 0x7a3   : > { %4978 = dma.done.wait (%p4323_p7), [#allocation4], 16  }
 0x7a4   : > { %4980 = vsyncadd (%p4323_p7), [#allocation4], 4294967280 }
 0x7a5   : > { %4982 = dma.done.wait (%p4323_p7), [#allocation6], 16  }
 0x7a6   : > { %4984 = vsyncadd (%p4323_p7), [#allocation6], 4294967280 }
 0x7a7 PF: > { %s24_s17 = sadd.s32 1, %s4987_s17  }
 0x7a8   : > { %p21_p5 = scmp.ge.s32.totalorder %s24_s17, 7  }
 0x7aa   :  { %23 = sbr.rel (!%p21_p5) target bundleno = 2 (0x2), region = 110 }
 0x7b1   :  { %3738 = vsyncpa [#allocation4], 1 }
 0x7b2   :  { %3740 = vsyncpa [#allocation4 + $0x1], 1 }
 0x7b3   :  { %3741 = vsyncpa [#allocation6], 1 }

</bundles_post_ra>
